<compile_context>
chip_gen: v7x
topology: tpu7x:2x2x1
jax: 0.10.0
libtpu: 0.0.40
codegen_flags: <defaults>
</compile_context>

<pallas_src>
import functools
import math

import jax
import jax.numpy as jnp
from jax.experimental import pallas as pl
from jax.experimental.pallas import tpu as pltpu


# Explicit scoped-VMEM budget: comfortably under v7x's 64 MiB physical VMEM,
# and raises v5e's 16 MiB default so double-buffering is never starved.
_VMEM_LIMIT_BYTES = 32 * 1024 * 1024


# ----------------------------------------------------------------------------
# Tiling helper: largest tile <= target that divides `dim` and is a multiple
# of `base` (8 for sublane dims, 128 for lane dims); falls back to the full
# dim (always a legal block) for small / awkward sizes.
# ----------------------------------------------------------------------------
def _fit(dim, target, base):
    if dim <= target:
        return dim
    t = (target // base) * base
    while t >= base:
        if dim % t == 0:
            return t
        t -= base
    return dim


# ----------------------------------------------------------------------------
# Tiled linear: y = act(x @ w + b)        (w is bf16, f32 accumulation)
# ----------------------------------------------------------------------------
def _linear_kernel(x_ref, w_ref, b_ref, o_ref, acc_ref, *, activation):
    k = pl.program_id(2)

    @pl.when(k == 0)
    def _():
        acc_ref[...] = jnp.zeros(acc_ref.shape, jnp.float32)

    acc_ref[...] += jnp.dot(
        x_ref[...].astype(jnp.bfloat16),   # no-op when activations are bf16
        w_ref[...],                        # weights pre-cast to bf16 in HBM
        preferred_element_type=jnp.float32,
    )

    @pl.when(k == pl.num_programs(2) - 1)
    def _():
        r = acc_ref[...] + b_ref[...].astype(jnp.float32)
        if activation == "relu":
            r = jnp.maximum(r, 0.0)
        o_ref[...] = r.astype(o_ref.dtype)


def linear(x, w, b, activation=None, out_dtype=None, tm=256, tn=512, tk=512):
    M, K = x.shape
    K2, N = w.shape
    assert K == K2
    out_dtype = out_dtype or x.dtype
    tm = _fit(M, tm, 8)
    tn = _fit(N, tn, 128)
    tk = _fit(K, tk, 128)
    grid = (M // tm, N // tn, K // tk)
    return pl.pallas_call(
        functools.partial(_linear_kernel, activation=activation),
        out_shape=jax.ShapeDtypeStruct((M, N), out_dtype),
        grid_spec=pltpu.PrefetchScalarGridSpec(
            num_scalar_prefetch=0,
            grid=grid,
            in_specs=[
                pl.BlockSpec((tm, tk), lambda i, j, k: (i, k)),
                pl.BlockSpec((tk, tn), lambda i, j, k: (k, j)),
                pl.BlockSpec((1, tn), lambda i, j, k: (0, j)),
            ],
            out_specs=pl.BlockSpec((tm, tn), lambda i, j, k: (i, j)),
            scratch_shapes=[pltpu.VMEM((tm, tn), jnp.float32)],
        ),
        compiler_params=pltpu.CompilerParams(
            dimension_semantics=("parallel", "parallel", "arbitrary"),
            vmem_limit_bytes=_VMEM_LIMIT_BYTES,
        ),
    )(x, w, b.reshape(1, N))


# ----------------------------------------------------------------------------
# Tiled linear fused with residual-add + LayerNorm epilogue:
#   o = LayerNorm(res + x @ w + b) * gamma + beta   (LN over full N = d_model)
# ----------------------------------------------------------------------------
def _linear_res_ln_kernel(x_ref, w_ref, b_ref, res_ref, g_ref, beta_ref,
                          o_ref, acc_ref, *, eps):
    k = pl.program_id(1)

    @pl.when(k == 0)
    def _():
        acc_ref[...] = jnp.zeros(acc_ref.shape, jnp.float32)

    acc_ref[...] += jnp.dot(
        x_ref[...].astype(jnp.bfloat16),
        w_ref[...],                        # bf16 weights
        preferred_element_type=jnp.float32,
    )

    @pl.when(k == pl.num_programs(1) - 1)
    def _():
        z = (res_ref[...].astype(jnp.float32)
             + acc_ref[...]
             + b_ref[...].astype(jnp.float32))
        mean = jnp.mean(z, axis=-1, keepdims=True)
        c = z - mean
        var = jnp.mean(c * c, axis=-1, keepdims=True)
        inv = jax.lax.rsqrt(var + eps)
        o_ref[...] = (c * inv * g_ref[...].astype(jnp.float32)
                      + beta_ref[...].astype(jnp.float32)).astype(o_ref.dtype)


def linear_residual_ln(x, w, b, res, gamma, beta, eps=1e-5, tm=256, tk=512):
    M, K = x.shape
    K2, N = w.shape
    assert K == K2 and res.shape == (M, N)
    tm = _fit(M, tm, 8)
    tk = _fit(K, tk, 128)
    grid = (M // tm, K // tk)
    return pl.pallas_call(
        functools.partial(_linear_res_ln_kernel, eps=eps),
        out_shape=jax.ShapeDtypeStruct((M, N), res.dtype),
        grid_spec=pltpu.PrefetchScalarGridSpec(
            num_scalar_prefetch=0,
            grid=grid,
            in_specs=[
                pl.BlockSpec((tm, tk), lambda i, k: (i, k)),
                pl.BlockSpec((tk, N), lambda i, k: (k, 0)),
                pl.BlockSpec((1, N), lambda i, k: (0, 0)),
                pl.BlockSpec((tm, N), lambda i, k: (i, 0)),
                pl.BlockSpec((1, N), lambda i, k: (0, 0)),
                pl.BlockSpec((1, N), lambda i, k: (0, 0)),
            ],
            out_specs=pl.BlockSpec((tm, N), lambda i, k: (i, 0)),
            scratch_shapes=[pltpu.VMEM((tm, N), jnp.float32)],
        ),
        compiler_params=pltpu.CompilerParams(
            dimension_semantics=("parallel", "arbitrary"),
            vmem_limit_bytes=_VMEM_LIMIT_BYTES,
        ),
    )(x, w, b.reshape(1, N), res, gamma.reshape(1, N), beta.reshape(1, N))


# ----------------------------------------------------------------------------
# Flash-style multi-head attention (online softmax over kv tiles).
# Blocks are lane-dense [t, D] (all heads) taken straight out of the fused
# QKV / KV projection outputs via column-block index_maps (no XLA slice
# copies).  1/sqrt(Dh) is already folded into the Q projection weights.
# ----------------------------------------------------------------------------
def _flash_mha_kernel(q_ref, k_ref, v_ref, o_ref, m_sc, l_sc, acc_sc,
                      *, n_heads):
    ki = pl.program_id(2)

    @pl.when(ki == 0)
    def _():
        m_sc[...] = jnp.full(m_sc.shape, -jnp.inf, jnp.float32)
        l_sc[...] = jnp.zeros(l_sc.shape, jnp.float32)
        acc_sc[...] = jnp.zeros(acc_sc.shape, jnp.float32)

    D = q_ref.shape[-1]
    Dh = D // n_heads

    q_all = q_ref[...].astype(jnp.bfloat16)   # no-op: projections emit bf16
    k_all = k_ref[...].astype(jnp.bfloat16)
    v_all = v_ref[...].astype(jnp.bfloat16)

    # Static unroll over heads: QK^T via dot_general contracting the last dims
    # (no explicit transpose) + per-head online-softmax statistics.
    # NOTE: with Dh < 256 this underfeeds the 256-wide v6e/v7x MXU; a
    # head-major [B, H, L, Dh] layout (head on the grid) would fix that at the
    # cost of an HBM transpose, which is not worth it for d_model-major I/O.
    for h in range(n_heads):
        sl = slice(h * Dh, (h + 1) * Dh)
        s = jax.lax.dot_general(
            q_all[:, sl], k_all[:, sl],
            dimension_numbers=(((1,), (1,)), ((), ())),
            preferred_element_type=jnp.float32)               # [tq, tkv] f32
        m_prev = m_sc[h]                                      # [tq, 1]
        m_new = jnp.maximum(m_prev, s.max(axis=-1, keepdims=True))
        alpha = jnp.exp(m_prev - m_new)
        p = jnp.exp(s - m_new)
        l_sc[h] = alpha * l_sc[h] + p.sum(axis=-1, keepdims=True)
        acc_sc[h] = alpha * acc_sc[h] + jnp.dot(
            p.astype(jnp.bfloat16), v_all[:, sl],
            preferred_element_type=jnp.float32)               # [tq, Dh]
        m_sc[h] = m_new

    @pl.when(ki == pl.num_programs(2) - 1)
    def _():
        # Exact reciprocal (runs once per q tile) and ONE lane-dense [tq, D]
        # store instead of n_heads masked Dh-wide stores.
        parts = [acc_sc[h] / l_sc[h] for h in range(n_heads)]
        o_ref[...] = jnp.concatenate(parts, axis=-1).astype(o_ref.dtype)


def flash_mha(q_src, k_src, v_src, n_heads, d_model,
              q_col=0, k_col=0, v_col=0, tq=128, tkv=256):
    """q_src: [B, Lq, nq*D]; k_src/v_src: [B, Lk, n*D].  *_col selects which
    D-wide column block holds q / k / v (e.g. fused QKV output -> 0/1/2)."""
    D = d_model
    if D % 128 != 0:
        # Unaligned d_model: D-wide lane-offset blocks would violate (8,128)
        # tiling; fall back to XLA column slices (tiny shapes only).
        def col(a, c):
            return jax.lax.slice_in_dim(a, c * D, (c + 1) * D, axis=2)
        q_src, k_src, v_src = col(q_src, q_col), col(k_src, k_col), col(v_src, v_col)
        q_col = k_col = v_col = 0

    B, Lq, _ = q_src.shape
    _, Lk, _ = k_src.shape
    assert D % n_heads == 0
    Dh = D // n_heads
    tq = _fit(Lq, tq, 8)
    tkv = _fit(Lk, tkv, 128)          # keep the score lane dim 128-aligned
    grid = (B, Lq // tq, Lk // tkv)
    return pl.pallas_call(
        functools.partial(_flash_mha_kernel, n_heads=n_heads),
        out_shape=jax.ShapeDtypeStruct((B, Lq, D), jnp.bfloat16),
        grid_spec=pltpu.PrefetchScalarGridSpec(
            num_scalar_prefetch=0,
            grid=grid,
            in_specs=[
                pl.BlockSpec((None, tq, D), lambda b, qi, ki: (b, qi, q_col)),
                pl.BlockSpec((None, tkv, D), lambda b, qi, ki: (b, ki, k_col)),
                pl.BlockSpec((None, tkv, D), lambda b, qi, ki: (b, ki, v_col)),
            ],
            out_specs=pl.BlockSpec((None, tq, D), lambda b, qi, ki: (b, qi, 0)),
            scratch_shapes=[
                pltpu.VMEM((n_heads, tq, 1), jnp.float32),    # running max
                pltpu.VMEM((n_heads, tq, 1), jnp.float32),    # running sum
                pltpu.VMEM((n_heads, tq, Dh), jnp.float32),   # out accumulator
            ],
        ),
        compiler_params=pltpu.CompilerParams(
            dimension_semantics=("parallel", "parallel", "arbitrary"),
            vmem_limit_bytes=_VMEM_LIMIT_BYTES,
        ),
    )(q_src, k_src, v_src)


# ----------------------------------------------------------------------------
# DecoderLayer forward (kernel params from prepare_params: bf16 weights,
# 1/sqrt(Dh) folded into the Q projection).
# ----------------------------------------------------------------------------
def decoder_layer(x, cross, kparams, n_heads, eps=1e-5):
    # NOTE: at tiny shapes (B*L ~ 16) the six pallas_calls are launch-overhead
    # bound; this structure targets realistic d_model / sequence lengths.
    B, L, D = x.shape
    _, Lc, _ = cross.shape
    x2d = x.reshape(B * L, D)
    sa_p, ca_p = kparams["self_attn"], kparams["cross_attn"]

    # --- self attention: fused QKV projection (bf16 out), flash attention fed
    #     directly from the fused array (column blocks 0/1/2), output
    #     projection fused with residual + LayerNorm1 ------------------------
    qkv = linear(x2d, sa_p["w_qkv"], sa_p["b_qkv"],
                 out_dtype=jnp.bfloat16, tn=min(3 * D, 1536))   # [B*L, 3D]
    qkv3 = qkv.reshape(B, L, 3 * D)                              # free reshape
    sa = flash_mha(qkv3, qkv3, qkv3, n_heads, D,
                   q_col=0, k_col=1, v_col=2).reshape(B * L, D)
    x1 = linear_residual_ln(sa, sa_p["wo"], sa_p["bo"], x2d,
                            kparams["ln1_g"], kparams["ln1_b"], eps)

    # --- cross attention: fused KV projection of `cross`, flash attention
    #     (k = column 0, v = column 1), output projection fused with
    #     residual + LayerNorm2 ----------------------------------------------
    qc = linear(x1, ca_p["wq"], ca_p["bq"],
                out_dtype=jnp.bfloat16).reshape(B, L, D)
    kv = linear(cross.reshape(B * Lc, D), ca_p["w_kv"], ca_p["b_kv"],
                out_dtype=jnp.bfloat16, tn=min(2 * D, 1024)).reshape(B, Lc, 2 * D)
    ca = flash_mha(qc, kv, kv, n_heads, D,
                   q_col=0, k_col=0, v_col=1).reshape(B * L, D)
    x2 = linear_residual_ln(ca, ca_p["wo"], ca_p["bo"], x1,
                            kparams["ln2_g"], kparams["ln2_b"], eps)

    # --- FFN: conv1(k=1) -> relu -> conv2(k=1) == per-token Linear;
    #     second linear fused with residual + LayerNorm3 ----------------------
    y = linear(x2, kparams["w1"], kparams["b1"], activation="relu",
               out_dtype=jnp.bfloat16)
    out = linear_residual_ln(y, kparams["w2"], kparams["b2"], x2,
                             kparams["ln3_g"], kparams["ln3_b"], eps)
    return out.reshape(B, L, D)


# ----------------------------------------------------------------------------
# Parameter init (f32, fused-weight layout) + kernel-side preparation
# ----------------------------------------------------------------------------
def init_params(key, d_model, d_ff):
    ks = jax.random.split(key, 20)
    s = 1.0 / math.sqrt(d_model)

    def w(k, shape, scale):
        return jax.random.normal(k, shape, jnp.float32) * scale

    return {
        "self_attn": {
            "w_qkv": w(ks[0], (d_model, 3 * d_model), s),
            "b_qkv": w(ks[1], (3 * d_model,), 0.5),
            "wo": w(ks[2], (d_model, d_model), s),
            "bo": w(ks[3], (d_model,), 0.5),
        },
        "cross_attn": {
            "wq": w(ks[4], (d_model, d_model), s),
            "bq": w(ks[5], (d_model,), 0.5),
            "w_kv": w(ks[6], (d_model, 2 * d_model), s),
            "b_kv": w(ks[7], (2 * d_model,), 0.5),
            "wo": w(ks[8], (d_model, d_model), s),
            "bo": w(ks[9], (d_model,), 0.5),
        },
        "w1": w(ks[10], (d_model, d_ff), s),
        "b1": w(ks[11], (d_ff,), 0.5),
        "w2": w(ks[12], (d_ff, d_model), 1.0 / math.sqrt(d_ff)),
        "b2": w(ks[13], (d_model,), 0.5),
        "ln1_g": 1.0 + w(ks[14], (d_model,), 0.2),
        "ln1_b": w(ks[15], (d_model,), 0.2),
        "ln2_g": 1.0 + w(ks[16], (d_model,), 0.2),
        "ln2_b": w(ks[17], (d_model,), 0.2),
        "ln3_g": 1.0 + w(ks[18], (d_model,), 0.2),
        "ln3_b": w(ks[19], (d_model,), 0.2),
    }


def prepare_params(params, d_model, n_heads):
    """Kernel-side params: 1/sqrt(Dh) folded into the Q projection, matmul
    weights pre-cast to bf16 (halves the HBM weight stream, MXU-native);
    biases / LN params stay f32."""
    scale = 1.0 / math.sqrt(d_model // n_heads)
    bf = lambda a: a.astype(jnp.bfloat16)
    sa, ca = params["self_attn"], params["cross_attn"]
    w_qkv = sa["w_qkv"].at[:, :d_model].multiply(scale)
    b_qkv = sa["b_qkv"].at[:d_model].multiply(scale)
    out = {
        "self_attn": {
            "w_qkv": bf(w_qkv), "b_qkv": b_qkv,
            "wo": bf(sa["wo"]), "bo": sa["bo"],
        },
        "cross_attn": {
            "wq": bf(ca["wq"] * scale), "bq": ca["bq"] * scale,
            "w_kv": bf(ca["w_kv"]), "b_kv": ca["b_kv"],
            "wo": bf(ca["wo"]), "bo": ca["bo"],
        },
        "w1": bf(params["w1"]), "b1": params["b1"],
        "w2": bf(params["w2"]), "b2": params["b2"],
    }
    for k in ("ln1_g", "ln1_b", "ln2_g", "ln2_b", "ln3_g", "ln3_b"):
        out[k] = params[k]
    return out


# ----------------------------------------------------------------------------
# Pure-JAX (f32) reference for correctness checking
# ----------------------------------------------------------------------------
def _mha_ref(q, k, v, n_heads):
    B, Lq, D = q.shape
    Lk = k.shape[1]
    Dh = D // n_heads
    qh = q.reshape(B, Lq, n_heads, Dh)
    kh = k.reshape(B, Lk, n_heads, Dh)
    vh = v.reshape(B, Lk, n_heads, Dh)
    s = jnp.einsum("bqhd,bkhd->bhqk", qh, kh) / math.sqrt(Dh)
    p = jax.nn.softmax(s, axis=-1)
    o = jnp.einsum("bhqk,bkhd->bqhd", p, vh)
    return o.reshape(B, Lq, D)


def decoder_layer_ref(x, cross, params, n_heads, eps=1e-5):
    sa_p, ca_p = params["self_attn"], params["cross_attn"]

    def ln(z, g, b):
        mu = z.mean(-1, keepdims=True)
        var = ((z - mu) ** 2).mean(-1, keepdims=True)
        return (z - mu) * jax.lax.rsqrt(var + eps) * g + b

    qkv = x @ sa_p["w_qkv"] + sa_p["b_qkv"]
    q, k, v = jnp.split(qkv, 3, axis=-1)
    x1 = ln(x + _mha_ref(q, k, v, n_heads) @ sa_p["wo"] + sa_p["bo"],
            params["ln1_g"], params["ln1_b"])

    qc = x1 @ ca_p["wq"] + ca_p["bq"]
    kvc = cross @ ca_p["w_kv"] + ca_p["b_kv"]
    kc, vc = jnp.split(kvc, 2, axis=-1)
    x2 = ln(x1 + _mha_ref(qc, kc, vc, n_heads) @ ca_p["wo"] + ca_p["bo"],
            params["ln2_g"], params["ln2_b"])

    y = jnp.maximum(x2 @ params["w1"] + params["b1"], 0.0)
    y = y @ params["w2"] + params["b2"]
    return ln(x2 + y, params["ln3_g"], params["ln3_b"])


def _round_weights_bf16(params):
    """Reference params with matmul weights rounded to bf16 (so the reference
    matches the kernel's weight precision; isolates implementation errors)."""
    rb = lambda a: a.astype(jnp.bfloat16).astype(jnp.float32)
    p = dict(params)
    p["self_attn"] = dict(params["self_attn"])
    p["cross_attn"] = dict(params["cross_attn"])
    for k in ("w_qkv", "wo"):
        p["self_attn"][k] = rb(p["self_attn"][k])
    for k in ("wq", "w_kv", "wo"):
        p["cross_attn"][k] = rb(p["cross_attn"][k])
    for k in ("w1", "w2"):
        p[k] = rb(p[k])
    return p


if __name__ == "__main__":
    # d_model chosen as a multiple of 128 so the fused-QKV column BlockSpecs
    # are lane-aligned (the production layout); shapes kept small otherwise.
    B, L, L_cross, d_model, n_heads = 2, 8, 16, 128, 4
    d_ff = 4 * d_model

    key = jax.random.PRNGKey(0)
    k_x, k_c, k_p = jax.random.split(key, 3)
    x = jax.random.normal(k_x, (B, L, d_model), jnp.float32)
    cross = jax.random.normal(k_c, (B, L_cross, d_model), jnp.float32)
    params = init_params(k_p, d_model, d_ff)
    kparams = prepare_params(params, d_model, n_heads)

    fwd = jax.jit(functools.partial(decoder_layer, n_heads=n_heads))
    out = fwd(x, cross, kparams)
    jax.block_until_ready(out)
    assert out.shape == (B, L, d_model)

    # Reference uses the same bf16-rounded weights; remaining differences come
    # only from bf16 activation casts at kernel boundaries / MXU inputs.
    ref = decoder_layer_ref(x, cross, _round_weights_bf16(params), n_heads)
    err = float(jnp.max(jnp.abs(out - ref)))
    assert err < 5e-2, f"mismatch vs bf16-weight reference: max abs err = {err}"
    print("KERNEL_OK")
</pallas_src>

<mosaic_0001>
module attributes {stable_mosaic.version = 11 : i64} {
  func.func @_linear_kernel(%arg0: i32, %arg1: i32, %arg2: i32, %arg3: memref<16x128xf32, #tpu.memory_space<vmem>>, %arg4: memref<128x384xbf16, #tpu.memory_space<vmem>>, %arg5: memref<1x384xf32, #tpu.memory_space<vmem>>, %arg6: memref<16x384xbf16, #tpu.memory_space<vmem>>, %arg7: memref<16x384xf32, #tpu.memory_space<vmem>>) attributes {dimension_semantics = [#tpu.dimension_semantics<parallel>, #tpu.dimension_semantics<parallel>, #tpu.dimension_semantics<arbitrary>], iteration_bounds = array<i64: 1, 1, 1>, scalar_prefetch = 0 : i64, scratch_operands = 1 : i64, tpu.core_type = #tpu.core_type<tc>, window_params = [{transform_indices = @transform_0, window_bounds = array<i64: 16, 128>}, {transform_indices = @transform_1, window_bounds = array<i64: 128, 384>}, {transform_indices = @transform_2, window_bounds = array<i64: 1, 384>}, {transform_indices = @transform_3, window_bounds = array<i64: 16, 384>}]} {
    %c0_i32 = arith.constant 0 : i32
    %0 = arith.cmpi eq, %arg2, %c0_i32 : i32
    %1 = arith.extui %0 : i1 to i32
    %c0_i32_0 = arith.constant 0 : i32
    %2 = arith.cmpi ne, %1, %c0_i32_0 : i32
    scf.if %2 {
      %cst_10 = arith.constant 0.000000e+00 : f32
      %13 = vector.broadcast %cst_10 : f32 to vector<16x384xf32>
      %c0_11 = arith.constant 0 : index
      %c0_12 = arith.constant 0 : index
      %14 = vector.load %arg7[%c0_11, %c0_12] : memref<16x384xf32, #tpu.memory_space<vmem>>, vector<16x384xf32>
      tpu.vector_store %arg7[%c0_11, %c0_12], %13 {strides = array<i32>} : memref<16x384xf32, #tpu.memory_space<vmem>>, vector<16x384xf32>,
    } else {
    }
    %c0 = arith.constant 0 : index
    %c0_1 = arith.constant 0 : index
    %3 = vector.load %arg7[%c0, %c0_1] : memref<16x384xf32, #tpu.memory_space<vmem>>, vector<16x384xf32>
    %c0_2 = arith.constant 0 : index
    %c0_3 = arith.constant 0 : index
    %4 = vector.load %arg3[%c0_2, %c0_3] : memref<16x128xf32, #tpu.memory_space<vmem>>, vector<16x128xf32>
    %5 = arith.truncf %4 : vector<16x128xf32> to vector<16x128xbf16>
    %c0_4 = arith.constant 0 : index
    %c0_5 = arith.constant 0 : index
    %6 = vector.load %arg4[%c0_4, %c0_5] : memref<128x384xbf16, #tpu.memory_space<vmem>>, vector<128x384xbf16>
    %cst = arith.constant dense<0.000000e+00> : vector<16x384xf32>
    %7 = tpu.matmul %5, %6, %cst {dimension_numbers = #tpu.dot_dimension_numbers<[1], [0], [0], [1], [0, 0, 1, 1], [], []>} : vector<16x128xbf16>, vector<128x384xbf16>, vector<16x384xf32> -> vector<16x384xf32>
    %8 = arith.addf %3, %7 : vector<16x384xf32>
    %c0_6 = arith.constant 0 : index
    %c0_7 = arith.constant 0 : index
    %9 = vector.load %arg7[%c0_6, %c0_7] : memref<16x384xf32, #tpu.memory_space<vmem>>, vector<16x384xf32>
    tpu.vector_store %arg7[%c0_6, %c0_7], %8 {strides = array<i32>} : memref<16x384xf32, #tpu.memory_space<vmem>>, vector<16x384xf32>,
    %c0_i32_8 = arith.constant 0 : i32
    %10 = arith.cmpi eq, %arg2, %c0_i32_8 : i32
    %11 = arith.extui %10 : i1 to i32
    %c0_i32_9 = arith.constant 0 : i32
    %12 = arith.cmpi ne, %11, %c0_i32_9 : i32
    scf.if %12 {
      %c0_10 = arith.constant 0 : index
      %c0_11 = arith.constant 0 : index
      %13 = vector.load %arg7[%c0_10, %c0_11] : memref<16x384xf32, #tpu.memory_space<vmem>>, vector<16x384xf32>
      %c0_12 = arith.constant 0 : index
      %c0_13 = arith.constant 0 : index
      %14 = vector.load %arg5[%c0_12, %c0_13] : memref<1x384xf32, #tpu.memory_space<vmem>>, vector<1x384xf32>
      %15 = vector.broadcast %14 : vector<1x384xf32> to vector<16x384xf32>
      %16 = arith.addf %13, %15 : vector<16x384xf32>
      %17 = arith.truncf %16 : vector<16x384xf32> to vector<16x384xbf16>
      %c0_14 = arith.constant 0 : index
      %c0_15 = arith.constant 0 : index
      %18 = vector.load %arg6[%c0_14, %c0_15] : memref<16x384xbf16, #tpu.memory_space<vmem>>, vector<16x384xbf16>
      tpu.vector_store %arg6[%c0_14, %c0_15], %17 {strides = array<i32>} : memref<16x384xbf16, #tpu.memory_space<vmem>>, vector<16x384xbf16>,
    } else {
    }
    return
  }
  func.func @transform_0(%arg0: i32, %arg1: i32, %arg2: i32) -> (i32, i32) {
    %c0_i32 = arith.constant 0 : i32
    return %arg0, %arg2 : i32, i32
  }
  func.func @transform_1(%arg0: i32, %arg1: i32, %arg2: i32) -> (i32, i32) {
    %c0_i32 = arith.constant 0 : i32
    return %arg2, %arg1 : i32, i32
  }
  func.func @transform_2(%arg0: i32, %arg1: i32, %arg2: i32) -> (i32, i32) {
    %c0_i32 = arith.constant 0 : i32
    %c0_i32_0 = arith.constant 0 : i32
    return %c0_i32, %arg1 : i32, i32
  }
  func.func @transform_3(%arg0: i32, %arg1: i32, %arg2: i32) -> (i32, i32) {
    %c0_i32 = arith.constant 0 : i32
    return %arg0, %arg1 : i32, i32
  }
}

module attributes {stable_mosaic.version = 11 : i64} {
  func.func @_flash_mha_kernel(%arg0: i32, %arg1: i32, %arg2: i32, %arg3: memref<1x8x128xbf16, #tpu.memory_space<vmem>>, %arg4: memref<1x8x128xbf16, #tpu.memory_space<vmem>>, %arg5: memref<1x8x128xbf16, #tpu.memory_space<vmem>>, %arg6: memref<1x8x128xbf16, #tpu.memory_space<vmem>>, %arg7: memref<4x8x1xf32, #tpu.memory_space<vmem>>, %arg8: memref<4x8x1xf32, #tpu.memory_space<vmem>>, %arg9: memref<4x8x32xf32, #tpu.memory_space<vmem>>) attributes {dimension_semantics = [#tpu.dimension_semantics<parallel>, #tpu.dimension_semantics<parallel>, #tpu.dimension_semantics<arbitrary>], iteration_bounds = array<i64: 2, 1, 1>, scalar_prefetch = 0 : i64, scratch_operands = 3 : i64, tpu.core_type = #tpu.core_type<tc>, window_params = [{transform_indices = @transform_0, window_bounds = array<i64: 1, 8, 128>}, {transform_indices = @transform_1, window_bounds = array<i64: 1, 8, 128>}, {transform_indices = @transform_2, window_bounds = array<i64: 1, 8, 128>}, {transform_indices = @transform_3, window_bounds = array<i64: 1, 8, 128>}]} {
    %c0_i32 = arith.constant 0 : i32
    %0 = arith.cmpi eq, %arg2, %c0_i32 : i32
    %1 = arith.extui %0 : i1 to i32
    %c0_i32_0 = arith.constant 0 : i32
    %2 = arith.cmpi ne, %1, %c0_i32_0 : i32
    scf.if %2 {
      %cst_95 = arith.constant 0xFF800000 : f32
      %156 = vector.broadcast %cst_95 : f32 to vector<4x8x1xf32>
      %c0_96 = arith.constant 0 : index
      %c0_97 = arith.constant 0 : index
      %c0_98 = arith.constant 0 : index
      %157 = vector.load %arg7[%c0_96, %c0_97, %c0_98] : memref<4x8x1xf32, #tpu.memory_space<vmem>>, vector<4x8x1xf32>
      tpu.vector_store %arg7[%c0_96, %c0_97, %c0_98], %156 {strides = array<i32>} : memref<4x8x1xf32, #tpu.memory_space<vmem>>, vector<4x8x1xf32>,
      %cst_99 = arith.constant 0.000000e+00 : f32
      %158 = vector.broadcast %cst_99 : f32 to vector<4x8x1xf32>
      %c0_100 = arith.constant 0 : index
      %c0_101 = arith.constant 0 : index
      %c0_102 = arith.constant 0 : index
      %159 = vector.load %arg8[%c0_100, %c0_101, %c0_102] : memref<4x8x1xf32, #tpu.memory_space<vmem>>, vector<4x8x1xf32>
      tpu.vector_store %arg8[%c0_100, %c0_101, %c0_102], %158 {strides = array<i32>} : memref<4x8x1xf32, #tpu.memory_space<vmem>>, vector<4x8x1xf32>,
      %cst_103 = arith.constant 0.000000e+00 : f32
      %160 = vector.broadcast %cst_103 : f32 to vector<4x8x32xf32>
      %c0_104 = arith.constant 0 : index
      %c0_105 = arith.constant 0 : index
      %c0_106 = arith.constant 0 : index
      %161 = vector.load %arg9[%c0_104, %c0_105, %c0_106] : memref<4x8x32xf32, #tpu.memory_space<vmem>>, vector<4x8x32xf32>
      tpu.vector_store %arg9[%c0_104, %c0_105, %c0_106], %160 {strides = array<i32>} : memref<4x8x32xf32, #tpu.memory_space<vmem>>, vector<4x8x32xf32>,
    } else {
    }
    %c0 = arith.constant 0 : index
    %c0_1 = arith.constant 0 : index
    %c0_2 = arith.constant 0 : index
    %3 = vector.load %arg3[%c0, %c0_1, %c0_2] : memref<1x8x128xbf16, #tpu.memory_space<vmem>>, vector<1x8x128xbf16>
    %4 = vector.shape_cast %3 : vector<1x8x128xbf16> to vector<8x128xbf16>
    %c0_3 = arith.constant 0 : index
    %c0_4 = arith.constant 0 : index
    %c0_5 = arith.constant 0 : index
    %5 = vector.load %arg4[%c0_3, %c0_4, %c0_5] : memref<1x8x128xbf16, #tpu.memory_space<vmem>>, vector<1x8x128xbf16>
    %6 = vector.shape_cast %5 : vector<1x8x128xbf16> to vector<8x128xbf16>
    %c0_6 = arith.constant 0 : index
    %c0_7 = arith.constant 0 : index
    %c0_8 = arith.constant 0 : index
    %7 = vector.load %arg5[%c0_6, %c0_7, %c0_8] : memref<1x8x128xbf16, #tpu.memory_space<vmem>>, vector<1x8x128xbf16>
    %8 = vector.shape_cast %7 : vector<1x8x128xbf16> to vector<8x128xbf16>
    %9 = vector.extract_strided_slice %4 {offsets = [0, 0], sizes = [8, 32], strides = [1, 1]} : vector<8x128xbf16> to vector<8x32xbf16>
    %10 = vector.extract_strided_slice %6 {offsets = [0, 0], sizes = [8, 32], strides = [1, 1]} : vector<8x128xbf16> to vector<8x32xbf16>
    %cst = arith.constant dense<0.000000e+00> : vector<8x8xf32>
    %11 = tpu.matmul %9, %10, %cst {dimension_numbers = #tpu.dot_dimension_numbers<[1], [1], [0], [0], [0, 0, 1, 0], [], []>} : vector<8x32xbf16>, vector<8x32xbf16>, vector<8x8xf32> -> vector<8x8xf32>
    %c0_9 = arith.constant 0 : index
    %c0_10 = arith.constant 0 : index
    %c0_11 = arith.constant 0 : index
    %12 = vector.load %arg7[%c0_9, %c0_10, %c0_11] : memref<4x8x1xf32, #tpu.memory_space<vmem>>, vector<1x8x1xf32>
    %13 = vector.shape_cast %12 : vector<1x8x1xf32> to vector<8x1xf32>
    %cst_12 = arith.constant dense<0xFF800000> : vector<8xf32>
    %14 = vector.multi_reduction <maximumf>, %11, %cst_12 [1] : vector<8x8xf32> to vector<8xf32>
    %15 = vector.shape_cast %14 : vector<8xf32> to vector<8x1xf32>
    %16 = arith.maximumf %13, %15 : vector<8x1xf32>
    %17 = arith.subf %13, %16 : vector<8x1xf32>
    %18 = math.exp %17 : vector<8x1xf32>
    %19 = vector.broadcast %16 : vector<8x1xf32> to vector<8x8xf32>
    %20 = arith.subf %11, %19 : vector<8x8xf32>
    %21 = math.exp %20 : vector<8x8xf32>
    %c0_13 = arith.constant 0 : index
    %c0_14 = arith.constant 0 : index
    %c0_15 = arith.constant 0 : index
    %22 = vector.load %arg8[%c0_13, %c0_14, %c0_15] : memref<4x8x1xf32, #tpu.memory_space<vmem>>, vector<1x8x1xf32>
    %23 = vector.shape_cast %22 : vector<1x8x1xf32> to vector<8x1xf32>
    %24 = arith.mulf %18, %23 : vector<8x1xf32>
    %cst_16 = arith.constant dense<0.000000e+00> : vector<8xf32>
    %25 = vector.multi_reduction <add>, %21, %cst_16 [1] : vector<8x8xf32> to vector<8xf32>
    %26 = vector.shape_cast %25 : vector<8xf32> to vector<8x1xf32>
    %27 = arith.addf %24, %26 : vector<8x1xf32>
    %c0_17 = arith.constant 0 : index
    %c0_18 = arith.constant 0 : index
    %c0_19 = arith.constant 0 : index
    %28 = vector.load %arg8[%c0_17, %c0_18, %c0_19] : memref<4x8x1xf32, #tpu.memory_space<vmem>>, vector<1x8x1xf32>
    %29 = vector.shape_cast %28 : vector<1x8x1xf32> to vector<8x1xf32>
    %30 = vector.shape_cast %27 : vector<8x1xf32> to vector<1x8x1xf32>
    tpu.vector_store %arg8[%c0_17, %c0_18, %c0_19], %30 {strides = array<i32>} : memref<4x8x1xf32, #tpu.memory_space<vmem>>, vector<1x8x1xf32>,
    %c0_20 = arith.constant 0 : index
    %c0_21 = arith.constant 0 : index
    %c0_22 = arith.constant 0 : index
    %31 = vector.load %arg9[%c0_20, %c0_21, %c0_22] : memref<4x8x32xf32, #tpu.memory_space<vmem>>, vector<1x8x32xf32>
    %32 = vector.shape_cast %31 : vector<1x8x32xf32> to vector<8x32xf32>
    %33 = vector.broadcast %18 : vector<8x1xf32> to vector<8x32xf32>
    %34 = arith.mulf %33, %32 : vector<8x32xf32>
    %35 = arith.truncf %21 : vector<8x8xf32> to vector<8x8xbf16>
    %36 = vector.extract_strided_slice %8 {offsets = [0, 0], sizes = [8, 32], strides = [1, 1]} : vector<8x128xbf16> to vector<8x32xbf16>
    %cst_23 = arith.constant dense<0.000000e+00> : vector<8x32xf32>
    %37 = tpu.matmul %35, %36, %cst_23 {dimension_numbers = #tpu.dot_dimension_numbers<[1], [0], [0], [1], [0, 0, 1, 1], [], []>} : vector<8x8xbf16>, vector<8x32xbf16>, vector<8x32xf32> -> vector<8x32xf32>
    %38 = arith.addf %34, %37 : vector<8x32xf32>
    %c0_24 = arith.constant 0 : index
    %c0_25 = arith.constant 0 : index
    %c0_26 = arith.constant 0 : index
    %39 = vector.load %arg9[%c0_24, %c0_25, %c0_26] : memref<4x8x32xf32, #tpu.memory_space<vmem>>, vector<1x8x32xf32>
    %40 = vector.shape_cast %39 : vector<1x8x32xf32> to vector<8x32xf32>
    %41 = vector.shape_cast %38 : vector<8x32xf32> to vector<1x8x32xf32>
    tpu.vector_store %arg9[%c0_24, %c0_25, %c0_26], %41 {strides = array<i32>} : memref<4x8x32xf32, #tpu.memory_space<vmem>>, vector<1x8x32xf32>,
    %c0_27 = arith.constant 0 : index
    %c0_28 = arith.constant 0 : index
    %c0_29 = arith.constant 0 : index
    %42 = vector.load %arg7[%c0_27, %c0_28, %c0_29] : memref<4x8x1xf32, #tpu.memory_space<vmem>>, vector<1x8x1xf32>
    %43 = vector.shape_cast %42 : vector<1x8x1xf32> to vector<8x1xf32>
    %44 = vector.shape_cast %16 : vector<8x1xf32> to vector<1x8x1xf32>
    tpu.vector_store %arg7[%c0_27, %c0_28, %c0_29], %44 {strides = array<i32>} : memref<4x8x1xf32, #tpu.memory_space<vmem>>, vector<1x8x1xf32>,
    %45 = vector.extract_strided_slice %4 {offsets = [0, 32], sizes = [8, 32], strides = [1, 1]} : vector<8x128xbf16> to vector<8x32xbf16>
    %46 = vector.extract_strided_slice %6 {offsets = [0, 32], sizes = [8, 32], strides = [1, 1]} : vector<8x128xbf16> to vector<8x32xbf16>
    %cst_30 = arith.constant dense<0.000000e+00> : vector<8x8xf32>
    %47 = tpu.matmul %45, %46, %cst_30 {dimension_numbers = #tpu.dot_dimension_numbers<[1], [1], [0], [0], [0, 0, 1, 0], [], []>} : vector<8x32xbf16>, vector<8x32xbf16>, vector<8x8xf32> -> vector<8x8xf32>
    %c1 = arith.constant 1 : index
    %c0_31 = arith.constant 0 : index
    %c0_32 = arith.constant 0 : index
    %48 = vector.load %arg7[%c1, %c0_31, %c0_32] : memref<4x8x1xf32, #tpu.memory_space<vmem>>, vector<1x8x1xf32>
    %49 = vector.shape_cast %48 : vector<1x8x1xf32> to vector<8x1xf32>
    %cst_33 = arith.constant dense<0xFF800000> : vector<8xf32>
    %50 = vector.multi_reduction <maximumf>, %47, %cst_33 [1] : vector<8x8xf32> to vector<8xf32>
    %51 = vector.shape_cast %50 : vector<8xf32> to vector<8x1xf32>
    %52 = arith.maximumf %49, %51 : vector<8x1xf32>
    %53 = arith.subf %49, %52 : vector<8x1xf32>
    %54 = math.exp %53 : vector<8x1xf32>
    %55 = vector.broadcast %52 : vector<8x1xf32> to vector<8x8xf32>
    %56 = arith.subf %47, %55 : vector<8x8xf32>
    %57 = math.exp %56 : vector<8x8xf32>
    %c1_34 = arith.constant 1 : index
    %c0_35 = arith.constant 0 : index
    %c0_36 = arith.constant 0 : index
    %58 = vector.load %arg8[%c1_34, %c0_35, %c0_36] : memref<4x8x1xf32, #tpu.memory_space<vmem>>, vector<1x8x1xf32>
    %59 = vector.shape_cast %58 : vector<1x8x1xf32> to vector<8x1xf32>
    %60 = arith.mulf %54, %59 : vector<8x1xf32>
    %cst_37 = arith.constant dense<0.000000e+00> : vector<8xf32>
    %61 = vector.multi_reduction <add>, %57, %cst_37 [1] : vector<8x8xf32> to vector<8xf32>
    %62 = vector.shape_cast %61 : vector<8xf32> to vector<8x1xf32>
    %63 = arith.addf %60, %62 : vector<8x1xf32>
    %c1_38 = arith.constant 1 : index
    %c0_39 = arith.constant 0 : index
    %c0_40 = arith.constant 0 : index
    %64 = vector.load %arg8[%c1_38, %c0_39, %c0_40] : memref<4x8x1xf32, #tpu.memory_space<vmem>>, vector<1x8x1xf32>
    %65 = vector.shape_cast %64 : vector<1x8x1xf32> to vector<8x1xf32>
    %66 = vector.shape_cast %63 : vector<8x1xf32> to vector<1x8x1xf32>
    tpu.vector_store %arg8[%c1_38, %c0_39, %c0_40], %66 {strides = array<i32>} : memref<4x8x1xf32, #tpu.memory_space<vmem>>, vector<1x8x1xf32>,
    %c1_41 = arith.constant 1 : index
    %c0_42 = arith.constant 0 : index
    %c0_43 = arith.constant 0 : index
    %67 = vector.load %arg9[%c1_41, %c0_42, %c0_43] : memref<4x8x32xf32, #tpu.memory_space<vmem>>, vector<1x8x32xf32>
    %68 = vector.shape_cast %67 : vector<1x8x32xf32> to vector<8x32xf32>
    %69 = vector.broadcast %54 : vector<8x1xf32> to vector<8x32xf32>
    %70 = arith.mulf %69, %68 : vector<8x32xf32>
    %71 = arith.truncf %57 : vector<8x8xf32> to vector<8x8xbf16>
    %72 = vector.extract_strided_slice %8 {offsets = [0, 32], sizes = [8, 32], strides = [1, 1]} : vector<8x128xbf16> to vector<8x32xbf16>
    %cst_44 = arith.constant dense<0.000000e+00> : vector<8x32xf32>
    %73 = tpu.matmul %71, %72, %cst_44 {dimension_numbers = #tpu.dot_dimension_numbers<[1], [0], [0], [1], [0, 0, 1, 1], [], []>} : vector<8x8xbf16>, vector<8x32xbf16>, vector<8x32xf32> -> vector<8x32xf32>
    %74 = arith.addf %70, %73 : vector<8x32xf32>
    %c1_45 = arith.constant 1 : index
    %c0_46 = arith.constant 0 : index
    %c0_47 = arith.constant 0 : index
    %75 = vector.load %arg9[%c1_45, %c0_46, %c0_47] : memref<4x8x32xf32, #tpu.memory_space<vmem>>, vector<1x8x32xf32>
    %76 = vector.shape_cast %75 : vector<1x8x32xf32> to vector<8x32xf32>
    %77 = vector.shape_cast %74 : vector<8x32xf32> to vector<1x8x32xf32>
    tpu.vector_store %arg9[%c1_45, %c0_46, %c0_47], %77 {strides = array<i32>} : memref<4x8x32xf32, #tpu.memory_space<vmem>>, vector<1x8x32xf32>,
    %c1_48 = arith.constant 1 : index
    %c0_49 = arith.constant 0 : index
    %c0_50 = arith.constant 0 : index
    %78 = vector.load %arg7[%c1_48, %c0_49, %c0_50] : memref<4x8x1xf32, #tpu.memory_space<vmem>>, vector<1x8x1xf32>
    %79 = vector.shape_cast %78 : vector<1x8x1xf32> to vector<8x1xf32>
    %80 = vector.shape_cast %52 : vector<8x1xf32> to vector<1x8x1xf32>
    tpu.vector_store %arg7[%c1_48, %c0_49, %c0_50], %80 {strides = array<i32>} : memref<4x8x1xf32, #tpu.memory_space<vmem>>, vector<1x8x1xf32>,
    %81 = vector.extract_strided_slice %4 {offsets = [0, 64], sizes = [8, 32], strides = [1, 1]} : vector<8x128xbf16> to vector<8x32xbf16>
    %82 = vector.extract_strided_slice %6 {offsets = [0, 64], sizes = [8, 32], strides = [1, 1]} : vector<8x128xbf16> to vector<8x32xbf16>
    %cst_51 = arith.constant dense<0.000000e+00> : vector<8x8xf32>
    %83 = tpu.matmul %81, %82, %cst_51 {dimension_numbers = #tpu.dot_dimension_numbers<[1], [1], [0], [0], [0, 0, 1, 0], [], []>} : vector<8x32xbf16>, vector<8x32xbf16>, vector<8x8xf32> -> vector<8x8xf32>
    %c2 = arith.constant 2 : index
    %c0_52 = arith.constant 0 : index
    %c0_53 = arith.constant 0 : index
    %84 = vector.load %arg7[%c2, %c0_52, %c0_53] : memref<4x8x1xf32, #tpu.memory_space<vmem>>, vector<1x8x1xf32>
    %85 = vector.shape_cast %84 : vector<1x8x1xf32> to vector<8x1xf32>
    %cst_54 = arith.constant dense<0xFF800000> : vector<8xf32>
    %86 = vector.multi_reduction <maximumf>, %83, %cst_54 [1] : vector<8x8xf32> to vector<8xf32>
    %87 = vector.shape_cast %86 : vector<8xf32> to vector<8x1xf32>
    %88 = arith.maximumf %85, %87 : vector<8x1xf32>
    %89 = arith.subf %85, %88 : vector<8x1xf32>
    %90 = math.exp %89 : vector<8x1xf32>
    %91 = vector.broadcast %88 : vector<8x1xf32> to vector<8x8xf32>
    %92 = arith.subf %83, %91 : vector<8x8xf32>
    %93 = math.exp %92 : vector<8x8xf32>
    %c2_55 = arith.constant 2 : index
    %c0_56 = arith.constant 0 : index
    %c0_57 = arith.constant 0 : index
    %94 = vector.load %arg8[%c2_55, %c0_56, %c0_57] : memref<4x8x1xf32, #tpu.memory_space<vmem>>, vector<1x8x1xf32>
    %95 = vector.shape_cast %94 : vector<1x8x1xf32> to vector<8x1xf32>
    %96 = arith.mulf %90, %95 : vector<8x1xf32>
    %cst_58 = arith.constant dense<0.000000e+00> : vector<8xf32>
    %97 = vector.multi_reduction <add>, %93, %cst_58 [1] : vector<8x8xf32> to vector<8xf32>
    %98 = vector.shape_cast %97 : vector<8xf32> to vector<8x1xf32>
    %99 = arith.addf %96, %98 : vector<8x1xf32>
    %c2_59 = arith.constant 2 : index
    %c0_60 = arith.constant 0 : index
    %c0_61 = arith.constant 0 : index
    %100 = vector.load %arg8[%c2_59, %c0_60, %c0_61] : memref<4x8x1xf32, #tpu.memory_space<vmem>>, vector<1x8x1xf32>
    %101 = vector.shape_cast %100 : vector<1x8x1xf32> to vector<8x1xf32>
    %102 = vector.shape_cast %99 : vector<8x1xf32> to vector<1x8x1xf32>
    tpu.vector_store %arg8[%c2_59, %c0_60, %c0_61], %102 {strides = array<i32>} : memref<4x8x1xf32, #tpu.memory_space<vmem>>, vector<1x8x1xf32>,
    %c2_62 = arith.constant 2 : index
    %c0_63 = arith.constant 0 : index
    %c0_64 = arith.constant 0 : index
    %103 = vector.load %arg9[%c2_62, %c0_63, %c0_64] : memref<4x8x32xf32, #tpu.memory_space<vmem>>, vector<1x8x32xf32>
    %104 = vector.shape_cast %103 : vector<1x8x32xf32> to vector<8x32xf32>
    %105 = vector.broadcast %90 : vector<8x1xf32> to vector<8x32xf32>
    %106 = arith.mulf %105, %104 : vector<8x32xf32>
    %107 = arith.truncf %93 : vector<8x8xf32> to vector<8x8xbf16>
    %108 = vector.extract_strided_slice %8 {offsets = [0, 64], sizes = [8, 32], strides = [1, 1]} : vector<8x128xbf16> to vector<8x32xbf16>
    %cst_65 = arith.constant dense<0.000000e+00> : vector<8x32xf32>
    %109 = tpu.matmul %107, %108, %cst_65 {dimension_numbers = #tpu.dot_dimension_numbers<[1], [0], [0], [1], [0, 0, 1, 1], [], []>} : vector<8x8xbf16>, vector<8x32xbf16>, vector<8x32xf32> -> vector<8x32xf32>
    %110 = arith.addf %106, %109 : vector<8x32xf32>
    %c2_66 = arith.constant 2 : index
    %c0_67 = arith.constant 0 : index
    %c0_68 = arith.constant 0 : index
    %111 = vector.load %arg9[%c2_66, %c0_67, %c0_68] : memref<4x8x32xf32, #tpu.memory_space<vmem>>, vector<1x8x32xf32>
    %112 = vector.shape_cast %111 : vector<1x8x32xf32> to vector<8x32xf32>
    %113 = vector.shape_cast %110 : vector<8x32xf32> to vector<1x8x32xf32>
    tpu.vector_store %arg9[%c2_66, %c0_67, %c0_68], %113 {strides = array<i32>} : memref<4x8x32xf32, #tpu.memory_space<vmem>>, vector<1x8x32xf32>,
    %c2_69 = arith.constant 2 : index
    %c0_70 = arith.constant 0 : index
    %c0_71 = arith.constant 0 : index
    %114 = vector.load %arg7[%c2_69, %c0_70, %c0_71] : memref<4x8x1xf32, #tpu.memory_space<vmem>>, vector<1x8x1xf32>
    %115 = vector.shape_cast %114 : vector<1x8x1xf32> to vector<8x1xf32>
    %116 = vector.shape_cast %88 : vector<8x1xf32> to vector<1x8x1xf32>
    tpu.vector_store %arg7[%c2_69, %c0_70, %c0_71], %116 {strides = array<i32>} : memref<4x8x1xf32, #tpu.memory_space<vmem>>, vector<1x8x1xf32>,
    %117 = vector.extract_strided_slice %4 {offsets = [0, 96], sizes = [8, 32], strides = [1, 1]} : vector<8x128xbf16> to vector<8x32xbf16>
    %118 = vector.extract_strided_slice %6 {offsets = [0, 96], sizes = [8, 32], strides = [1, 1]} : vector<8x128xbf16> to vector<8x32xbf16>
    %cst_72 = arith.constant dense<0.000000e+00> : vector<8x8xf32>
    %119 = tpu.matmul %117, %118, %cst_72 {dimension_numbers = #tpu.dot_dimension_numbers<[1], [1], [0], [0], [0, 0, 1, 0], [], []>} : vector<8x32xbf16>, vector<8x32xbf16>, vector<8x8xf32> -> vector<8x8xf32>
    %c3 = arith.constant 3 : index
    %c0_73 = arith.constant 0 : index
    %c0_74 = arith.constant 0 : index
    %120 = vector.load %arg7[%c3, %c0_73, %c0_74] : memref<4x8x1xf32, #tpu.memory_space<vmem>>, vector<1x8x1xf32>
    %121 = vector.shape_cast %120 : vector<1x8x1xf32> to vector<8x1xf32>
    %cst_75 = arith.constant dense<0xFF800000> : vector<8xf32>
    %122 = vector.multi_reduction <maximumf>, %119, %cst_75 [1] : vector<8x8xf32> to vector<8xf32>
    %123 = vector.shape_cast %122 : vector<8xf32> to vector<8x1xf32>
    %124 = arith.maximumf %121, %123 : vector<8x1xf32>
    %125 = arith.subf %121, %124 : vector<8x1xf32>
    %126 = math.exp %125 : vector<8x1xf32>
    %127 = vector.broadcast %124 : vector<8x1xf32> to vector<8x8xf32>
    %128 = arith.subf %119, %127 : vector<8x8xf32>
    %129 = math.exp %128 : vector<8x8xf32>
    %c3_76 = arith.constant 3 : index
    %c0_77 = arith.constant 0 : index
    %c0_78 = arith.constant 0 : index
    %130 = vector.load %arg8[%c3_76, %c0_77, %c0_78] : memref<4x8x1xf32, #tpu.memory_space<vmem>>, vector<1x8x1xf32>
    %131 = vector.shape_cast %130 : vector<1x8x1xf32> to vector<8x1xf32>
    %132 = arith.mulf %126, %131 : vector<8x1xf32>
    %cst_79 = arith.constant dense<0.000000e+00> : vector<8xf32>
    %133 = vector.multi_reduction <add>, %129, %cst_79 [1] : vector<8x8xf32> to vector<8xf32>
    %134 = vector.shape_cast %133 : vector<8xf32> to vector<8x1xf32>
    %135 = arith.addf %132, %134 : vector<8x1xf32>
    %c3_80 = arith.constant 3 : index
    %c0_81 = arith.constant 0 : index
    %c0_82 = arith.constant 0 : index
    %136 = vector.load %arg8[%c3_80, %c0_81, %c0_82] : memref<4x8x1xf32, #tpu.memory_space<vmem>>, vector<1x8x1xf32>
    %137 = vector.shape_cast %136 : vector<1x8x1xf32> to vector<8x1xf32>
    %138 = vector.shape_cast %135 : vector<8x1xf32> to vector<1x8x1xf32>
    tpu.vector_store %arg8[%c3_80, %c0_81, %c0_82], %138 {strides = array<i32>} : memref<4x8x1xf32, #tpu.memory_space<vmem>>, vector<1x8x1xf32>,
    %c3_83 = arith.constant 3 : index
    %c0_84 = arith.constant 0 : index
    %c0_85 = arith.constant 0 : index
    %139 = vector.load %arg9[%c3_83, %c0_84, %c0_85] : memref<4x8x32xf32, #tpu.memory_space<vmem>>, vector<1x8x32xf32>
    %140 = vector.shape_cast %139 : vector<1x8x32xf32> to vector<8x32xf32>
    %141 = vector.broadcast %126 : vector<8x1xf32> to vector<8x32xf32>
    %142 = arith.mulf %141, %140 : vector<8x32xf32>
    %143 = arith.truncf %129 : vector<8x8xf32> to vector<8x8xbf16>
    %144 = vector.extract_strided_slice %8 {offsets = [0, 96], sizes = [8, 32], strides = [1, 1]} : vector<8x128xbf16> to vector<8x32xbf16>
    %cst_86 = arith.constant dense<0.000000e+00> : vector<8x32xf32>
    %145 = tpu.matmul %143, %144, %cst_86 {dimension_numbers = #tpu.dot_dimension_numbers<[1], [0], [0], [1], [0, 0, 1, 1], [], []>} : vector<8x8xbf16>, vector<8x32xbf16>, vector<8x32xf32> -> vector<8x32xf32>
    %146 = arith.addf %142, %145 : vector<8x32xf32>
    %c3_87 = arith.constant 3 : index
    %c0_88 = arith.constant 0 : index
    %c0_89 = arith.constant 0 : index
    %147 = vector.load %arg9[%c3_87, %c0_88, %c0_89] : memref<4x8x32xf32, #tpu.memory_space<vmem>>, vector<1x8x32xf32>
    %148 = vector.shape_cast %147 : vector<1x8x32xf32> to vector<8x32xf32>
    %149 = vector.shape_cast %146 : vector<8x32xf32> to vector<1x8x32xf32>
    tpu.vector_store %arg9[%c3_87, %c0_88, %c0_89], %149 {strides = array<i32>} : memref<4x8x32xf32, #tpu.memory_space<vmem>>, vector<1x8x32xf32>,
    %c3_90 = arith.constant 3 : index
    %c0_91 = arith.constant 0 : index
    %c0_92 = arith.constant 0 : index
    %150 = vector.load %arg7[%c3_90, %c0_91, %c0_92] : memref<4x8x1xf32, #tpu.memory_space<vmem>>, vector<1x8x1xf32>
    %151 = vector.shape_cast %150 : vector<1x8x1xf32> to vector<8x1xf32>
    %152 = vector.shape_cast %124 : vector<8x1xf32> to vector<1x8x1xf32>
    tpu.vector_store %arg7[%c3_90, %c0_91, %c0_92], %152 {strides = array<i32>} : memref<4x8x1xf32, #tpu.memory_space<vmem>>, vector<1x8x1xf32>,
    %c0_i32_93 = arith.constant 0 : i32
    %153 = arith.cmpi eq, %arg2, %c0_i32_93 : i32
    %154 = arith.extui %153 : i1 to i32
    %c0_i32_94 = arith.constant 0 : i32
    %155 = arith.cmpi ne, %154, %c0_i32_94 : i32
    scf.if %155 {
      %c0_95 = arith.constant 0 : index
      %c0_96 = arith.constant 0 : index
      %c0_97 = arith.constant 0 : index
      %156 = vector.load %arg9[%c0_95, %c0_96, %c0_97] : memref<4x8x32xf32, #tpu.memory_space<vmem>>, vector<1x8x32xf32>
      %157 = vector.shape_cast %156 : vector<1x8x32xf32> to vector<8x32xf32>
      %c0_98 = arith.constant 0 : index
      %c0_99 = arith.constant 0 : index
      %c0_100 = arith.constant 0 : index
      %158 = vector.load %arg8[%c0_98, %c0_99, %c0_100] : memref<4x8x1xf32, #tpu.memory_space<vmem>>, vector<1x8x1xf32>
      %159 = vector.shape_cast %158 : vector<1x8x1xf32> to vector<8x1xf32>
      %160 = vector.broadcast %159 : vector<8x1xf32> to vector<8x32xf32>
      %161 = arith.divf %157, %160 : vector<8x32xf32>
      %c1_101 = arith.constant 1 : index
      %c0_102 = arith.constant 0 : index
      %c0_103 = arith.constant 0 : index
      %162 = vector.load %arg9[%c1_101, %c0_102, %c0_103] : memref<4x8x32xf32, #tpu.memory_space<vmem>>, vector<1x8x32xf32>
      %163 = vector.shape_cast %162 : vector<1x8x32xf32> to vector<8x32xf32>
      %c1_104 = arith.constant 1 : index
      %c0_105 = arith.constant 0 : index
      %c0_106 = arith.constant 0 : index
      %164 = vector.load %arg8[%c1_104, %c0_105, %c0_106] : memref<4x8x1xf32, #tpu.memory_space<vmem>>, vector<1x8x1xf32>
      %165 = vector.shape_cast %164 : vector<1x8x1xf32> to vector<8x1xf32>
      %166 = vector.broadcast %165 : vector<8x1xf32> to vector<8x32xf32>
      %167 = arith.divf %163, %166 : vector<8x32xf32>
      %c2_107 = arith.constant 2 : index
      %c0_108 = arith.constant 0 : index
      %c0_109 = arith.constant 0 : index
      %168 = vector.load %arg9[%c2_107, %c0_108, %c0_109] : memref<4x8x32xf32, #tpu.memory_space<vmem>>, vector<1x8x32xf32>
      %169 = vector.shape_cast %168 : vector<1x8x32xf32> to vector<8x32xf32>
      %c2_110 = arith.constant 2 : index
      %c0_111 = arith.constant 0 : index
      %c0_112 = arith.constant 0 : index
      %170 = vector.load %arg8[%c2_110, %c0_111, %c0_112] : memref<4x8x1xf32, #tpu.memory_space<vmem>>, vector<1x8x1xf32>
      %171 = vector.shape_cast %170 : vector<1x8x1xf32> to vector<8x1xf32>
      %172 = vector.broadcast %171 : vector<8x1xf32> to vector<8x32xf32>
      %173 = arith.divf %169, %172 : vector<8x32xf32>
      %c3_113 = arith.constant 3 : index
      %c0_114 = arith.constant 0 : index
      %c0_115 = arith.constant 0 : index
      %174 = vector.load %arg9[%c3_113, %c0_114, %c0_115] : memref<4x8x32xf32, #tpu.memory_space<vmem>>, vector<1x8x32xf32>
      %175 = vector.shape_cast %174 : vector<1x8x32xf32> to vector<8x32xf32>
      %c3_116 = arith.constant 3 : index
      %c0_117 = arith.constant 0 : index
      %c0_118 = arith.constant 0 : index
      %176 = vector.load %arg8[%c3_116, %c0_117, %c0_118] : memref<4x8x1xf32, #tpu.memory_space<vmem>>, vector<1x8x1xf32>
      %177 = vector.shape_cast %176 : vector<1x8x1xf32> to vector<8x1xf32>
      %178 = vector.broadcast %177 : vector<8x1xf32> to vector<8x32xf32>
      %179 = arith.divf %175, %178 : vector<8x32xf32>
      %180 = tpu.concatenate %161, %167, %173, %179 in 1 : vector<8x32xf32>, vector<8x32xf32>, vector<8x32xf32>, vector<8x32xf32> -> vector<8x128xf32>
      %181 = arith.truncf %180 : vector<8x128xf32> to vector<8x128xbf16>
      %c0_119 = arith.constant 0 : index
      %c0_120 = arith.constant 0 : index
      %c0_121 = arith.constant 0 : index
      %182 = vector.load %arg6[%c0_119, %c0_120, %c0_121] : memref<1x8x128xbf16, #tpu.memory_space<vmem>>, vector<1x8x128xbf16>
      %183 = vector.shape_cast %182 : vector<1x8x128xbf16> to vector<8x128xbf16>
      %184 = vector.shape_cast %181 : vector<8x128xbf16> to vector<1x8x128xbf16>
      tpu.vector_store %arg6[%c0_119, %c0_120, %c0_121], %184 {strides = array<i32>} : memref<1x8x128xbf16, #tpu.memory_space<vmem>>, vector<1x8x128xbf16>,
    } else {
    }
    return
  }
  func.func @transform_0(%arg0: i32, %arg1: i32, %arg2: i32) -> (i32, i32, i32) {
    %c0_i32 = arith.constant 0 : i32
    %c0_i32_0 = arith.constant 0 : i32
    return %arg0, %arg1, %c0_i32 : i32, i32, i32
  }
  func.func @transform_1(%arg0: i32, %arg1: i32, %arg2: i32) -> (i32, i32, i32) {
    %c1_i32 = arith.constant 1 : i32
    %c0_i32 = arith.constant 0 : i32
    return %arg0, %arg2, %c1_i32 : i32, i32, i32
  }
  func.func @transform_2(%arg0: i32, %arg1: i32, %arg2: i32) -> (i32, i32, i32) {
    %c2_i32 = arith.constant 2 : i32
    %c0_i32 = arith.constant 0 : i32
    return %arg0, %arg2, %c2_i32 : i32, i32, i32
  }
  func.func @transform_3(%arg0: i32, %arg1: i32, %arg2: i32) -> (i32, i32, i32) {
    %c0_i32 = arith.constant 0 : i32
    %c0_i32_0 = arith.constant 0 : i32
    return %arg0, %arg1, %c0_i32 : i32, i32, i32
  }
}

module attributes {stable_mosaic.version = 11 : i64} {
  func.func @_linear_res_ln_kernel(%arg0: i32, %arg1: i32, %arg2: memref<16x128xbf16, #tpu.memory_space<vmem>>, %arg3: memref<128x128xbf16, #tpu.memory_space<vmem>>, %arg4: memref<1x128xf32, #tpu.memory_space<vmem>>, %arg5: memref<16x128xf32, #tpu.memory_space<vmem>>, %arg6: memref<1x128xf32, #tpu.memory_space<vmem>>, %arg7: memref<1x128xf32, #tpu.memory_space<vmem>>, %arg8: memref<16x128xf32, #tpu.memory_space<vmem>>, %arg9: memref<16x128xf32, #tpu.memory_space<vmem>>) attributes {dimension_semantics = [#tpu.dimension_semantics<parallel>, #tpu.dimension_semantics<arbitrary>], iteration_bounds = array<i64: 1, 1>, scalar_prefetch = 0 : i64, scratch_operands = 1 : i64, tpu.core_type = #tpu.core_type<tc>, window_params = [{transform_indices = @transform_0, window_bounds = array<i64: 16, 128>}, {transform_indices = @transform_1, window_bounds = array<i64: 128, 128>}, {pipeline_mode = #tpu.pipeline_mode<synchronous>, transform_indices = @transform_2, window_bounds = array<i64: 1, 128>}, {transform_indices = @transform_3, window_bounds = array<i64: 16, 128>}, {pipeline_mode = #tpu.pipeline_mode<synchronous>, transform_indices = @transform_4, window_bounds = array<i64: 1, 128>}, {pipeline_mode = #tpu.pipeline_mode<synchronous>, transform_indices = @transform_5, window_bounds = array<i64: 1, 128>}, {transform_indices = @transform_6, window_bounds = array<i64: 16, 128>}]} {
    %c0_i32 = arith.constant 0 : i32
    %0 = arith.cmpi eq, %arg1, %c0_i32 : i32
    %1 = arith.extui %0 : i1 to i32
    %c0_i32_0 = arith.constant 0 : i32
    %2 = arith.cmpi ne, %1, %c0_i32_0 : i32
    scf.if %2 {
      %cst_10 = arith.constant 0.000000e+00 : f32
      %12 = vector.broadcast %cst_10 : f32 to vector<16x128xf32>
      %c0_11 = arith.constant 0 : index
      %c0_12 = arith.constant 0 : index
      %13 = vector.load %arg9[%c0_11, %c0_12] : memref<16x128xf32, #tpu.memory_space<vmem>>, vector<16x128xf32>
      tpu.vector_store %arg9[%c0_11, %c0_12], %12 {strides = array<i32>} : memref<16x128xf32, #tpu.memory_space<vmem>>, vector<16x128xf32>,
    } else {
    }
    %c0 = arith.constant 0 : index
    %c0_1 = arith.constant 0 : index
    %3 = vector.load %arg9[%c0, %c0_1] : memref<16x128xf32, #tpu.memory_space<vmem>>, vector<16x128xf32>
    %c0_2 = arith.constant 0 : index
    %c0_3 = arith.constant 0 : index
    %4 = vector.load %arg2[%c0_2, %c0_3] : memref<16x128xbf16, #tpu.memory_space<vmem>>, vector<16x128xbf16>
    %c0_4 = arith.constant 0 : index
    %c0_5 = arith.constant 0 : index
    %5 = vector.load %arg3[%c0_4, %c0_5] : memref<128x128xbf16, #tpu.memory_space<vmem>>, vector<128x128xbf16>
    %cst = arith.constant dense<0.000000e+00> : vector<16x128xf32>
    %6 = tpu.matmul %4, %5, %cst {dimension_numbers = #tpu.dot_dimension_numbers<[1], [0], [0], [1], [0, 0, 1, 1], [], []>} : vector<16x128xbf16>, vector<128x128xbf16>, vector<16x128xf32> -> vector<16x128xf32>
    %7 = arith.addf %3, %6 : vector<16x128xf32>
    %c0_6 = arith.constant 0 : index
    %c0_7 = arith.constant 0 : index
    %8 = vector.load %arg9[%c0_6, %c0_7] : memref<16x128xf32, #tpu.memory_space<vmem>>, vector<16x128xf32>
    tpu.vector_store %arg9[%c0_6, %c0_7], %7 {strides = array<i32>} : memref<16x128xf32, #tpu.memory_space<vmem>>, vector<16x128xf32>,
    %c0_i32_8 = arith.constant 0 : i32
    %9 = arith.cmpi eq, %arg1, %c0_i32_8 : i32
    %10 = arith.extui %9 : i1 to i32
    %c0_i32_9 = arith.constant 0 : i32
    %11 = arith.cmpi ne, %10, %c0_i32_9 : i32
    scf.if %11 {
      %c0_10 = arith.constant 0 : index
      %c0_11 = arith.constant 0 : index
      %12 = vector.load %arg5[%c0_10, %c0_11] : memref<16x128xf32, #tpu.memory_space<vmem>>, vector<16x128xf32>
      %c0_12 = arith.constant 0 : index
      %c0_13 = arith.constant 0 : index
      %13 = vector.load %arg9[%c0_12, %c0_13] : memref<16x128xf32, #tpu.memory_space<vmem>>, vector<16x128xf32>
      %14 = arith.addf %12, %13 : vector<16x128xf32>
      %c0_14 = arith.constant 0 : index
      %c0_15 = arith.constant 0 : index
      %15 = vector.load %arg4[%c0_14, %c0_15] : memref<1x128xf32, #tpu.memory_space<vmem>>, vector<1x128xf32>
      %16 = vector.broadcast %15 : vector<1x128xf32> to vector<16x128xf32>
      %17 = arith.addf %14, %16 : vector<16x128xf32>
      %cst_16 = arith.constant dense<0.000000e+00> : vector<16xf32>
      %18 = vector.multi_reduction <add>, %17, %cst_16 [1] : vector<16x128xf32> to vector<16xf32>
      %19 = vector.shape_cast %18 : vector<16xf32> to vector<16x1xf32>
      %cst_17 = arith.constant 1.280000e+02 : f32
      %20 = vector.broadcast %cst_17 : f32 to vector<16x1xf32>
      %21 = arith.divf %19, %20 : vector<16x1xf32>
      %22 = vector.broadcast %21 : vector<16x1xf32> to vector<16x128xf32>
      %23 = arith.subf %17, %22 : vector<16x128xf32>
      %24 = arith.mulf %23, %23 : vector<16x128xf32>
      %cst_18 = arith.constant dense<0.000000e+00> : vector<16xf32>
      %25 = vector.multi_reduction <add>, %24, %cst_18 [1] : vector<16x128xf32> to vector<16xf32>
      %26 = vector.shape_cast %25 : vector<16xf32> to vector<16x1xf32>
      %cst_19 = arith.constant 1.280000e+02 : f32
      %27 = vector.broadcast %cst_19 : f32 to vector<16x1xf32>
      %28 = arith.divf %26, %27 : vector<16x1xf32>
      %cst_20 = arith.constant 9.99999974E-6 : f32
      %29 = vector.broadcast %cst_20 : f32 to vector<16x1xf32>
      %30 = arith.addf %28, %29 : vector<16x1xf32>
      %31 = math.rsqrt %30 : vector<16x1xf32>
      %32 = vector.broadcast %31 : vector<16x1xf32> to vector<16x128xf32>
      %33 = arith.mulf %23, %32 : vector<16x128xf32>
      %c0_21 = arith.constant 0 : index
      %c0_22 = arith.constant 0 : index
      %34 = vector.load %arg6[%c0_21, %c0_22] : memref<1x128xf32, #tpu.memory_space<vmem>>, vector<1x128xf32>
      %35 = vector.broadcast %34 : vector<1x128xf32> to vector<16x128xf32>
      %36 = arith.mulf %33, %35 : vector<16x128xf32>
      %c0_23 = arith.constant 0 : index
      %c0_24 = arith.constant 0 : index
      %37 = vector.load %arg7[%c0_23, %c0_24] : memref<1x128xf32, #tpu.memory_space<vmem>>, vector<1x128xf32>
      %38 = vector.broadcast %37 : vector<1x128xf32> to vector<16x128xf32>
      %39 = arith.addf %36, %38 : vector<16x128xf32>
      %c0_25 = arith.constant 0 : index
      %c0_26 = arith.constant 0 : index
      %40 = vector.load %arg8[%c0_25, %c0_26] : memref<16x128xf32, #tpu.memory_space<vmem>>, vector<16x128xf32>
      tpu.vector_store %arg8[%c0_25, %c0_26], %39 {strides = array<i32>} : memref<16x128xf32, #tpu.memory_space<vmem>>, vector<16x128xf32>,
    } else {
    }
    return
  }
  func.func @transform_0(%arg0: i32, %arg1: i32) -> (i32, i32) {
    %c0_i32 = arith.constant 0 : i32
    return %arg0, %arg1 : i32, i32
  }
  func.func @transform_1(%arg0: i32, %arg1: i32) -> (i32, i32) {
    %c0_i32 = arith.constant 0 : i32
    %c0_i32_0 = arith.constant 0 : i32
    return %arg1, %c0_i32 : i32, i32
  }
  func.func @transform_2(%arg0: i32, %arg1: i32) -> (i32, i32) {
    %c0_i32 = arith.constant 0 : i32
    %c0_i32_0 = arith.constant 0 : i32
    %c0_i32_1 = arith.constant 0 : i32
    return %c0_i32, %c0_i32_0 : i32, i32
  }
  func.func @transform_3(%arg0: i32, %arg1: i32) -> (i32, i32) {
    %c0_i32 = arith.constant 0 : i32
    %c0_i32_0 = arith.constant 0 : i32
    return %arg0, %c0_i32 : i32, i32
  }
  func.func @transform_4(%arg0: i32, %arg1: i32) -> (i32, i32) {
    %c0_i32 = arith.constant 0 : i32
    %c0_i32_0 = arith.constant 0 : i32
    %c0_i32_1 = arith.constant 0 : i32
    return %c0_i32, %c0_i32_0 : i32, i32
  }
  func.func @transform_5(%arg0: i32, %arg1: i32) -> (i32, i32) {
    %c0_i32 = arith.constant 0 : i32
    %c0_i32_0 = arith.constant 0 : i32
    %c0_i32_1 = arith.constant 0 : i32
    return %c0_i32, %c0_i32_0 : i32, i32
  }
  func.func @transform_6(%arg0: i32, %arg1: i32) -> (i32, i32) {
    %c0_i32 = arith.constant 0 : i32
    %c0_i32_0 = arith.constant 0 : i32
    return %arg0, %c0_i32 : i32, i32
  }
}

module attributes {stable_mosaic.version = 11 : i64} {
  func.func @_linear_kernel(%arg0: i32, %arg1: i32, %arg2: i32, %arg3: memref<16x128xf32, #tpu.memory_space<vmem>>, %arg4: memref<128x128xbf16, #tpu.memory_space<vmem>>, %arg5: memref<1x128xf32, #tpu.memory_space<vmem>>, %arg6: memref<16x128xbf16, #tpu.memory_space<vmem>>, %arg7: memref<16x128xf32, #tpu.memory_space<vmem>>) attributes {dimension_semantics = [#tpu.dimension_semantics<parallel>, #tpu.dimension_semantics<parallel>, #tpu.dimension_semantics<arbitrary>], iteration_bounds = array<i64: 1, 1, 1>, scalar_prefetch = 0 : i64, scratch_operands = 1 : i64, tpu.core_type = #tpu.core_type<tc>, window_params = [{transform_indices = @transform_0, window_bounds = array<i64: 16, 128>}, {transform_indices = @transform_1, window_bounds = array<i64: 128, 128>}, {transform_indices = @transform_2, window_bounds = array<i64: 1, 128>}, {transform_indices = @transform_3, window_bounds = array<i64: 16, 128>}]} {
    %c0_i32 = arith.constant 0 : i32
    %0 = arith.cmpi eq, %arg2, %c0_i32 : i32
    %1 = arith.extui %0 : i1 to i32
    %c0_i32_0 = arith.constant 0 : i32
    %2 = arith.cmpi ne, %1, %c0_i32_0 : i32
    scf.if %2 {
      %cst_10 = arith.constant 0.000000e+00 : f32
      %13 = vector.broadcast %cst_10 : f32 to vector<16x128xf32>
      %c0_11 = arith.constant 0 : index
      %c0_12 = arith.constant 0 : index
      %14 = vector.load %arg7[%c0_11, %c0_12] : memref<16x128xf32, #tpu.memory_space<vmem>>, vector<16x128xf32>
      tpu.vector_store %arg7[%c0_11, %c0_12], %13 {strides = array<i32>} : memref<16x128xf32, #tpu.memory_space<vmem>>, vector<16x128xf32>,
    } else {
    }
    %c0 = arith.constant 0 : index
    %c0_1 = arith.constant 0 : index
    %3 = vector.load %arg7[%c0, %c0_1] : memref<16x128xf32, #tpu.memory_space<vmem>>, vector<16x128xf32>
    %c0_2 = arith.constant 0 : index
    %c0_3 = arith.constant 0 : index
    %4 = vector.load %arg3[%c0_2, %c0_3] : memref<16x128xf32, #tpu.memory_space<vmem>>, vector<16x128xf32>
    %5 = arith.truncf %4 : vector<16x128xf32> to vector<16x128xbf16>
    %c0_4 = arith.constant 0 : index
    %c0_5 = arith.constant 0 : index
    %6 = vector.load %arg4[%c0_4, %c0_5] : memref<128x128xbf16, #tpu.memory_space<vmem>>, vector<128x128xbf16>
    %cst = arith.constant dense<0.000000e+00> : vector<16x128xf32>
    %7 = tpu.matmul %5, %6, %cst {dimension_numbers = #tpu.dot_dimension_numbers<[1], [0], [0], [1], [0, 0, 1, 1], [], []>} : vector<16x128xbf16>, vector<128x128xbf16>, vector<16x128xf32> -> vector<16x128xf32>
    %8 = arith.addf %3, %7 : vector<16x128xf32>
    %c0_6 = arith.constant 0 : index
    %c0_7 = arith.constant 0 : index
    %9 = vector.load %arg7[%c0_6, %c0_7] : memref<16x128xf32, #tpu.memory_space<vmem>>, vector<16x128xf32>
    tpu.vector_store %arg7[%c0_6, %c0_7], %8 {strides = array<i32>} : memref<16x128xf32, #tpu.memory_space<vmem>>, vector<16x128xf32>,
    %c0_i32_8 = arith.constant 0 : i32
    %10 = arith.cmpi eq, %arg2, %c0_i32_8 : i32
    %11 = arith.extui %10 : i1 to i32
    %c0_i32_9 = arith.constant 0 : i32
    %12 = arith.cmpi ne, %11, %c0_i32_9 : i32
    scf.if %12 {
      %c0_10 = arith.constant 0 : index
      %c0_11 = arith.constant 0 : index
      %13 = vector.load %arg7[%c0_10, %c0_11] : memref<16x128xf32, #tpu.memory_space<vmem>>, vector<16x128xf32>
      %c0_12 = arith.constant 0 : index
      %c0_13 = arith.constant 0 : index
      %14 = vector.load %arg5[%c0_12, %c0_13] : memref<1x128xf32, #tpu.memory_space<vmem>>, vector<1x128xf32>
      %15 = vector.broadcast %14 : vector<1x128xf32> to vector<16x128xf32>
      %16 = arith.addf %13, %15 : vector<16x128xf32>
      %17 = arith.truncf %16 : vector<16x128xf32> to vector<16x128xbf16>
      %c0_14 = arith.constant 0 : index
      %c0_15 = arith.constant 0 : index
      %18 = vector.load %arg6[%c0_14, %c0_15] : memref<16x128xbf16, #tpu.memory_space<vmem>>, vector<16x128xbf16>
      tpu.vector_store %arg6[%c0_14, %c0_15], %17 {strides = array<i32>} : memref<16x128xbf16, #tpu.memory_space<vmem>>, vector<16x128xbf16>,
    } else {
    }
    return
  }
  func.func @transform_0(%arg0: i32, %arg1: i32, %arg2: i32) -> (i32, i32) {
    %c0_i32 = arith.constant 0 : i32
    return %arg0, %arg2 : i32, i32
  }
  func.func @transform_1(%arg0: i32, %arg1: i32, %arg2: i32) -> (i32, i32) {
    %c0_i32 = arith.constant 0 : i32
    return %arg2, %arg1 : i32, i32
  }
  func.func @transform_2(%arg0: i32, %arg1: i32, %arg2: i32) -> (i32, i32) {
    %c0_i32 = arith.constant 0 : i32
    %c0_i32_0 = arith.constant 0 : i32
    return %c0_i32, %arg1 : i32, i32
  }
  func.func @transform_3(%arg0: i32, %arg1: i32, %arg2: i32) -> (i32, i32) {
    %c0_i32 = arith.constant 0 : i32
    return %arg0, %arg1 : i32, i32
  }
}

module attributes {stable_mosaic.version = 11 : i64} {
  func.func @_linear_kernel(%arg0: i32, %arg1: i32, %arg2: i32, %arg3: memref<32x128xf32, #tpu.memory_space<vmem>>, %arg4: memref<128x256xbf16, #tpu.memory_space<vmem>>, %arg5: memref<1x256xf32, #tpu.memory_space<vmem>>, %arg6: memref<32x256xbf16, #tpu.memory_space<vmem>>, %arg7: memref<32x256xf32, #tpu.memory_space<vmem>>) attributes {dimension_semantics = [#tpu.dimension_semantics<parallel>, #tpu.dimension_semantics<parallel>, #tpu.dimension_semantics<arbitrary>], iteration_bounds = array<i64: 1, 1, 1>, scalar_prefetch = 0 : i64, scratch_operands = 1 : i64, tpu.core_type = #tpu.core_type<tc>, window_params = [{transform_indices = @transform_0, window_bounds = array<i64: 32, 128>}, {transform_indices = @transform_1, window_bounds = array<i64: 128, 256>}, {transform_indices = @transform_2, window_bounds = array<i64: 1, 256>}, {transform_indices = @transform_3, window_bounds = array<i64: 32, 256>}]} {
    %c0_i32 = arith.constant 0 : i32
    %0 = arith.cmpi eq, %arg2, %c0_i32 : i32
    %1 = arith.extui %0 : i1 to i32
    %c0_i32_0 = arith.constant 0 : i32
    %2 = arith.cmpi ne, %1, %c0_i32_0 : i32
    scf.if %2 {
      %cst_10 = arith.constant 0.000000e+00 : f32
      %13 = vector.broadcast %cst_10 : f32 to vector<32x256xf32>
      %c0_11 = arith.constant 0 : index
      %c0_12 = arith.constant 0 : index
      %14 = vector.load %arg7[%c0_11, %c0_12] : memref<32x256xf32, #tpu.memory_space<vmem>>, vector<32x256xf32>
      tpu.vector_store %arg7[%c0_11, %c0_12], %13 {strides = array<i32>} : memref<32x256xf32, #tpu.memory_space<vmem>>, vector<32x256xf32>,
    } else {
    }
    %c0 = arith.constant 0 : index
    %c0_1 = arith.constant 0 : index
    %3 = vector.load %arg7[%c0, %c0_1] : memref<32x256xf32, #tpu.memory_space<vmem>>, vector<32x256xf32>
    %c0_2 = arith.constant 0 : index
    %c0_3 = arith.constant 0 : index
    %4 = vector.load %arg3[%c0_2, %c0_3] : memref<32x128xf32, #tpu.memory_space<vmem>>, vector<32x128xf32>
    %5 = arith.truncf %4 : vector<32x128xf32> to vector<32x128xbf16>
    %c0_4 = arith.constant 0 : index
    %c0_5 = arith.constant 0 : index
    %6 = vector.load %arg4[%c0_4, %c0_5] : memref<128x256xbf16, #tpu.memory_space<vmem>>, vector<128x256xbf16>
    %cst = arith.constant dense<0.000000e+00> : vector<32x256xf32>
    %7 = tpu.matmul %5, %6, %cst {dimension_numbers = #tpu.dot_dimension_numbers<[1], [0], [0], [1], [0, 0, 1, 1], [], []>} : vector<32x128xbf16>, vector<128x256xbf16>, vector<32x256xf32> -> vector<32x256xf32>
    %8 = arith.addf %3, %7 : vector<32x256xf32>
    %c0_6 = arith.constant 0 : index
    %c0_7 = arith.constant 0 : index
    %9 = vector.load %arg7[%c0_6, %c0_7] : memref<32x256xf32, #tpu.memory_space<vmem>>, vector<32x256xf32>
    tpu.vector_store %arg7[%c0_6, %c0_7], %8 {strides = array<i32>} : memref<32x256xf32, #tpu.memory_space<vmem>>, vector<32x256xf32>,
    %c0_i32_8 = arith.constant 0 : i32
    %10 = arith.cmpi eq, %arg2, %c0_i32_8 : i32
    %11 = arith.extui %10 : i1 to i32
    %c0_i32_9 = arith.constant 0 : i32
    %12 = arith.cmpi ne, %11, %c0_i32_9 : i32
    scf.if %12 {
      %c0_10 = arith.constant 0 : index
      %c0_11 = arith.constant 0 : index
      %13 = vector.load %arg7[%c0_10, %c0_11] : memref<32x256xf32, #tpu.memory_space<vmem>>, vector<32x256xf32>
      %c0_12 = arith.constant 0 : index
      %c0_13 = arith.constant 0 : index
      %14 = vector.load %arg5[%c0_12, %c0_13] : memref<1x256xf32, #tpu.memory_space<vmem>>, vector<1x256xf32>
      %15 = vector.broadcast %14 : vector<1x256xf32> to vector<32x256xf32>
      %16 = arith.addf %13, %15 : vector<32x256xf32>
      %17 = arith.truncf %16 : vector<32x256xf32> to vector<32x256xbf16>
      %c0_14 = arith.constant 0 : index
      %c0_15 = arith.constant 0 : index
      %18 = vector.load %arg6[%c0_14, %c0_15] : memref<32x256xbf16, #tpu.memory_space<vmem>>, vector<32x256xbf16>
      tpu.vector_store %arg6[%c0_14, %c0_15], %17 {strides = array<i32>} : memref<32x256xbf16, #tpu.memory_space<vmem>>, vector<32x256xbf16>,
    } else {
    }
    return
  }
  func.func @transform_0(%arg0: i32, %arg1: i32, %arg2: i32) -> (i32, i32) {
    %c0_i32 = arith.constant 0 : i32
    return %arg0, %arg2 : i32, i32
  }
  func.func @transform_1(%arg0: i32, %arg1: i32, %arg2: i32) -> (i32, i32) {
    %c0_i32 = arith.constant 0 : i32
    return %arg2, %arg1 : i32, i32
  }
  func.func @transform_2(%arg0: i32, %arg1: i32, %arg2: i32) -> (i32, i32) {
    %c0_i32 = arith.constant 0 : i32
    %c0_i32_0 = arith.constant 0 : i32
    return %c0_i32, %arg1 : i32, i32
  }
  func.func @transform_3(%arg0: i32, %arg1: i32, %arg2: i32) -> (i32, i32) {
    %c0_i32 = arith.constant 0 : i32
    return %arg0, %arg1 : i32, i32
  }
}

module attributes {stable_mosaic.version = 11 : i64} {
  func.func @_flash_mha_kernel(%arg0: i32, %arg1: i32, %arg2: i32, %arg3: memref<1x8x128xbf16, #tpu.memory_space<vmem>>, %arg4: memref<1x16x128xbf16, #tpu.memory_space<vmem>>, %arg5: memref<1x16x128xbf16, #tpu.memory_space<vmem>>, %arg6: memref<1x8x128xbf16, #tpu.memory_space<vmem>>, %arg7: memref<4x8x1xf32, #tpu.memory_space<vmem>>, %arg8: memref<4x8x1xf32, #tpu.memory_space<vmem>>, %arg9: memref<4x8x32xf32, #tpu.memory_space<vmem>>) attributes {dimension_semantics = [#tpu.dimension_semantics<parallel>, #tpu.dimension_semantics<parallel>, #tpu.dimension_semantics<arbitrary>], iteration_bounds = array<i64: 2, 1, 1>, scalar_prefetch = 0 : i64, scratch_operands = 3 : i64, tpu.core_type = #tpu.core_type<tc>, window_params = [{transform_indices = @transform_0, window_bounds = array<i64: 1, 8, 128>}, {transform_indices = @transform_1, window_bounds = array<i64: 1, 16, 128>}, {transform_indices = @transform_2, window_bounds = array<i64: 1, 16, 128>}, {transform_indices = @transform_3, window_bounds = array<i64: 1, 8, 128>}]} {
    %c0_i32 = arith.constant 0 : i32
    %0 = arith.cmpi eq, %arg2, %c0_i32 : i32
    %1 = arith.extui %0 : i1 to i32
    %c0_i32_0 = arith.constant 0 : i32
    %2 = arith.cmpi ne, %1, %c0_i32_0 : i32
    scf.if %2 {
      %cst_95 = arith.constant 0xFF800000 : f32
      %156 = vector.broadcast %cst_95 : f32 to vector<4x8x1xf32>
      %c0_96 = arith.constant 0 : index
      %c0_97 = arith.constant 0 : index
      %c0_98 = arith.constant 0 : index
      %157 = vector.load %arg7[%c0_96, %c0_97, %c0_98] : memref<4x8x1xf32, #tpu.memory_space<vmem>>, vector<4x8x1xf32>
      tpu.vector_store %arg7[%c0_96, %c0_97, %c0_98], %156 {strides = array<i32>} : memref<4x8x1xf32, #tpu.memory_space<vmem>>, vector<4x8x1xf32>,
      %cst_99 = arith.constant 0.000000e+00 : f32
      %158 = vector.broadcast %cst_99 : f32 to vector<4x8x1xf32>
      %c0_100 = arith.constant 0 : index
      %c0_101 = arith.constant 0 : index
      %c0_102 = arith.constant 0 : index
      %159 = vector.load %arg8[%c0_100, %c0_101, %c0_102] : memref<4x8x1xf32, #tpu.memory_space<vmem>>, vector<4x8x1xf32>
      tpu.vector_store %arg8[%c0_100, %c0_101, %c0_102], %158 {strides = array<i32>} : memref<4x8x1xf32, #tpu.memory_space<vmem>>, vector<4x8x1xf32>,
      %cst_103 = arith.constant 0.000000e+00 : f32
      %160 = vector.broadcast %cst_103 : f32 to vector<4x8x32xf32>
      %c0_104 = arith.constant 0 : index
      %c0_105 = arith.constant 0 : index
      %c0_106 = arith.constant 0 : index
      %161 = vector.load %arg9[%c0_104, %c0_105, %c0_106] : memref<4x8x32xf32, #tpu.memory_space<vmem>>, vector<4x8x32xf32>
      tpu.vector_store %arg9[%c0_104, %c0_105, %c0_106], %160 {strides = array<i32>} : memref<4x8x32xf32, #tpu.memory_space<vmem>>, vector<4x8x32xf32>,
    } else {
    }
    %c0 = arith.constant 0 : index
    %c0_1 = arith.constant 0 : index
    %c0_2 = arith.constant 0 : index
    %3 = vector.load %arg3[%c0, %c0_1, %c0_2] : memref<1x8x128xbf16, #tpu.memory_space<vmem>>, vector<1x8x128xbf16>
    %4 = vector.shape_cast %3 : vector<1x8x128xbf16> to vector<8x128xbf16>
    %c0_3 = arith.constant 0 : index
    %c0_4 = arith.constant 0 : index
    %c0_5 = arith.constant 0 : index
    %5 = vector.load %arg4[%c0_3, %c0_4, %c0_5] : memref<1x16x128xbf16, #tpu.memory_space<vmem>>, vector<1x16x128xbf16>
    %6 = vector.shape_cast %5 : vector<1x16x128xbf16> to vector<16x128xbf16>
    %c0_6 = arith.constant 0 : index
    %c0_7 = arith.constant 0 : index
    %c0_8 = arith.constant 0 : index
    %7 = vector.load %arg5[%c0_6, %c0_7, %c0_8] : memref<1x16x128xbf16, #tpu.memory_space<vmem>>, vector<1x16x128xbf16>
    %8 = vector.shape_cast %7 : vector<1x16x128xbf16> to vector<16x128xbf16>
    %9 = vector.extract_strided_slice %4 {offsets = [0, 0], sizes = [8, 32], strides = [1, 1]} : vector<8x128xbf16> to vector<8x32xbf16>
    %10 = vector.extract_strided_slice %6 {offsets = [0, 0], sizes = [16, 32], strides = [1, 1]} : vector<16x128xbf16> to vector<16x32xbf16>
    %cst = arith.constant dense<0.000000e+00> : vector<8x16xf32>
    %11 = tpu.matmul %9, %10, %cst {dimension_numbers = #tpu.dot_dimension_numbers<[1], [1], [0], [0], [0, 0, 1, 0], [], []>} : vector<8x32xbf16>, vector<16x32xbf16>, vector<8x16xf32> -> vector<8x16xf32>
    %c0_9 = arith.constant 0 : index
    %c0_10 = arith.constant 0 : index
    %c0_11 = arith.constant 0 : index
    %12 = vector.load %arg7[%c0_9, %c0_10, %c0_11] : memref<4x8x1xf32, #tpu.memory_space<vmem>>, vector<1x8x1xf32>
    %13 = vector.shape_cast %12 : vector<1x8x1xf32> to vector<8x1xf32>
    %cst_12 = arith.constant dense<0xFF800000> : vector<8xf32>
    %14 = vector.multi_reduction <maximumf>, %11, %cst_12 [1] : vector<8x16xf32> to vector<8xf32>
    %15 = vector.shape_cast %14 : vector<8xf32> to vector<8x1xf32>
    %16 = arith.maximumf %13, %15 : vector<8x1xf32>
    %17 = arith.subf %13, %16 : vector<8x1xf32>
    %18 = math.exp %17 : vector<8x1xf32>
    %19 = vector.broadcast %16 : vector<8x1xf32> to vector<8x16xf32>
    %20 = arith.subf %11, %19 : vector<8x16xf32>
    %21 = math.exp %20 : vector<8x16xf32>
    %c0_13 = arith.constant 0 : index
    %c0_14 = arith.constant 0 : index
    %c0_15 = arith.constant 0 : index
    %22 = vector.load %arg8[%c0_13, %c0_14, %c0_15] : memref<4x8x1xf32, #tpu.memory_space<vmem>>, vector<1x8x1xf32>
    %23 = vector.shape_cast %22 : vector<1x8x1xf32> to vector<8x1xf32>
    %24 = arith.mulf %18, %23 : vector<8x1xf32>
    %cst_16 = arith.constant dense<0.000000e+00> : vector<8xf32>
    %25 = vector.multi_reduction <add>, %21, %cst_16 [1] : vector<8x16xf32> to vector<8xf32>
    %26 = vector.shape_cast %25 : vector<8xf32> to vector<8x1xf32>
    %27 = arith.addf %24, %26 : vector<8x1xf32>
    %c0_17 = arith.constant 0 : index
    %c0_18 = arith.constant 0 : index
    %c0_19 = arith.constant 0 : index
    %28 = vector.load %arg8[%c0_17, %c0_18, %c0_19] : memref<4x8x1xf32, #tpu.memory_space<vmem>>, vector<1x8x1xf32>
    %29 = vector.shape_cast %28 : vector<1x8x1xf32> to vector<8x1xf32>
    %30 = vector.shape_cast %27 : vector<8x1xf32> to vector<1x8x1xf32>
    tpu.vector_store %arg8[%c0_17, %c0_18, %c0_19], %30 {strides = array<i32>} : memref<4x8x1xf32, #tpu.memory_space<vmem>>, vector<1x8x1xf32>,
    %c0_20 = arith.constant 0 : index
    %c0_21 = arith.constant 0 : index
    %c0_22 = arith.constant 0 : index
    %31 = vector.load %arg9[%c0_20, %c0_21, %c0_22] : memref<4x8x32xf32, #tpu.memory_space<vmem>>, vector<1x8x32xf32>
    %32 = vector.shape_cast %31 : vector<1x8x32xf32> to vector<8x32xf32>
    %33 = vector.broadcast %18 : vector<8x1xf32> to vector<8x32xf32>
    %34 = arith.mulf %33, %32 : vector<8x32xf32>
    %35 = arith.truncf %21 : vector<8x16xf32> to vector<8x16xbf16>
    %36 = vector.extract_strided_slice %8 {offsets = [0, 0], sizes = [16, 32], strides = [1, 1]} : vector<16x128xbf16> to vector<16x32xbf16>
    %cst_23 = arith.constant dense<0.000000e+00> : vector<8x32xf32>
    %37 = tpu.matmul %35, %36, %cst_23 {dimension_numbers = #tpu.dot_dimension_numbers<[1], [0], [0], [1], [0, 0, 1, 1], [], []>} : vector<8x16xbf16>, vector<16x32xbf16>, vector<8x32xf32> -> vector<8x32xf32>
    %38 = arith.addf %34, %37 : vector<8x32xf32>
    %c0_24 = arith.constant 0 : index
    %c0_25 = arith.constant 0 : index
    %c0_26 = arith.constant 0 : index
    %39 = vector.load %arg9[%c0_24, %c0_25, %c0_26] : memref<4x8x32xf32, #tpu.memory_space<vmem>>, vector<1x8x32xf32>
    %40 = vector.shape_cast %39 : vector<1x8x32xf32> to vector<8x32xf32>
    %41 = vector.shape_cast %38 : vector<8x32xf32> to vector<1x8x32xf32>
    tpu.vector_store %arg9[%c0_24, %c0_25, %c0_26], %41 {strides = array<i32>} : memref<4x8x32xf32, #tpu.memory_space<vmem>>, vector<1x8x32xf32>,
    %c0_27 = arith.constant 0 : index
    %c0_28 = arith.constant 0 : index
    %c0_29 = arith.constant 0 : index
    %42 = vector.load %arg7[%c0_27, %c0_28, %c0_29] : memref<4x8x1xf32, #tpu.memory_space<vmem>>, vector<1x8x1xf32>
    %43 = vector.shape_cast %42 : vector<1x8x1xf32> to vector<8x1xf32>
    %44 = vector.shape_cast %16 : vector<8x1xf32> to vector<1x8x1xf32>
    tpu.vector_store %arg7[%c0_27, %c0_28, %c0_29], %44 {strides = array<i32>} : memref<4x8x1xf32, #tpu.memory_space<vmem>>, vector<1x8x1xf32>,
    %45 = vector.extract_strided_slice %4 {offsets = [0, 32], sizes = [8, 32], strides = [1, 1]} : vector<8x128xbf16> to vector<8x32xbf16>
    %46 = vector.extract_strided_slice %6 {offsets = [0, 32], sizes = [16, 32], strides = [1, 1]} : vector<16x128xbf16> to vector<16x32xbf16>
    %cst_30 = arith.constant dense<0.000000e+00> : vector<8x16xf32>
    %47 = tpu.matmul %45, %46, %cst_30 {dimension_numbers = #tpu.dot_dimension_numbers<[1], [1], [0], [0], [0, 0, 1, 0], [], []>} : vector<8x32xbf16>, vector<16x32xbf16>, vector<8x16xf32> -> vector<8x16xf32>
    %c1 = arith.constant 1 : index
    %c0_31 = arith.constant 0 : index
    %c0_32 = arith.constant 0 : index
    %48 = vector.load %arg7[%c1, %c0_31, %c0_32] : memref<4x8x1xf32, #tpu.memory_space<vmem>>, vector<1x8x1xf32>
    %49 = vector.shape_cast %48 : vector<1x8x1xf32> to vector<8x1xf32>
    %cst_33 = arith.constant dense<0xFF800000> : vector<8xf32>
    %50 = vector.multi_reduction <maximumf>, %47, %cst_33 [1] : vector<8x16xf32> to vector<8xf32>
    %51 = vector.shape_cast %50 : vector<8xf32> to vector<8x1xf32>
    %52 = arith.maximumf %49, %51 : vector<8x1xf32>
    %53 = arith.subf %49, %52 : vector<8x1xf32>
    %54 = math.exp %53 : vector<8x1xf32>
    %55 = vector.broadcast %52 : vector<8x1xf32> to vector<8x16xf32>
    %56 = arith.subf %47, %55 : vector<8x16xf32>
    %57 = math.exp %56 : vector<8x16xf32>
    %c1_34 = arith.constant 1 : index
    %c0_35 = arith.constant 0 : index
    %c0_36 = arith.constant 0 : index
    %58 = vector.load %arg8[%c1_34, %c0_35, %c0_36] : memref<4x8x1xf32, #tpu.memory_space<vmem>>, vector<1x8x1xf32>
    %59 = vector.shape_cast %58 : vector<1x8x1xf32> to vector<8x1xf32>
    %60 = arith.mulf %54, %59 : vector<8x1xf32>
    %cst_37 = arith.constant dense<0.000000e+00> : vector<8xf32>
    %61 = vector.multi_reduction <add>, %57, %cst_37 [1] : vector<8x16xf32> to vector<8xf32>
    %62 = vector.shape_cast %61 : vector<8xf32> to vector<8x1xf32>
    %63 = arith.addf %60, %62 : vector<8x1xf32>
    %c1_38 = arith.constant 1 : index
    %c0_39 = arith.constant 0 : index
    %c0_40 = arith.constant 0 : index
    %64 = vector.load %arg8[%c1_38, %c0_39, %c0_40] : memref<4x8x1xf32, #tpu.memory_space<vmem>>, vector<1x8x1xf32>
    %65 = vector.shape_cast %64 : vector<1x8x1xf32> to vector<8x1xf32>
    %66 = vector.shape_cast %63 : vector<8x1xf32> to vector<1x8x1xf32>
    tpu.vector_store %arg8[%c1_38, %c0_39, %c0_40], %66 {strides = array<i32>} : memref<4x8x1xf32, #tpu.memory_space<vmem>>, vector<1x8x1xf32>,
    %c1_41 = arith.constant 1 : index
    %c0_42 = arith.constant 0 : index
    %c0_43 = arith.constant 0 : index
    %67 = vector.load %arg9[%c1_41, %c0_42, %c0_43] : memref<4x8x32xf32, #tpu.memory_space<vmem>>, vector<1x8x32xf32>
    %68 = vector.shape_cast %67 : vector<1x8x32xf32> to vector<8x32xf32>
    %69 = vector.broadcast %54 : vector<8x1xf32> to vector<8x32xf32>
    %70 = arith.mulf %69, %68 : vector<8x32xf32>
    %71 = arith.truncf %57 : vector<8x16xf32> to vector<8x16xbf16>
    %72 = vector.extract_strided_slice %8 {offsets = [0, 32], sizes = [16, 32], strides = [1, 1]} : vector<16x128xbf16> to vector<16x32xbf16>
    %cst_44 = arith.constant dense<0.000000e+00> : vector<8x32xf32>
    %73 = tpu.matmul %71, %72, %cst_44 {dimension_numbers = #tpu.dot_dimension_numbers<[1], [0], [0], [1], [0, 0, 1, 1], [], []>} : vector<8x16xbf16>, vector<16x32xbf16>, vector<8x32xf32> -> vector<8x32xf32>
    %74 = arith.addf %70, %73 : vector<8x32xf32>
    %c1_45 = arith.constant 1 : index
    %c0_46 = arith.constant 0 : index
    %c0_47 = arith.constant 0 : index
    %75 = vector.load %arg9[%c1_45, %c0_46, %c0_47] : memref<4x8x32xf32, #tpu.memory_space<vmem>>, vector<1x8x32xf32>
    %76 = vector.shape_cast %75 : vector<1x8x32xf32> to vector<8x32xf32>
    %77 = vector.shape_cast %74 : vector<8x32xf32> to vector<1x8x32xf32>
    tpu.vector_store %arg9[%c1_45, %c0_46, %c0_47], %77 {strides = array<i32>} : memref<4x8x32xf32, #tpu.memory_space<vmem>>, vector<1x8x32xf32>,
    %c1_48 = arith.constant 1 : index
    %c0_49 = arith.constant 0 : index
    %c0_50 = arith.constant 0 : index
    %78 = vector.load %arg7[%c1_48, %c0_49, %c0_50] : memref<4x8x1xf32, #tpu.memory_space<vmem>>, vector<1x8x1xf32>
    %79 = vector.shape_cast %78 : vector<1x8x1xf32> to vector<8x1xf32>
    %80 = vector.shape_cast %52 : vector<8x1xf32> to vector<1x8x1xf32>
    tpu.vector_store %arg7[%c1_48, %c0_49, %c0_50], %80 {strides = array<i32>} : memref<4x8x1xf32, #tpu.memory_space<vmem>>, vector<1x8x1xf32>,
    %81 = vector.extract_strided_slice %4 {offsets = [0, 64], sizes = [8, 32], strides = [1, 1]} : vector<8x128xbf16> to vector<8x32xbf16>
    %82 = vector.extract_strided_slice %6 {offsets = [0, 64], sizes = [16, 32], strides = [1, 1]} : vector<16x128xbf16> to vector<16x32xbf16>
    %cst_51 = arith.constant dense<0.000000e+00> : vector<8x16xf32>
    %83 = tpu.matmul %81, %82, %cst_51 {dimension_numbers = #tpu.dot_dimension_numbers<[1], [1], [0], [0], [0, 0, 1, 0], [], []>} : vector<8x32xbf16>, vector<16x32xbf16>, vector<8x16xf32> -> vector<8x16xf32>
    %c2 = arith.constant 2 : index
    %c0_52 = arith.constant 0 : index
    %c0_53 = arith.constant 0 : index
    %84 = vector.load %arg7[%c2, %c0_52, %c0_53] : memref<4x8x1xf32, #tpu.memory_space<vmem>>, vector<1x8x1xf32>
    %85 = vector.shape_cast %84 : vector<1x8x1xf32> to vector<8x1xf32>
    %cst_54 = arith.constant dense<0xFF800000> : vector<8xf32>
    %86 = vector.multi_reduction <maximumf>, %83, %cst_54 [1] : vector<8x16xf32> to vector<8xf32>
    %87 = vector.shape_cast %86 : vector<8xf32> to vector<8x1xf32>
    %88 = arith.maximumf %85, %87 : vector<8x1xf32>
    %89 = arith.subf %85, %88 : vector<8x1xf32>
    %90 = math.exp %89 : vector<8x1xf32>
    %91 = vector.broadcast %88 : vector<8x1xf32> to vector<8x16xf32>
    %92 = arith.subf %83, %91 : vector<8x16xf32>
    %93 = math.exp %92 : vector<8x16xf32>
    %c2_55 = arith.constant 2 : index
    %c0_56 = arith.constant 0 : index
    %c0_57 = arith.constant 0 : index
    %94 = vector.load %arg8[%c2_55, %c0_56, %c0_57] : memref<4x8x1xf32, #tpu.memory_space<vmem>>, vector<1x8x1xf32>
    %95 = vector.shape_cast %94 : vector<1x8x1xf32> to vector<8x1xf32>
    %96 = arith.mulf %90, %95 : vector<8x1xf32>
    %cst_58 = arith.constant dense<0.000000e+00> : vector<8xf32>
    %97 = vector.multi_reduction <add>, %93, %cst_58 [1] : vector<8x16xf32> to vector<8xf32>
    %98 = vector.shape_cast %97 : vector<8xf32> to vector<8x1xf32>
    %99 = arith.addf %96, %98 : vector<8x1xf32>
    %c2_59 = arith.constant 2 : index
    %c0_60 = arith.constant 0 : index
    %c0_61 = arith.constant 0 : index
    %100 = vector.load %arg8[%c2_59, %c0_60, %c0_61] : memref<4x8x1xf32, #tpu.memory_space<vmem>>, vector<1x8x1xf32>
    %101 = vector.shape_cast %100 : vector<1x8x1xf32> to vector<8x1xf32>
    %102 = vector.shape_cast %99 : vector<8x1xf32> to vector<1x8x1xf32>
    tpu.vector_store %arg8[%c2_59, %c0_60, %c0_61], %102 {strides = array<i32>} : memref<4x8x1xf32, #tpu.memory_space<vmem>>, vector<1x8x1xf32>,
    %c2_62 = arith.constant 2 : index
    %c0_63 = arith.constant 0 : index
    %c0_64 = arith.constant 0 : index
    %103 = vector.load %arg9[%c2_62, %c0_63, %c0_64] : memref<4x8x32xf32, #tpu.memory_space<vmem>>, vector<1x8x32xf32>
    %104 = vector.shape_cast %103 : vector<1x8x32xf32> to vector<8x32xf32>
    %105 = vector.broadcast %90 : vector<8x1xf32> to vector<8x32xf32>
    %106 = arith.mulf %105, %104 : vector<8x32xf32>
    %107 = arith.truncf %93 : vector<8x16xf32> to vector<8x16xbf16>
    %108 = vector.extract_strided_slice %8 {offsets = [0, 64], sizes = [16, 32], strides = [1, 1]} : vector<16x128xbf16> to vector<16x32xbf16>
    %cst_65 = arith.constant dense<0.000000e+00> : vector<8x32xf32>
    %109 = tpu.matmul %107, %108, %cst_65 {dimension_numbers = #tpu.dot_dimension_numbers<[1], [0], [0], [1], [0, 0, 1, 1], [], []>} : vector<8x16xbf16>, vector<16x32xbf16>, vector<8x32xf32> -> vector<8x32xf32>
    %110 = arith.addf %106, %109 : vector<8x32xf32>
    %c2_66 = arith.constant 2 : index
    %c0_67 = arith.constant 0 : index
    %c0_68 = arith.constant 0 : index
    %111 = vector.load %arg9[%c2_66, %c0_67, %c0_68] : memref<4x8x32xf32, #tpu.memory_space<vmem>>, vector<1x8x32xf32>
    %112 = vector.shape_cast %111 : vector<1x8x32xf32> to vector<8x32xf32>
    %113 = vector.shape_cast %110 : vector<8x32xf32> to vector<1x8x32xf32>
    tpu.vector_store %arg9[%c2_66, %c0_67, %c0_68], %113 {strides = array<i32>} : memref<4x8x32xf32, #tpu.memory_space<vmem>>, vector<1x8x32xf32>,
    %c2_69 = arith.constant 2 : index
    %c0_70 = arith.constant 0 : index
    %c0_71 = arith.constant 0 : index
    %114 = vector.load %arg7[%c2_69, %c0_70, %c0_71] : memref<4x8x1xf32, #tpu.memory_space<vmem>>, vector<1x8x1xf32>
    %115 = vector.shape_cast %114 : vector<1x8x1xf32> to vector<8x1xf32>
    %116 = vector.shape_cast %88 : vector<8x1xf32> to vector<1x8x1xf32>
    tpu.vector_store %arg7[%c2_69, %c0_70, %c0_71], %116 {strides = array<i32>} : memref<4x8x1xf32, #tpu.memory_space<vmem>>, vector<1x8x1xf32>,
    %117 = vector.extract_strided_slice %4 {offsets = [0, 96], sizes = [8, 32], strides = [1, 1]} : vector<8x128xbf16> to vector<8x32xbf16>
    %118 = vector.extract_strided_slice %6 {offsets = [0, 96], sizes = [16, 32], strides = [1, 1]} : vector<16x128xbf16> to vector<16x32xbf16>
    %cst_72 = arith.constant dense<0.000000e+00> : vector<8x16xf32>
    %119 = tpu.matmul %117, %118, %cst_72 {dimension_numbers = #tpu.dot_dimension_numbers<[1], [1], [0], [0], [0, 0, 1, 0], [], []>} : vector<8x32xbf16>, vector<16x32xbf16>, vector<8x16xf32> -> vector<8x16xf32>
    %c3 = arith.constant 3 : index
    %c0_73 = arith.constant 0 : index
    %c0_74 = arith.constant 0 : index
    %120 = vector.load %arg7[%c3, %c0_73, %c0_74] : memref<4x8x1xf32, #tpu.memory_space<vmem>>, vector<1x8x1xf32>
    %121 = vector.shape_cast %120 : vector<1x8x1xf32> to vector<8x1xf32>
    %cst_75 = arith.constant dense<0xFF800000> : vector<8xf32>
    %122 = vector.multi_reduction <maximumf>, %119, %cst_75 [1] : vector<8x16xf32> to vector<8xf32>
    %123 = vector.shape_cast %122 : vector<8xf32> to vector<8x1xf32>
    %124 = arith.maximumf %121, %123 : vector<8x1xf32>
    %125 = arith.subf %121, %124 : vector<8x1xf32>
    %126 = math.exp %125 : vector<8x1xf32>
    %127 = vector.broadcast %124 : vector<8x1xf32> to vector<8x16xf32>
    %128 = arith.subf %119, %127 : vector<8x16xf32>
    %129 = math.exp %128 : vector<8x16xf32>
    %c3_76 = arith.constant 3 : index
    %c0_77 = arith.constant 0 : index
    %c0_78 = arith.constant 0 : index
    %130 = vector.load %arg8[%c3_76, %c0_77, %c0_78] : memref<4x8x1xf32, #tpu.memory_space<vmem>>, vector<1x8x1xf32>
    %131 = vector.shape_cast %130 : vector<1x8x1xf32> to vector<8x1xf32>
    %132 = arith.mulf %126, %131 : vector<8x1xf32>
    %cst_79 = arith.constant dense<0.000000e+00> : vector<8xf32>
    %133 = vector.multi_reduction <add>, %129, %cst_79 [1] : vector<8x16xf32> to vector<8xf32>
    %134 = vector.shape_cast %133 : vector<8xf32> to vector<8x1xf32>
    %135 = arith.addf %132, %134 : vector<8x1xf32>
    %c3_80 = arith.constant 3 : index
    %c0_81 = arith.constant 0 : index
    %c0_82 = arith.constant 0 : index
    %136 = vector.load %arg8[%c3_80, %c0_81, %c0_82] : memref<4x8x1xf32, #tpu.memory_space<vmem>>, vector<1x8x1xf32>
    %137 = vector.shape_cast %136 : vector<1x8x1xf32> to vector<8x1xf32>
    %138 = vector.shape_cast %135 : vector<8x1xf32> to vector<1x8x1xf32>
    tpu.vector_store %arg8[%c3_80, %c0_81, %c0_82], %138 {strides = array<i32>} : memref<4x8x1xf32, #tpu.memory_space<vmem>>, vector<1x8x1xf32>,
    %c3_83 = arith.constant 3 : index
    %c0_84 = arith.constant 0 : index
    %c0_85 = arith.constant 0 : index
    %139 = vector.load %arg9[%c3_83, %c0_84, %c0_85] : memref<4x8x32xf32, #tpu.memory_space<vmem>>, vector<1x8x32xf32>
    %140 = vector.shape_cast %139 : vector<1x8x32xf32> to vector<8x32xf32>
    %141 = vector.broadcast %126 : vector<8x1xf32> to vector<8x32xf32>
    %142 = arith.mulf %141, %140 : vector<8x32xf32>
    %143 = arith.truncf %129 : vector<8x16xf32> to vector<8x16xbf16>
    %144 = vector.extract_strided_slice %8 {offsets = [0, 96], sizes = [16, 32], strides = [1, 1]} : vector<16x128xbf16> to vector<16x32xbf16>
    %cst_86 = arith.constant dense<0.000000e+00> : vector<8x32xf32>
    %145 = tpu.matmul %143, %144, %cst_86 {dimension_numbers = #tpu.dot_dimension_numbers<[1], [0], [0], [1], [0, 0, 1, 1], [], []>} : vector<8x16xbf16>, vector<16x32xbf16>, vector<8x32xf32> -> vector<8x32xf32>
    %146 = arith.addf %142, %145 : vector<8x32xf32>
    %c3_87 = arith.constant 3 : index
    %c0_88 = arith.constant 0 : index
    %c0_89 = arith.constant 0 : index
    %147 = vector.load %arg9[%c3_87, %c0_88, %c0_89] : memref<4x8x32xf32, #tpu.memory_space<vmem>>, vector<1x8x32xf32>
    %148 = vector.shape_cast %147 : vector<1x8x32xf32> to vector<8x32xf32>
    %149 = vector.shape_cast %146 : vector<8x32xf32> to vector<1x8x32xf32>
    tpu.vector_store %arg9[%c3_87, %c0_88, %c0_89], %149 {strides = array<i32>} : memref<4x8x32xf32, #tpu.memory_space<vmem>>, vector<1x8x32xf32>,
    %c3_90 = arith.constant 3 : index
    %c0_91 = arith.constant 0 : index
    %c0_92 = arith.constant 0 : index
    %150 = vector.load %arg7[%c3_90, %c0_91, %c0_92] : memref<4x8x1xf32, #tpu.memory_space<vmem>>, vector<1x8x1xf32>
    %151 = vector.shape_cast %150 : vector<1x8x1xf32> to vector<8x1xf32>
    %152 = vector.shape_cast %124 : vector<8x1xf32> to vector<1x8x1xf32>
    tpu.vector_store %arg7[%c3_90, %c0_91, %c0_92], %152 {strides = array<i32>} : memref<4x8x1xf32, #tpu.memory_space<vmem>>, vector<1x8x1xf32>,
    %c0_i32_93 = arith.constant 0 : i32
    %153 = arith.cmpi eq, %arg2, %c0_i32_93 : i32
    %154 = arith.extui %153 : i1 to i32
    %c0_i32_94 = arith.constant 0 : i32
    %155 = arith.cmpi ne, %154, %c0_i32_94 : i32
    scf.if %155 {
      %c0_95 = arith.constant 0 : index
      %c0_96 = arith.constant 0 : index
      %c0_97 = arith.constant 0 : index
      %156 = vector.load %arg9[%c0_95, %c0_96, %c0_97] : memref<4x8x32xf32, #tpu.memory_space<vmem>>, vector<1x8x32xf32>
      %157 = vector.shape_cast %156 : vector<1x8x32xf32> to vector<8x32xf32>
      %c0_98 = arith.constant 0 : index
      %c0_99 = arith.constant 0 : index
      %c0_100 = arith.constant 0 : index
      %158 = vector.load %arg8[%c0_98, %c0_99, %c0_100] : memref<4x8x1xf32, #tpu.memory_space<vmem>>, vector<1x8x1xf32>
      %159 = vector.shape_cast %158 : vector<1x8x1xf32> to vector<8x1xf32>
      %160 = vector.broadcast %159 : vector<8x1xf32> to vector<8x32xf32>
      %161 = arith.divf %157, %160 : vector<8x32xf32>
      %c1_101 = arith.constant 1 : index
      %c0_102 = arith.constant 0 : index
      %c0_103 = arith.constant 0 : index
      %162 = vector.load %arg9[%c1_101, %c0_102, %c0_103] : memref<4x8x32xf32, #tpu.memory_space<vmem>>, vector<1x8x32xf32>
      %163 = vector.shape_cast %162 : vector<1x8x32xf32> to vector<8x32xf32>
      %c1_104 = arith.constant 1 : index
      %c0_105 = arith.constant 0 : index
      %c0_106 = arith.constant 0 : index
      %164 = vector.load %arg8[%c1_104, %c0_105, %c0_106] : memref<4x8x1xf32, #tpu.memory_space<vmem>>, vector<1x8x1xf32>
      %165 = vector.shape_cast %164 : vector<1x8x1xf32> to vector<8x1xf32>
      %166 = vector.broadcast %165 : vector<8x1xf32> to vector<8x32xf32>
      %167 = arith.divf %163, %166 : vector<8x32xf32>
      %c2_107 = arith.constant 2 : index
      %c0_108 = arith.constant 0 : index
      %c0_109 = arith.constant 0 : index
      %168 = vector.load %arg9[%c2_107, %c0_108, %c0_109] : memref<4x8x32xf32, #tpu.memory_space<vmem>>, vector<1x8x32xf32>
      %169 = vector.shape_cast %168 : vector<1x8x32xf32> to vector<8x32xf32>
      %c2_110 = arith.constant 2 : index
      %c0_111 = arith.constant 0 : index
      %c0_112 = arith.constant 0 : index
      %170 = vector.load %arg8[%c2_110, %c0_111, %c0_112] : memref<4x8x1xf32, #tpu.memory_space<vmem>>, vector<1x8x1xf32>
      %171 = vector.shape_cast %170 : vector<1x8x1xf32> to vector<8x1xf32>
      %172 = vector.broadcast %171 : vector<8x1xf32> to vector<8x32xf32>
      %173 = arith.divf %169, %172 : vector<8x32xf32>
      %c3_113 = arith.constant 3 : index
      %c0_114 = arith.constant 0 : index
      %c0_115 = arith.constant 0 : index
      %174 = vector.load %arg9[%c3_113, %c0_114, %c0_115] : memref<4x8x32xf32, #tpu.memory_space<vmem>>, vector<1x8x32xf32>
      %175 = vector.shape_cast %174 : vector<1x8x32xf32> to vector<8x32xf32>
      %c3_116 = arith.constant 3 : index
      %c0_117 = arith.constant 0 : index
      %c0_118 = arith.constant 0 : index
      %176 = vector.load %arg8[%c3_116, %c0_117, %c0_118] : memref<4x8x1xf32, #tpu.memory_space<vmem>>, vector<1x8x1xf32>
      %177 = vector.shape_cast %176 : vector<1x8x1xf32> to vector<8x1xf32>
      %178 = vector.broadcast %177 : vector<8x1xf32> to vector<8x32xf32>
      %179 = arith.divf %175, %178 : vector<8x32xf32>
      %180 = tpu.concatenate %161, %167, %173, %179 in 1 : vector<8x32xf32>, vector<8x32xf32>, vector<8x32xf32>, vector<8x32xf32> -> vector<8x128xf32>
      %181 = arith.truncf %180 : vector<8x128xf32> to vector<8x128xbf16>
      %c0_119 = arith.constant 0 : index
      %c0_120 = arith.constant 0 : index
      %c0_121 = arith.constant 0 : index
      %182 = vector.load %arg6[%c0_119, %c0_120, %c0_121] : memref<1x8x128xbf16, #tpu.memory_space<vmem>>, vector<1x8x128xbf16>
      %183 = vector.shape_cast %182 : vector<1x8x128xbf16> to vector<8x128xbf16>
      %184 = vector.shape_cast %181 : vector<8x128xbf16> to vector<1x8x128xbf16>
      tpu.vector_store %arg6[%c0_119, %c0_120, %c0_121], %184 {strides = array<i32>} : memref<1x8x128xbf16, #tpu.memory_space<vmem>>, vector<1x8x128xbf16>,
    } else {
    }
    return
  }
  func.func @transform_0(%arg0: i32, %arg1: i32, %arg2: i32) -> (i32, i32, i32) {
    %c0_i32 = arith.constant 0 : i32
    %c0_i32_0 = arith.constant 0 : i32
    return %arg0, %arg1, %c0_i32 : i32, i32, i32
  }
  func.func @transform_1(%arg0: i32, %arg1: i32, %arg2: i32) -> (i32, i32, i32) {
    %c0_i32 = arith.constant 0 : i32
    %c0_i32_0 = arith.constant 0 : i32
    return %arg0, %arg2, %c0_i32 : i32, i32, i32
  }
  func.func @transform_2(%arg0: i32, %arg1: i32, %arg2: i32) -> (i32, i32, i32) {
    %c1_i32 = arith.constant 1 : i32
    %c0_i32 = arith.constant 0 : i32
    return %arg0, %arg2, %c1_i32 : i32, i32, i32
  }
  func.func @transform_3(%arg0: i32, %arg1: i32, %arg2: i32) -> (i32, i32, i32) {
    %c0_i32 = arith.constant 0 : i32
    %c0_i32_0 = arith.constant 0 : i32
    return %arg0, %arg1, %c0_i32 : i32, i32, i32
  }
}

module attributes {stable_mosaic.version = 11 : i64} {
  func.func @_linear_kernel(%arg0: i32, %arg1: i32, %arg2: i32, %arg3: memref<16x128xf32, #tpu.memory_space<vmem>>, %arg4: memref<128x512xbf16, #tpu.memory_space<vmem>>, %arg5: memref<1x512xf32, #tpu.memory_space<vmem>>, %arg6: memref<16x512xbf16, #tpu.memory_space<vmem>>, %arg7: memref<16x512xf32, #tpu.memory_space<vmem>>) attributes {dimension_semantics = [#tpu.dimension_semantics<parallel>, #tpu.dimension_semantics<parallel>, #tpu.dimension_semantics<arbitrary>], iteration_bounds = array<i64: 1, 1, 1>, scalar_prefetch = 0 : i64, scratch_operands = 1 : i64, tpu.core_type = #tpu.core_type<tc>, window_params = [{transform_indices = @transform_0, window_bounds = array<i64: 16, 128>}, {transform_indices = @transform_1, window_bounds = array<i64: 128, 512>}, {transform_indices = @transform_2, window_bounds = array<i64: 1, 512>}, {transform_indices = @transform_3, window_bounds = array<i64: 16, 512>}]} {
    %c0_i32 = arith.constant 0 : i32
    %0 = arith.cmpi eq, %arg2, %c0_i32 : i32
    %1 = arith.extui %0 : i1 to i32
    %c0_i32_0 = arith.constant 0 : i32
    %2 = arith.cmpi ne, %1, %c0_i32_0 : i32
    scf.if %2 {
      %cst_10 = arith.constant 0.000000e+00 : f32
      %13 = vector.broadcast %cst_10 : f32 to vector<16x512xf32>
      %c0_11 = arith.constant 0 : index
      %c0_12 = arith.constant 0 : index
      %14 = vector.load %arg7[%c0_11, %c0_12] : memref<16x512xf32, #tpu.memory_space<vmem>>, vector<16x512xf32>
      tpu.vector_store %arg7[%c0_11, %c0_12], %13 {strides = array<i32>} : memref<16x512xf32, #tpu.memory_space<vmem>>, vector<16x512xf32>,
    } else {
    }
    %c0 = arith.constant 0 : index
    %c0_1 = arith.constant 0 : index
    %3 = vector.load %arg7[%c0, %c0_1] : memref<16x512xf32, #tpu.memory_space<vmem>>, vector<16x512xf32>
    %c0_2 = arith.constant 0 : index
    %c0_3 = arith.constant 0 : index
    %4 = vector.load %arg3[%c0_2, %c0_3] : memref<16x128xf32, #tpu.memory_space<vmem>>, vector<16x128xf32>
    %5 = arith.truncf %4 : vector<16x128xf32> to vector<16x128xbf16>
    %c0_4 = arith.constant 0 : index
    %c0_5 = arith.constant 0 : index
    %6 = vector.load %arg4[%c0_4, %c0_5] : memref<128x512xbf16, #tpu.memory_space<vmem>>, vector<128x512xbf16>
    %cst = arith.constant dense<0.000000e+00> : vector<16x512xf32>
    %7 = tpu.matmul %5, %6, %cst {dimension_numbers = #tpu.dot_dimension_numbers<[1], [0], [0], [1], [0, 0, 1, 1], [], []>} : vector<16x128xbf16>, vector<128x512xbf16>, vector<16x512xf32> -> vector<16x512xf32>
    %8 = arith.addf %3, %7 : vector<16x512xf32>
    %c0_6 = arith.constant 0 : index
    %c0_7 = arith.constant 0 : index
    %9 = vector.load %arg7[%c0_6, %c0_7] : memref<16x512xf32, #tpu.memory_space<vmem>>, vector<16x512xf32>
    tpu.vector_store %arg7[%c0_6, %c0_7], %8 {strides = array<i32>} : memref<16x512xf32, #tpu.memory_space<vmem>>, vector<16x512xf32>,
    %c0_i32_8 = arith.constant 0 : i32
    %10 = arith.cmpi eq, %arg2, %c0_i32_8 : i32
    %11 = arith.extui %10 : i1 to i32
    %c0_i32_9 = arith.constant 0 : i32
    %12 = arith.cmpi ne, %11, %c0_i32_9 : i32
    scf.if %12 {
      %c0_10 = arith.constant 0 : index
      %c0_11 = arith.constant 0 : index
      %13 = vector.load %arg7[%c0_10, %c0_11] : memref<16x512xf32, #tpu.memory_space<vmem>>, vector<16x512xf32>
      %c0_12 = arith.constant 0 : index
      %c0_13 = arith.constant 0 : index
      %14 = vector.load %arg5[%c0_12, %c0_13] : memref<1x512xf32, #tpu.memory_space<vmem>>, vector<1x512xf32>
      %15 = vector.broadcast %14 : vector<1x512xf32> to vector<16x512xf32>
      %16 = arith.addf %13, %15 : vector<16x512xf32>
      %cst_14 = arith.constant 0.000000e+00 : f32
      %17 = vector.broadcast %cst_14 : f32 to vector<16x512xf32>
      %18 = arith.maximumf %16, %17 : vector<16x512xf32>
      %19 = arith.truncf %18 : vector<16x512xf32> to vector<16x512xbf16>
      %c0_15 = arith.constant 0 : index
      %c0_16 = arith.constant 0 : index
      %20 = vector.load %arg6[%c0_15, %c0_16] : memref<16x512xbf16, #tpu.memory_space<vmem>>, vector<16x512xbf16>
      tpu.vector_store %arg6[%c0_15, %c0_16], %19 {strides = array<i32>} : memref<16x512xbf16, #tpu.memory_space<vmem>>, vector<16x512xbf16>,
    } else {
    }
    return
  }
  func.func @transform_0(%arg0: i32, %arg1: i32, %arg2: i32) -> (i32, i32) {
    %c0_i32 = arith.constant 0 : i32
    return %arg0, %arg2 : i32, i32
  }
  func.func @transform_1(%arg0: i32, %arg1: i32, %arg2: i32) -> (i32, i32) {
    %c0_i32 = arith.constant 0 : i32
    return %arg2, %arg1 : i32, i32
  }
  func.func @transform_2(%arg0: i32, %arg1: i32, %arg2: i32) -> (i32, i32) {
    %c0_i32 = arith.constant 0 : i32
    %c0_i32_0 = arith.constant 0 : i32
    return %c0_i32, %arg1 : i32, i32
  }
  func.func @transform_3(%arg0: i32, %arg1: i32, %arg2: i32) -> (i32, i32) {
    %c0_i32 = arith.constant 0 : i32
    return %arg0, %arg1 : i32, i32
  }
}

module attributes {stable_mosaic.version = 11 : i64} {
  func.func @_linear_res_ln_kernel(%arg0: i32, %arg1: i32, %arg2: memref<16x512xbf16, #tpu.memory_space<vmem>>, %arg3: memref<512x128xbf16, #tpu.memory_space<vmem>>, %arg4: memref<1x128xf32, #tpu.memory_space<vmem>>, %arg5: memref<16x128xf32, #tpu.memory_space<vmem>>, %arg6: memref<1x128xf32, #tpu.memory_space<vmem>>, %arg7: memref<1x128xf32, #tpu.memory_space<vmem>>, %arg8: memref<16x128xf32, #tpu.memory_space<vmem>>, %arg9: memref<16x128xf32, #tpu.memory_space<vmem>>) attributes {dimension_semantics = [#tpu.dimension_semantics<parallel>, #tpu.dimension_semantics<arbitrary>], iteration_bounds = array<i64: 1, 1>, scalar_prefetch = 0 : i64, scratch_operands = 1 : i64, tpu.core_type = #tpu.core_type<tc>, window_params = [{transform_indices = @transform_0, window_bounds = array<i64: 16, 512>}, {transform_indices = @transform_1, window_bounds = array<i64: 512, 128>}, {pipeline_mode = #tpu.pipeline_mode<synchronous>, transform_indices = @transform_2, window_bounds = array<i64: 1, 128>}, {transform_indices = @transform_3, window_bounds = array<i64: 16, 128>}, {pipeline_mode = #tpu.pipeline_mode<synchronous>, transform_indices = @transform_4, window_bounds = array<i64: 1, 128>}, {pipeline_mode = #tpu.pipeline_mode<synchronous>, transform_indices = @transform_5, window_bounds = array<i64: 1, 128>}, {transform_indices = @transform_6, window_bounds = array<i64: 16, 128>}]} {
    %c0_i32 = arith.constant 0 : i32
    %0 = arith.cmpi eq, %arg1, %c0_i32 : i32
    %1 = arith.extui %0 : i1 to i32
    %c0_i32_0 = arith.constant 0 : i32
    %2 = arith.cmpi ne, %1, %c0_i32_0 : i32
    scf.if %2 {
      %cst_10 = arith.constant 0.000000e+00 : f32
      %12 = vector.broadcast %cst_10 : f32 to vector<16x128xf32>
      %c0_11 = arith.constant 0 : index
      %c0_12 = arith.constant 0 : index
      %13 = vector.load %arg9[%c0_11, %c0_12] : memref<16x128xf32, #tpu.memory_space<vmem>>, vector<16x128xf32>
      tpu.vector_store %arg9[%c0_11, %c0_12], %12 {strides = array<i32>} : memref<16x128xf32, #tpu.memory_space<vmem>>, vector<16x128xf32>,
    } else {
    }
    %c0 = arith.constant 0 : index
    %c0_1 = arith.constant 0 : index
    %3 = vector.load %arg9[%c0, %c0_1] : memref<16x128xf32, #tpu.memory_space<vmem>>, vector<16x128xf32>
    %c0_2 = arith.constant 0 : index
    %c0_3 = arith.constant 0 : index
    %4 = vector.load %arg2[%c0_2, %c0_3] : memref<16x512xbf16, #tpu.memory_space<vmem>>, vector<16x512xbf16>
    %c0_4 = arith.constant 0 : index
    %c0_5 = arith.constant 0 : index
    %5 = vector.load %arg3[%c0_4, %c0_5] : memref<512x128xbf16, #tpu.memory_space<vmem>>, vector<512x128xbf16>
    %cst = arith.constant dense<0.000000e+00> : vector<16x128xf32>
    %6 = tpu.matmul %4, %5, %cst {dimension_numbers = #tpu.dot_dimension_numbers<[1], [0], [0], [1], [0, 0, 1, 1], [], []>} : vector<16x512xbf16>, vector<512x128xbf16>, vector<16x128xf32> -> vector<16x128xf32>
    %7 = arith.addf %3, %6 : vector<16x128xf32>
    %c0_6 = arith.constant 0 : index
    %c0_7 = arith.constant 0 : index
    %8 = vector.load %arg9[%c0_6, %c0_7] : memref<16x128xf32, #tpu.memory_space<vmem>>, vector<16x128xf32>
    tpu.vector_store %arg9[%c0_6, %c0_7], %7 {strides = array<i32>} : memref<16x128xf32, #tpu.memory_space<vmem>>, vector<16x128xf32>,
    %c0_i32_8 = arith.constant 0 : i32
    %9 = arith.cmpi eq, %arg1, %c0_i32_8 : i32
    %10 = arith.extui %9 : i1 to i32
    %c0_i32_9 = arith.constant 0 : i32
    %11 = arith.cmpi ne, %10, %c0_i32_9 : i32
    scf.if %11 {
      %c0_10 = arith.constant 0 : index
      %c0_11 = arith.constant 0 : index
      %12 = vector.load %arg5[%c0_10, %c0_11] : memref<16x128xf32, #tpu.memory_space<vmem>>, vector<16x128xf32>
      %c0_12 = arith.constant 0 : index
      %c0_13 = arith.constant 0 : index
      %13 = vector.load %arg9[%c0_12, %c0_13] : memref<16x128xf32, #tpu.memory_space<vmem>>, vector<16x128xf32>
      %14 = arith.addf %12, %13 : vector<16x128xf32>
      %c0_14 = arith.constant 0 : index
      %c0_15 = arith.constant 0 : index
      %15 = vector.load %arg4[%c0_14, %c0_15] : memref<1x128xf32, #tpu.memory_space<vmem>>, vector<1x128xf32>
      %16 = vector.broadcast %15 : vector<1x128xf32> to vector<16x128xf32>
      %17 = arith.addf %14, %16 : vector<16x128xf32>
      %cst_16 = arith.constant dense<0.000000e+00> : vector<16xf32>
      %18 = vector.multi_reduction <add>, %17, %cst_16 [1] : vector<16x128xf32> to vector<16xf32>
      %19 = vector.shape_cast %18 : vector<16xf32> to vector<16x1xf32>
      %cst_17 = arith.constant 1.280000e+02 : f32
      %20 = vector.broadcast %cst_17 : f32 to vector<16x1xf32>
      %21 = arith.divf %19, %20 : vector<16x1xf32>
      %22 = vector.broadcast %21 : vector<16x1xf32> to vector<16x128xf32>
      %23 = arith.subf %17, %22 : vector<16x128xf32>
      %24 = arith.mulf %23, %23 : vector<16x128xf32>
      %cst_18 = arith.constant dense<0.000000e+00> : vector<16xf32>
      %25 = vector.multi_reduction <add>, %24, %cst_18 [1] : vector<16x128xf32> to vector<16xf32>
      %26 = vector.shape_cast %25 : vector<16xf32> to vector<16x1xf32>
      %cst_19 = arith.constant 1.280000e+02 : f32
      %27 = vector.broadcast %cst_19 : f32 to vector<16x1xf32>
      %28 = arith.divf %26, %27 : vector<16x1xf32>
      %cst_20 = arith.constant 9.99999974E-6 : f32
      %29 = vector.broadcast %cst_20 : f32 to vector<16x1xf32>
      %30 = arith.addf %28, %29 : vector<16x1xf32>
      %31 = math.rsqrt %30 : vector<16x1xf32>
      %32 = vector.broadcast %31 : vector<16x1xf32> to vector<16x128xf32>
      %33 = arith.mulf %23, %32 : vector<16x128xf32>
      %c0_21 = arith.constant 0 : index
      %c0_22 = arith.constant 0 : index
      %34 = vector.load %arg6[%c0_21, %c0_22] : memref<1x128xf32, #tpu.memory_space<vmem>>, vector<1x128xf32>
      %35 = vector.broadcast %34 : vector<1x128xf32> to vector<16x128xf32>
      %36 = arith.mulf %33, %35 : vector<16x128xf32>
      %c0_23 = arith.constant 0 : index
      %c0_24 = arith.constant 0 : index
      %37 = vector.load %arg7[%c0_23, %c0_24] : memref<1x128xf32, #tpu.memory_space<vmem>>, vector<1x128xf32>
      %38 = vector.broadcast %37 : vector<1x128xf32> to vector<16x128xf32>
      %39 = arith.addf %36, %38 : vector<16x128xf32>
      %c0_25 = arith.constant 0 : index
      %c0_26 = arith.constant 0 : index
      %40 = vector.load %arg8[%c0_25, %c0_26] : memref<16x128xf32, #tpu.memory_space<vmem>>, vector<16x128xf32>
      tpu.vector_store %arg8[%c0_25, %c0_26], %39 {strides = array<i32>} : memref<16x128xf32, #tpu.memory_space<vmem>>, vector<16x128xf32>,
    } else {
    }
    return
  }
  func.func @transform_0(%arg0: i32, %arg1: i32) -> (i32, i32) {
    %c0_i32 = arith.constant 0 : i32
    return %arg0, %arg1 : i32, i32
  }
  func.func @transform_1(%arg0: i32, %arg1: i32) -> (i32, i32) {
    %c0_i32 = arith.constant 0 : i32
    %c0_i32_0 = arith.constant 0 : i32
    return %arg1, %c0_i32 : i32, i32
  }
  func.func @transform_2(%arg0: i32, %arg1: i32) -> (i32, i32) {
    %c0_i32 = arith.constant 0 : i32
    %c0_i32_0 = arith.constant 0 : i32
    %c0_i32_1 = arith.constant 0 : i32
    return %c0_i32, %c0_i32_0 : i32, i32
  }
  func.func @transform_3(%arg0: i32, %arg1: i32) -> (i32, i32) {
    %c0_i32 = arith.constant 0 : i32
    %c0_i32_0 = arith.constant 0 : i32
    return %arg0, %c0_i32 : i32, i32
  }
  func.func @transform_4(%arg0: i32, %arg1: i32) -> (i32, i32) {
    %c0_i32 = arith.constant 0 : i32
    %c0_i32_0 = arith.constant 0 : i32
    %c0_i32_1 = arith.constant 0 : i32
    return %c0_i32, %c0_i32_0 : i32, i32
  }
  func.func @transform_5(%arg0: i32, %arg1: i32) -> (i32, i32) {
    %c0_i32 = arith.constant 0 : i32
    %c0_i32_0 = arith.constant 0 : i32
    %c0_i32_1 = arith.constant 0 : i32
    return %c0_i32, %c0_i32_0 : i32, i32
  }
  func.func @transform_6(%arg0: i32, %arg1: i32) -> (i32, i32) {
    %c0_i32 = arith.constant 0 : i32
    %c0_i32_0 = arith.constant 0 : i32
    return %arg0, %c0_i32 : i32, i32
  }
}

</mosaic_0001>

<bundles_post_ra>
// kernel: decoder_layer.11
= control target key start
LH: loop header
LB: loop body
LE: loop exit
PB: predicated region body
PF: predicated region fallthrough
CT: control target
= control target key end

     0   :  { %v270_v0 = vmov 0.0   ;;  %vm271_vm0 = vmmov 0   ;;  %s355_s1 = inlined_call_operand.vmem [shape: bf16[128,128], index: 1, kind: input, shape index: {}]   ;;  %s356_s0 = inlined_call_operand.vmem [shape: bf16[16,128], index: 0, kind: input, shape index: {}]   ;;  %s357_s3 = inlined_call_operand.vmem [shape: f32[16,128], index: 3, kind: input, shape index: {}]   ;;  %s358_s2 = inlined_call_operand.vmem [shape: f32[1,128], index: 2, kind: input, shape index: {}]   ;;  %s359_s4 = inlined_call_operand.vmem [shape: f32[1,128], index: 4, kind: input, shape index: {}]   ;;  %s360_s5 = inlined_call_operand.vmem [shape: f32[1,128], index: 5, kind: input, shape index: {}]   ;;  %s361_s6 = inlined_call_operand.vmem [shape: f32[16,128], index: 6, kind: output, shape index: {}]  }
   0x1   :  { %235 = vmatprep.subr.bf16.mxu0 %v270_v0  ;;  %v257_v1 = vld [vmem:[%s355_s1] sm:$0xff]   ;;  %251 = vmatprep.mubr.msk.bf16.mxu0 %vm271_vm0, %v270_v0  ;;  %v258_v2 = vld [vmem:[%s355_s1 + $0x8] sm:$0xff]   ;;  %v259_v3 = vld [vmem:[%s355_s1 + $0x10] sm:$0xff]  }
   0x2   :  { %236 = vmatpush3.bf16.msra.mxu0 %v257_v1  ;;  %v260_v4 = vld [vmem:[%s355_s1 + $0x18] sm:$0xff]   ;;  %v261_v5 = vld [vmem:[%s355_s1 + $0x20] sm:$0xff]   ;;  %v262_v6 = vld [vmem:[%s355_s1 + $0x28] sm:$0xff]  }
   0x3   :  { %237 = vmatprep.subr.bf16.mxu0 %v270_v0  ;;  %v263_v7 = vld [vmem:[%s355_s1 + $0x30] sm:$0xff]   ;;  %v264_v8 = vld [vmem:[%s355_s1 + $0x38] sm:$0xff]   ;;  %v265_v9 = vld [vmem:[%s356_s0] sm:$0xff]  }
   0x4   :  { %v152_v10 = vld [vmem:[%s357_s3] sm:$0xff]  ;;  %v153_v12 = vld [vmem:[%s357_s3 + $0x8] sm:$0xff] }
   0x5   :  { %v223_v13 = vld [vmem:[%s358_s2] ss:$0 sm:$0xff] }
   0x6   :  { %238 = vmatpush3.bf16.msra.mxu0 %v258_v2  ;;  %v224_v36 = vld [vmem:[%s359_s4] ss:$0 sm:$0xff] }
   0x7   :  { %239 = vmatprep.subr.bf16.mxu0 %v270_v0  ;;  %v225_v38 = vld [vmem:[%s360_s5] ss:$0 sm:$0xff] }
   0xa   :  { %240 = vmatpush3.bf16.msra.mxu0 %v259_v3 }
   0xb   :  { %241 = vmatprep.subr.bf16.mxu0 %v270_v0 }
   0xe   :  { %242 = vmatpush3.bf16.msra.mxu0 %v260_v4 }
   0xf   :  { %243 = vmatprep.subr.bf16.mxu0 %v270_v0 }
  0x12   :  { %244 = vmatpush3.bf16.msra.mxu0 %v261_v5 }
  0x13   :  { %245 = vmatprep.subr.bf16.mxu0 %v270_v0 }
  0x16   :  { %246 = vmatpush3.bf16.msra.mxu0 %v262_v6 }
  0x17   :  { %247 = vmatprep.subr.bf16.mxu0 %v270_v0 }
  0x1a   :  { %248 = vmatpush3.bf16.msra.mxu0 %v263_v7 }
  0x1b   :  { %249 = vmatprep.subr.bf16.mxu0 %v270_v0 }
  0x1e   :  { %250 = vmatpush3.bf16.msra.mxu0 %v264_v8 }
  0x21   :  { %252 = vmatmul.mubr.bf16.vlgmr.msra.gmra.mrb[0].mxu0 %v265_v9 }
  0xf4   :  { %v138_v11 = vpop.f32.mrb[0].mxu0 }
  0xf5   :  { %v156_v14 = vadd.f32 %v152_v10, %v138_v11  ;;  %v253_v15 = vpop.f32.mrb[1].mxu0 }
  0xf6   :  { %v141_v16 = vpop.f32.mrb[2].mxu0 }
  0xf7   :  { %v157_v17 = vadd.f32 %v153_v12, %v141_v16  ;;  %v254_v18 = vpop.f32.mrb[3].mxu0  ;;  %v165_v19 = vadd.f32 %v223_v13, %v156_v14 }
  0xf9   :  { %167 = vadd.xlane.f32.xlu0 %v165_v19  ;;  %v166_v20 = vadd.f32 %v223_v13, %v157_v17 }
  0xfd   :  { %169 = vadd.xlane.f32.xlu0 %v166_v20 }
 0x186   :  { %v168_v21 = vpop.xlane.xlu0 %167 }
 0x187   :  { %v172_v22 = vmul.f32 0.0078125, %v168_v21 }
 0x189   :  { %v174_v23 = vsub.f32 %v165_v19, %v172_v22 }
 0x18a   :  { %v170_v24 = vpop.xlane.xlu0 %169 }
 0x18b   :  { %v173_v25 = vmul.f32 0.0078125, %v170_v24  ;;  %v176_v26 = vmul.f32 %v174_v23, %v174_v23 }
 0x18d   :  { %v175_v27 = vsub.f32 %v166_v20, %v173_v25  ;;  %178 = vadd.xlane.f32.xlu1 %v176_v26 }
 0x18f   :  { %v177_v28 = vmul.f32 %v175_v27, %v175_v27 }
 0x191   :  { %180 = vadd.xlane.f32.xlu1 %v177_v28 }
 0x21a   :  { %v179_v29 = vpop.xlane.xlu1 %178 }
 0x21b   :  { %v182_v30 = vmul.f32 0.0078125, %v179_v29 }
 0x21d   :  { %v184_v31 = vadd.f32 1e-05, %v182_v30 }
 0x21e   :  { %v181_v32 = vpop.xlane.xlu1 %180 }
 0x21f   :  { %266 = vrsqrt.f32 %v184_v31  ;;  %v183_v33 = vmul.f32 0.0078125, %v181_v32 }
 0x221   :  { %v185_v34 = vadd.f32 1e-05, %v183_v33 }
 0x223   :  { %268 = vrsqrt.f32 %v185_v34 }
 0x229   :  { %v267_v35 = vpop.eup %266 }
 0x22a   :  { %v188_v37 = vmul.f32 %v267_v35, %v174_v23 }
 0x22c   :  { %v197_v39 = vmul.f32 %v224_v36, %v188_v37 }
 0x22d   :  { %v269_v40 = vpop.eup %268 }
 0x22e   :  { %v206_v41 = vadd.f32 %v225_v38, %v197_v39  ;;  %v189_v42 = vmul.f32 %v269_v40, %v175_v27 }
 0x230   :  { %208 = vst [vmem:[%s361_s6] sm:$0xff] %v206_v41  ;;  %v198_v43 = vmul.f32 %v224_v36, %v189_v42 }
 0x232   :  { %v207_v44 = vadd.f32 %v225_v38, %v198_v43 }
 0x234   :  { %209 = vst [vmem:[%s361_s6 + $0x8] sm:$0xff] %v207_v44 }

// kernel: decoder_layer.9
= control target key start
LH: loop header
LB: loop body
LE: loop exit
PB: predicated region body
PF: predicated region fallthrough
CT: control target
= control target key end

     0   :  { %8 = vsyncpa [#allocation4], 0  ;;  %s488_s12 = smov [#allocation3]   ;;  %s547_s0 = inlined_call_operand.vmem [shape: f32[16,128], index: 0, kind: input, shape index: {}]   ;;  %s548_s1 = inlined_call_operand.hbm [shape: bf16[128,384], index: 1, kind: input, shape index: {}]   ;;  %s549_s2 = inlined_call_operand.vmem [shape: f32[1,384], index: 2, kind: input, shape index: {}]   ;;  %s550_s3 = inlined_call_operand.vmem [shape: bf16[16,384], index: 3, kind: output, shape index: {}]  }
   0x1   :  { %s16_s13 = sshll.u32 %s488_s12, 4  ;;  %s464_s16 = scalar_lea.hbm %s548_s1, 3072  ;;  %s17_s13 = int_to_ptr.vmem [resolvable:$true] %s16_s13 }
   0x2   :  { %p465_p0 = scmp.ne.s32.totalorder %s548_s1, %s464_s16  ;;  %p468_p1 = scmp.lt.u32.totalorder %s464_s16, %s548_s1 }
   0x4   :  { %p470_p2 = pnand %p468_p1, %p465_p0 }
   0x6   :  { %473 = shalt.err (!%p470_p2)
}
   0x7   :  { %s474_s21 = scalar_lea.vmem %s17_s13, 3072  ;;  %p479_p4 = scmp.lt.s32.totalorder %s17_s13, %s17_s13 }
   0x8   :  { %p475_p3 = scmp.ne.s32.totalorder %s17_s13, %s474_s21  ;;  %p480_p5 = scmp.lt.s32.totalorder %s474_s21, %s474_s21 }
   0xa   :  { %p481_p6 = por %p480_p5, %p479_p4 }
   0xc   :  { %p482_p7 = pnand %p481_p6, %p475_p3 }
   0xe   :  { %485 = shalt.err (!%p482_p7)
}
   0xf   :  { %s489_s22 = smov 192   ;;  %s490_s23 = smov 12  }
  0x10   :  { %22 = dma.hbm_to_vmem [thread:$0]  %s548_s1, 3072, %s17_s13, [#allocation4], %s489_s22, %s489_s22, %s490_s23  }
  0x11   :  { %486 = dma.done.wait [#allocation4], 3072  }
  0x12   :  { %487 = vsyncadd [#allocation4], 4294964224  ;;  %v491_v0 = vmov 0.0   ;;  %vm492_vm0 = vmmov 0   ;;  %v493_v1 = vmov 0   ;;  %v45_v25 = vld [vmem:[%s547_s0] sm:$0xff]  ;;  %v315_v29 = vlaneseq }
  0x13   :  { %406 = vmatprep.subr.bf16.mxu1 %v491_v0  ;;  %422 = vmatprep.mubr.msk.bf16.mxu1 %vm492_vm0, %v491_v0  ;;  %v432_v2 = vld [vmem:[#allocation3 + $0x4] ss:$12 sps:$4 sm:$0xff]   ;;  %v434_v3 = vld [vmem:[#allocation3 + $0x8] ss:$12 sps:$4 sm:$0xff]   ;;  %v435_v4 = vld [vmem:[#allocation3] ss:$12 sps:$4 sm:$0xff]  }
  0x14   :  { %240 = vmatprep.mubr.bf16.mxu0 %v493_v1  ;;  %208 = vmatprep.subr.bf16.mxu0 %v432_v2  ;;  %v436_v5 = vld [vmem:[#allocation3 + $0x1c] ss:$12 sps:$4 sm:$0xff]   ;;  %v438_v6 = vld [vmem:[#allocation3 + $0x20] ss:$12 sps:$4 sm:$0xff]   ;;  %v439_v7 = vld [vmem:[#allocation3 + $0x18] ss:$12 sps:$4 sm:$0xff]  }
  0x15   :  { %407 = vmatpush3.bf16.msra.mxu1 %v434_v3  ;;  %209 = vmatpush1.bf16.msra.mxu0 %v435_v4  ;;  %v440_v8 = vld [vmem:[#allocation3 + $0x34] ss:$12 sps:$4 sm:$0xff]   ;;  %v442_v9 = vld [vmem:[#allocation3 + $0x38] ss:$12 sps:$4 sm:$0xff]   ;;  %v443_v10 = vld [vmem:[#allocation3 + $0x30] ss:$12 sps:$4 sm:$0xff]  }
  0x16   :  { %408 = vmatprep.subr.bf16.mxu1 %v491_v0  ;;  %210 = vmatprep.subr.bf16.mxu0 %v436_v5  ;;  %v444_v11 = vld [vmem:[#allocation3 + $0x4c] ss:$12 sps:$4 sm:$0xff]   ;;  %v446_v12 = vld [vmem:[#allocation3 + $0x50] ss:$12 sps:$4 sm:$0xff]   ;;  %v447_v13 = vld [vmem:[#allocation3 + $0x48] ss:$12 sps:$4 sm:$0xff]  }
  0x17   :  { %v448_v14 = vld [vmem:[#allocation3 + $0x64] ss:$12 sps:$4 sm:$0xff]   ;;  %v450_v15 = vld [vmem:[#allocation3 + $0x68] ss:$12 sps:$4 sm:$0xff]   ;;  %v451_v16 = vld [vmem:[#allocation3 + $0x60] ss:$12 sps:$4 sm:$0xff]  }
  0x18   :  { %v452_v17 = vld [vmem:[#allocation3 + $0x7c] ss:$12 sps:$4 sm:$0xff]   ;;  %v454_v18 = vld [vmem:[#allocation3 + $0x80] ss:$12 sps:$4 sm:$0xff]   ;;  %v455_v19 = vld [vmem:[#allocation3 + $0x78] ss:$12 sps:$4 sm:$0xff]  }
  0x19   :  { %409 = vmatpush3.bf16.msra.mxu1 %v438_v6  ;;  %211 = vmatpush1.bf16.msra.mxu0 %v439_v7  ;;  %v456_v20 = vld [vmem:[#allocation3 + $0x94] ss:$12 sps:$4 sm:$0xff]   ;;  %v458_v21 = vld [vmem:[#allocation3 + $0x98] ss:$12 sps:$4 sm:$0xff]   ;;  %v459_v22 = vld [vmem:[#allocation3 + $0x90] ss:$12 sps:$4 sm:$0xff]  }
  0x1a   :  { %410 = vmatprep.subr.bf16.mxu1 %v491_v0  ;;  %212 = vmatprep.subr.bf16.mxu0 %v440_v8  ;;  %v460_v23 = vld [vmem:[#allocation3 + $0xac] ss:$12 sps:$4 sm:$0xff]   ;;  %v462_v24 = vld [vmem:[#allocation3 + $0xb0] ss:$12 sps:$4 sm:$0xff]   ;;  %v463_v27 = vld [vmem:[#allocation3 + $0xa8] ss:$12 sps:$4 sm:$0xff]  }
  0x1b   :  { %v46_v26 = vld [vmem:[%s547_s0 + $0x8] sm:$0xff]  ;;  %v316_v30 = vshrl.u32 %v315_v29, 7  ;;  %v313_v32 = vld [vmem:[%s549_s2] sm:$0x7] }
  0x1c   :  { %v47_v28 = vpack.c.bf16 %v46_v26, %v45_v25 }
  0x1d   :  { %411 = vmatpush3.bf16.msra.mxu1 %v442_v9  ;;  %213 = vmatpush1.bf16.msra.mxu0 %v443_v10  ;;  %v325_v31 = vsub.s32 2, %v316_v30  ;;  %v317_v33 = vsub.s32 0, %v316_v30  ;;  %v321_v34 = vsub.s32 1, %v316_v30 }
  0x1e   :  { %412 = vmatprep.subr.bf16.mxu1 %v491_v0  ;;  %214 = vmatprep.subr.bf16.mxu0 %v444_v11 }
  0x1f   :  { %v326_v35 = vrot.slane %v313_v32, %v325_v31  ;;  %v318_v36 = vrot.slane %v313_v32, %v317_v33  ;;  %v322_v37 = vrot.slane %v313_v32, %v321_v34 }
  0x21   :  { %413 = vmatpush3.bf16.msra.mxu1 %v446_v12  ;;  %215 = vmatpush1.bf16.msra.mxu0 %v447_v13 }
  0x22   :  { %414 = vmatprep.subr.bf16.mxu1 %v491_v0  ;;  %216 = vmatprep.subr.bf16.mxu0 %v448_v14 }
  0x25   :  { %415 = vmatpush3.bf16.msra.mxu1 %v450_v15  ;;  %217 = vmatpush1.bf16.msra.mxu0 %v451_v16 }
  0x26   :  { %416 = vmatprep.subr.bf16.mxu1 %v491_v0  ;;  %218 = vmatprep.subr.bf16.mxu0 %v452_v17 }
  0x29   :  { %417 = vmatpush3.bf16.msra.mxu1 %v454_v18  ;;  %219 = vmatpush1.bf16.msra.mxu0 %v455_v19 }
  0x2a   :  { %418 = vmatprep.subr.bf16.mxu1 %v491_v0  ;;  %220 = vmatprep.subr.bf16.mxu0 %v456_v20 }
  0x2d   :  { %419 = vmatpush3.bf16.msra.mxu1 %v458_v21  ;;  %221 = vmatpush1.bf16.msra.mxu0 %v459_v22 }
  0x2e   :  { %420 = vmatprep.subr.bf16.mxu1 %v491_v0  ;;  %222 = vmatprep.subr.bf16.mxu0 %v460_v23 }
  0x31   :  { %421 = vmatpush3.bf16.msra.mxu1 %v462_v24  ;;  %223 = vmatpush1.bf16.msra.mxu0 %v463_v27 }
  0x34   :  { %423 = vmatmul.mubr.bf16.vlgmr.msra.gmra.mrb[0].mxu1 %v47_v28  ;;  %241 = vmatmul.mubr.bf16.vlgmr.msra.gmra.mrb[0].mxu0 %v47_v28 }
 0x107   :  { %v285_v38 = vpop.f32.mrb[0].mxu1  ;;  %v242_v40 = vpop.f32.mrb[0].mxu0 }
 0x108   :  { %v332_v39 = vadd.f32 %v326_v35, %v285_v38  ;;  %v424_v41 = vpop.f32.mrb[1].mxu1  ;;  %v330_v42 = vadd.f32 %v318_v36, %v242_v40  ;;  %v244_v43 = vpop.f32.mrb[1].mxu0 }
 0x109   :  { %v288_v44 = vpop.f32.mrb[2].mxu1  ;;  %v331_v46 = vadd.f32 %v322_v37, %v244_v43  ;;  %v246_v48 = vpop.f32.mrb[2].mxu0 }
 0x10a   :  { %v394_v45 = vpack.c.bf16 %v332_v39, %v332_v39  ;;  %v335_v47 = vadd.f32 %v326_v35, %v288_v44  ;;  %v425_v49 = vpop.f32.mrb[3].mxu1  ;;  %v333_v50 = vadd.f32 %v318_v36, %v246_v48  ;;  %v248_v51 = vpop.f32.mrb[3].mxu0 }
 0x10b   :  { %v393_v52 = vpack.c.bf16 %v331_v46, %v330_v42  ;;  %v334_v54 = vadd.f32 %v322_v37, %v248_v51 }
 0x10c   :  { %357 = vst [vmem:[%s550_s3 + $0x8] sm:$0xf] %v394_v45  ;;  %v396_v53 = vpack.c.bf16 %v335_v47, %v335_v47 }
 0x10d   :  { %356 = vst [vmem:[%s550_s3] sm:$0xff] %v393_v52  ;;  %v395_v55 = vpack.c.bf16 %v334_v54, %v333_v50 }
 0x10e   :  { %359 = vst [vmem:[%s550_s3 + $0x14] sm:$0xf] %v396_v53 }
 0x10f   :  { %358 = vst [vmem:[%s550_s3 + $0xc] sm:$0xff] %v395_v55 }
 0x110   :  { %364 = vsyncpa [#allocation4], 1 }

// kernel: decoder_layer.10
= control target key start
LH: loop header
LB: loop body
LE: loop exit
PB: predicated region body
PF: predicated region fallthrough
CT: control target
= control target key end

     0   :  { %s1238_s12 = smov 0   ;;  %s1240_s13 = smov 0   ;;  %s1408_s0 = inlined_call_operand.vmem [shape: bf16[2,8,384], index: 0, kind: input, shape index: {}, may-alias: {0,1,2}]   ;;  %s1409_s1 = inlined_call_operand.vmem [shape: bf16[2,8,384], index: 1, kind: input, shape index: {}, may-alias: {0,1,2}]   ;;  %s1410_s2 = inlined_call_operand.vmem [shape: bf16[2,8,384], index: 2, kind: input, shape index: {}, may-alias: {0,1,2}]   ;;  %s1411_s3 = inlined_call_operand.vmem [shape: bf16[2,8,128], index: 3, kind: output, shape index: {}]  }
   0x1   :  { %s1242_s14 = smov 0  }
   0x2 LB: > { %s32_s15 = sadd.s32 1, %s1205_s13  ;;  %p1043_p0 = scmp.ge.s32.totalorder %s1209_s14, 1  ;;  %s1209_s14 = sphi %s1242_s14, %s13_s14   ;;  %s1205_s13 = sphi %s1240_s13, %s1413_s13   ;;  %s1201_s12 = sphi %s1238_s12, %s1412_s12  }
   0x3   : > { %p34_p1 = scmp.ge.s32.totalorder %s32_s15, 2  ;;  %p198_p2 = scmp.lt.s32.totalorder %s1209_s14, 3 }
   0x5   : > { %s1415_s15 = smov (%p34_p1, %s32_s15), 0  ;;  %p199_p3 = pnand %p1043_p0, %p198_p2 }
   0x6   : > { %p248_p4 = scmp.lt.s32.totalorder (!%p199_p3), %s1201_s12, 1  ;;  %vm298_vm0 = vcmask (!%p199_p3), 261120   ;;  %v1211_v0 = vmov (!%p199_p3), 0.0   ;;  %vm1212_vm1 = vmmov (!%p199_p3), 0   ;;  %vm289_vm2 = vcmask (!%p199_p3), 7168   ;;  %s1215_s23 = smov (!%p199_p3), 96  }
   0x7   : > { %202 = sbr.rel (%p199_p3) target bundleno = 1466 (0x5ba), region = 32  ;;  %1079 = vmatprep.subr.bf16.mxu0 (!%p199_p3), %v1211_v0  ;;  %299 = vst.msk [vmem:[#allocation4] sm:$0xff] (!%p199_p3), %vm298_vm0, %v1211_v0  ;;  %300 = vst.msk [vmem:[#allocation4 + $0x8] sm:$0xff] (!%p199_p3), %vm298_vm0, %v1211_v0  ;;  %1081 = vmatprep.mubr.msk.bf16.mxu0 (!%p199_p3), %vm1212_vm1, %v1211_v0  ;;  %v1213_v4 = vmov (!%p199_p3), -inf   ;;  %vm354_vm3 = vcmask (!%p199_p3), 64512   ;;  %v1214_v10 = vmov (!%p199_p3), 0  }
   0x8   : > { %301 = vst.msk [vmem:[#allocation4 + $0x10] sm:$0xff] (!%p199_p3), %vm298_vm0, %v1211_v0  ;;  %302 = vst.msk [vmem:[#allocation4 + $0x18] sm:$0xff] (!%p199_p3), %vm298_vm0, %v1211_v0  ;;  %1085 = vmatprep.subr.bf16.mxu1 (!%p199_p3), %v1211_v0  ;;  %1087 = vmatprep.mubr.msk.bf16.mxu1 (!%p199_p3), %vm1212_vm1, %v1211_v0  ;;  %s1216_s24 = smov (!%p199_p3), 64   ;;  %s1217_s25 = smov (!%p199_p3), 32   ;;  %vm389_vm4 = vcmask (!%p199_p3), 1043456   ;;  %vm902_vm5 = vcmask (!%p199_p3), 523264  }
   0x9   : > { %290 = vst.msk [vmem:[#allocation2] sm:$0xff] (!%p199_p3), %vm289_vm2, %v1213_v4  ;;  %291 = vst.msk [vmem:[#allocation2 + $0x8] sm:$0xff] (!%p199_p3), %vm289_vm2, %v1213_v4  ;;  %1159 = vset.pattern.permute.xlu0 (!%p199_p3), %v1214_v10  ;;  %1160 = vset.pattern.permute.xlu1 (!%p199_p3), %v1214_v10  ;;  %vm904_vm6 = vcmask (!%p199_p3), 785408  }
   0xa   : > { %292 = vst.msk [vmem:[#allocation2 + $0x10] sm:$0xff] (!%p199_p3), %vm289_vm2, %v1213_v4  ;;  %293 = vst.msk [vmem:[#allocation2 + $0x18] sm:$0xff] (!%p199_p3), %vm289_vm2, %v1213_v4 }
   0xb   : > { %294 = vst.msk [vmem:[#allocation3] sm:$0xff] (!%p199_p3), %vm289_vm2, %v1211_v0  ;;  %295 = vst.msk [vmem:[#allocation3 + $0x8] sm:$0xff] (!%p199_p3), %vm289_vm2, %v1211_v0 }
   0xc   : > { %296 = vst.msk [vmem:[#allocation3 + $0x10] sm:$0xff] (!%p199_p3), %vm289_vm2, %v1211_v0  ;;  %297 = vst.msk [vmem:[#allocation3 + $0x18] sm:$0xff] (!%p199_p3), %vm289_vm2, %v1211_v0 }
   0xe   : > { %s1417_s12 = smov (!%p248_p4, %s1201_s12), 1 }
   0xf   : > { %s1273_s16 = smul.u32 12, %s1417_s12  ;;  %s1047_s29 = sshll.u32 %s1417_s12, 2 }
  0x10   : > { %v1307_v13 = vld [vmem:[#allocation2] sm:$0xff]  ;;  %v1350_v52 = vld [vmem:[#allocation2 + $0x8] sm:$0xff]  ;;  %s283_s5 = scalar_lea.vmem %s1411_s3, %s1047_s29 }
  0x11   : > { %s979_s19 = scalar_lea.vmem %s1409_s1, %s1273_s16  ;;  %s256_s22 = scalar_lea.vmem %s1408_s0, %s1273_s16  ;;  %v631_v56 = vld [vmem:[#allocation2 + $0x10] sm:$0xff]  ;;  %v766_v60 = vld [vmem:[#allocation2 + $0x18] sm:$0xff] }
  0x12   : > { %v1048_v1 = vld [vmem:[%s979_s19 + $0x4] sm:$0xf]  ;;  %v303_v3 = vld [vmem:[%s256_s22] sm:$0xf]  ;;  %s985_s28 = scalar_lea.vmem %s1410_s2, %s1273_s16 }
  0x13   : > { %v311_v2 = vsel %vm298_vm0, %v1048_v1, 0  ;;  %v1053_v11 = vcombine.low %v1048_v1, %v1048_v1  ;;  %v1052_v12 = vcombine.low %v303_v3, %v303_v3  ;;  %v1321_v17 = vld [vmem:[%s985_s28 + $0x8] sm:$0xf] }
  0x14   : > { %1080 = vmatpush3.bf16.xpose.msra.mxu0 %v311_v2  ;;  %v391_v18 = vsel %vm389_vm4, %v1321_v17, 0  ;;  %v1055_v63 = vcombine.low %v1321_v17, %v1321_v17 }
  0x15   : > { %1097 = vmatprep.subr.bf16.mxu0 %v1211_v0  ;;  %444 = vrot.lane.b32.xlu1 %v1053_v11, %s1215_s23 }
  0x16   : > { %1086 = vmatpush3.bf16.msra.mxu1 %v391_v18 }
  0x17   : > { %1091 = vmatprep.subr.bf16.mxu1 %v1211_v0 }
  0x19   : > { %439 = vrot.lane.b32.xlu1 %v1052_v12, %s1215_s23 }
  0x1b   : > { %1082 = vmatmul.mubr.msk.bf16.vlgmr.msra.gmra.mrb[0].mxu0 %vm298_vm0, %v303_v3 }
  0x1c   : > { %1099 = vmatprep.mubr.msk.bf16.mxu0 %vm1212_vm1, %v1211_v0 }
  0x1d   : > { %582 = vrot.lane.b32.xlu1 %v1053_v11, %s1216_s24 }
  0x21   : > { %580 = vrot.lane.b32.xlu1 %v1052_v12, %s1216_s24 }
  0x25   : > { %717 = vrot.lane.b32.xlu1 %v1053_v11, %s1217_s25 }
  0x29   : > { %715 = vrot.lane.b32.xlu1 %v1052_v12, %s1217_s25 }
  0x87   : > { %v445_v22 = vpop.permute.xlu1 %444 }
  0x88   : > { %v450_v25 = vsel %vm298_vm0, %v445_v22, 0 }
  0x8b   : > { %v440_v23 = vpop.permute.xlu1 %439 }
  0x8f   : > { %v583_v27 = vpop.permute.xlu1 %582 }
  0x90   : > { %v588_v29 = vsel %vm298_vm0, %v583_v27, 0 }
  0x93   : > { %v581_v28 = vpop.permute.xlu1 %580 }
  0x97   : > { %v718_v30 = vpop.permute.xlu1 %717 }
  0x98   : > { %v723_v31 = vsel %vm298_vm0, %v718_v30, 0 }
  0x9b   : > { %v716_v32 = vpop.permute.xlu1 %715 }
  0xee   : > { %v347_v5 = vpop.f32.mrb[0].mxu0 }
  0xef   : > { %v1083_v6 = vpop.f32.mrb[1].mxu0  ;;  %v355_v7 = vsel %vm354_vm3, %v347_v5, -inf }
  0xf0   : > { %356 = vmax.xlane.f32.xlu0 %v355_v7  ;;  %v350_v8 = vpop.f32.mrb[2].mxu0 }
  0xf1   : > { %v1084_v9 = vpop.f32.mrb[3].mxu0 }
 0x17d   : > { %v357_v14 = vpop.xlane.xlu0 %356 }
 0x17e   : > { %v1310_v15 = vmax.f32 %v1307_v13, %v357_v14 }
 0x180   : > { %v359_v16 = vsub.f32 %v1307_v13, %v1310_v15  ;;  %435 = vst.msk [vmem:[#allocation2] sm:$0xff] %vm289_vm2, %v1310_v15  ;;  %364 = vperm.xlu0 %1159, %v1310_v15  }
 0x1ff   : > { %v365_v19 = vpop.permute.xlu0 %364 }
 0x200   : > { %v367_v20 = vsub.f32 %v347_v5, %v365_v19 }
 0x202   : > { %v368_v21 = vmul.f32 1.442695, %v367_v20 }
 0x204   : > { %1163 = vpow2.f32 %v368_v21 }
 0x20e   : > { %v1326_v24 = vpop.eup %1163 }
 0x20f   : > { %v385_v26 = vpack.c.bf16 %v1326_v24, %v1326_v24  ;;  %v372_v2 = vsel %vm354_vm3, %v1326_v24, 0.0 }
 0x211   : > { %1088 = vmatmul.mubr.msk.bf16.vlgmr.msra.gmra.mrb[0].mxu1 %vm354_vm3, %v385_v26 }
 0x212   : > { %1092 = vmatpush3.bf16.xpose.msra.mxu1 %v450_v25  ;;  %1093 = vmatprep.mubr.msk.bf16.mxu1 %vm1212_vm1, %v1211_v0 }
 0x213   : > { %1103 = vmatprep.subr.bf16.mxu1 %v1211_v0 }
 0x219   : > { %1094 = vmatmul.mubr.msk.bf16.vlgmr.msra.gmra.mrb[4].mxu1 %vm298_vm0, %v440_v23 }
 0x21a   : > { %1104 = vmatpush3.bf16.xpose.msra.mxu1 %v588_v29  ;;  %1105 = vmatprep.mubr.msk.bf16.mxu1 %vm1212_vm1, %v1211_v0 }
 0x21b   : > { %1115 = vmatprep.subr.bf16.mxu1 %v1211_v0 }
 0x221   : > { %1106 = vmatmul.mubr.msk.bf16.vlgmr.msra.gmra.mrb[8].mxu1 %vm298_vm0, %v581_v28  ;;  %v360_v28 = vmul.f32 1.442695, %v359_v16 }
 0x222   : > { %1116 = vmatpush3.bf16.xpose.msra.mxu1 %v723_v31  ;;  %1117 = vmatprep.mubr.msk.bf16.mxu1 %vm1212_vm1, %v1211_v0 }
 0x229   : > { %1118 = vmatmul.mubr.msk.bf16.vlgmr.msra.gmra.mrb[12].mxu1 %vm298_vm0, %v716_v32 }
 0x2e4   : > { %v1345_v33 = vpop.f32.mrb[0].mxu1 }
 0x2e5   : > { %v1089_v34 = vpop.f32.mrb[1].mxu1 }
 0x2e6   : > { %v430_v35 = vpop.f32.mrb[2].mxu1 }
 0x2e7   : > { %v1090_v36 = vpop.f32.mrb[3].mxu1 }
 0x2e8   : > { %v370_v36 = vld [vmem:[#allocation3] sm:$0xff] }
 0x2ec   : > { %v486_v37 = vpop.f32.mrb[4].mxu1 }
 0x2ed   : > { %v1095_v38 = vpop.f32.mrb[5].mxu1  ;;  %v494_v39 = vsel %vm354_vm3, %v486_v37, -inf }
 0x2ee   : > { %495 = vmax.xlane.f32.xlu1 %v494_v39  ;;  %v489_v40 = vpop.f32.mrb[6].mxu1 }
 0x2ef   : > { %v1096_v41 = vpop.f32.mrb[7].mxu1  ;;  %v510_v40 = vld [vmem:[#allocation3 + $0x8] sm:$0xff] }
 0x2f4   : > { %v624_v42 = vpop.f32.mrb[8].mxu1 }
 0x2f5   : > { %v1107_v43 = vpop.f32.mrb[9].mxu1  ;;  %v632_v44 = vsel %vm354_vm3, %v624_v42, -inf }
 0x2f6   : > { %633 = vmax.xlane.f32.xlu0 %v632_v44  ;;  %v627_v45 = vpop.f32.mrb[10].mxu1  ;;  %v648_v44 = vld [vmem:[#allocation3 + $0x10] sm:$0xff] }
 0x2f7   : > { %v1108_v46 = vpop.f32.mrb[11].mxu1 }
 0x2fc   : > { %v759_v47 = vpop.f32.mrb[12].mxu1 }
 0x2fd   : > { %v1119_v48 = vpop.f32.mrb[13].mxu1  ;;  %v767_v49 = vsel %vm354_vm3, %v759_v47, -inf }
 0x2fe   : > { %768 = vmax.xlane.f32.xlu1 %v767_v49  ;;  %v762_v50 = vpop.f32.mrb[14].mxu1  ;;  %v783_v49 = vld [vmem:[#allocation3 + $0x18] sm:$0xff] }
 0x2ff   : > { %v1120_v51 = vpop.f32.mrb[15].mxu1  ;;  %v378_v50 = vld [vmem:[#allocation4] sm:$0xff] }
 0x37b   : > { %v496_v53 = vpop.xlane.xlu1 %495 }
 0x37c   : > { %v497_v54 = vmax.f32 %v1350_v52, %v496_v53 }
 0x37e   : > { %v498_v55 = vsub.f32 %v1350_v52, %v497_v54  ;;  %579 = vst.msk [vmem:[#allocation2 + $0x8] sm:$0xff] %vm289_vm2, %v497_v54  ;;  %503 = vperm.xlu1 %1160, %v497_v54  }
 0x380   : > { %v499_v30 = vmul.f32 1.442695, %v498_v55 }
 0x383   : > { %v634_v57 = vpop.xlane.xlu0 %633 }
 0x384   : > { %v635_v58 = vmax.f32 %v631_v56, %v634_v57 }
 0x386   : > { %v636_v59 = vsub.f32 %v631_v56, %v635_v58  ;;  %714 = vst.msk [vmem:[#allocation2 + $0x10] sm:$0xff] %vm289_vm2, %v635_v58  ;;  %641 = vperm.xlu0 %1159, %v635_v58  }
 0x388   : > { %v637_v32 = vmul.f32 1.442695, %v636_v59  ;;  %v518_v59 = vld [vmem:[#allocation4 + $0x8] sm:$0xff] }
 0x38b   : > { %v769_v61 = vpop.xlane.xlu1 %768 }
 0x38c   : > { %v770_v62 = vmax.f32 %v766_v60, %v769_v61 }
 0x38e   : > { %v771_v1 = vsub.f32 %v766_v60, %v770_v62  ;;  %849 = vst.msk [vmem:[#allocation2 + $0x18] sm:$0xff] %vm289_vm2, %v770_v62  ;;  %776 = vperm.xlu1 %1160, %v770_v62  }
 0x390   : > { %v772_v31 = vmul.f32 1.442695, %v771_v1 }
 0x392   : > { %529 = vrot.lane.b32.xlu1 %v1055_v63, %s1215_s23 }
 0x396   : > { %664 = vrot.lane.b32.xlu1 %v1055_v63, %s1216_s24 }
 0x39a   : > { %799 = vrot.lane.b32.xlu1 %v1055_v63, %s1217_s25 }
 0x3be   : > { %373 = vadd.xlane.f32.xlu1 %v372_v2 }
 0x3fd   : > { %v504_v3 = vpop.permute.xlu1 %503 }
 0x3fe   : > { %v506_v4 = vsub.f32 %v486_v37, %v504_v3 }
 0x400   : > { %v507_v5 = vmul.f32 1.442695, %v506_v4  ;;  %v656_v4 = vld [vmem:[#allocation4 + $0x10] sm:$0xff] }
 0x402   : > { %1165 = vpow2.f32 %v507_v5 }
 0x405   : > { %v642_v6 = vpop.permute.xlu0 %641 }
 0x406   : > { %v644_v7 = vsub.f32 %v624_v42, %v642_v6 }
 0x408   : > { %v645_v8 = vmul.f32 1.442695, %v644_v7 }
 0x40a   : > { %1167 = vpow2.f32 %v645_v8 }
 0x40c   : > { %v1166_v9 = vpop.eup %1165 }
 0x40d   : > { %v777_v10 = vpop.permute.xlu1 %776  ;;  %v512_v11 = vsel %vm354_vm3, %v1166_v9, 0.0  ;;  %v525_v20 = vpack.c.bf16 %v1166_v9, %v1166_v9 }
 0x40e   : > { %v779_v12 = vsub.f32 %v759_v47, %v777_v10  ;;  %513 = vadd.xlane.f32.xlu0 %v512_v11  ;;  %v791_v11 = vld [vmem:[#allocation4 + $0x18] sm:$0xff] }
 0x410   : > { %v780_v14 = vmul.f32 1.442695, %v779_v12 }
 0x411   : > { %v530_v17 = vpop.permute.xlu1 %529 }
 0x412   : > { %1169 = vpow2.f32 %v780_v14  ;;  %v535_v18 = vsel %vm389_vm4, %v530_v17, 0 }
 0x413   : > { %1098 = vmatpush3.bf16.msra.mxu0 %v535_v18  ;;  %1171 = vpow2.f32 %v360_v28 }
 0x414   : > { %v1168_v19 = vpop.eup %1167  ;;  %1109 = vmatprep.subr.bf16.mxu0 %v1211_v0  ;;  %1173 = vpow2.f32 %v499_v30 }
 0x415   : > { %v650_v21 = vsel %vm354_vm3, %v1168_v19, 0.0  ;;  %v665_v22 = vpop.permute.xlu1 %664  ;;  %v663_v26 = vpack.c.bf16 %v1168_v19, %v1168_v19  ;;  %1175 = vpow2.f32 %v772_v31 }
 0x416   : > { %651 = vadd.xlane.f32.xlu0 %v650_v21  ;;  %1100 = vmatmul.mubr.msk.bf16.vlgmr.msra.gmra.mrb[4].mxu0 %vm354_vm3, %v525_v20  ;;  %v670_v23 = vsel %vm389_vm4, %v665_v22, 0  ;;  %1177 = vpow2.f32 %v637_v32 }
 0x417   : > { %1110 = vmatpush3.bf16.msra.mxu0 %v670_v23  ;;  %1111 = vmatprep.mubr.msk.bf16.mxu0 %vm1212_vm1, %v1211_v0 }
 0x418   : > { %1121 = vmatprep.subr.bf16.mxu0 %v1211_v0 }
 0x419   : > { %v800_v24 = vpop.permute.xlu1 %799 }
 0x41a   : > { %v805_v27 = vsel %vm389_vm4, %v800_v24, 0 }
 0x41c   : > { %v1170_v25 = vpop.eup %1169 }
 0x41d   : > { %v785_v29 = vsel %vm354_vm3, %v1170_v25, 0.0  ;;  %v798_v34 = vpack.c.bf16 %v1170_v25, %v1170_v25  ;;  %v1172_v13 = vpop.eup %1171 }
 0x41e   : > { %1112 = vmatmul.mubr.msk.bf16.vlgmr.msra.gmra.mrb[8].mxu0 %vm354_vm3, %v663_v26  ;;  %786 = vadd.xlane.f32.xlu1 %v785_v29  ;;  %v1174_v15 = vpop.eup %1173 }
 0x41f   : > { %1122 = vmatpush3.bf16.msra.mxu0 %v805_v27  ;;  %1123 = vmatprep.mubr.msk.bf16.mxu0 %vm1212_vm1, %v1211_v0  ;;  %v1176_v16 = vpop.eup %1175  ;;  %v371_v0 = vmul.f32 %v1172_v13, %v370_v36  ;;  %v511_v41 = vmul.f32 %v1174_v15, %v510_v40 }
 0x420   : > { %v1178_v35 = vpop.eup %1177  ;;  %v784_v51 = vmul.f32 %v1176_v16, %v783_v49 }
 0x421   : > { %v649_v45 = vmul.f32 %v1178_v35, %v648_v44 }
 0x426   : > { %1124 = vmatmul.mubr.msk.bf16.vlgmr.msra.gmra.mrb[12].mxu0 %vm354_vm3, %v798_v34 }
 0x42c   : > { %381 = vperm.xlu0 %1159, %v1172_v13  }
 0x42f   : > { %521 = vperm.xlu1 %1160, %v1174_v15  }
 0x430   : > { %794 = vperm.xlu0 %1159, %v1176_v16  }
 0x433   : > { %659 = vperm.xlu1 %1160, %v1178_v35  }
 0x44b   : > { %v374_v37 = vpop.xlane.xlu1 %373 }
 0x44c   : > { %v375_v38 = vadd.f32 %v374_v37, %v371_v0 }
 0x44e   : > { %377 = vst.msk [vmem:[#allocation3] sm:$0xff] %vm289_vm2, %v375_v38 }
 0x455   : > { %v854_v39 = vld [vmem:[#allocation3] sm:$0xff] }
 0x456   : > { %857 = vperm.xlu1 %1160, %v854_v39  }
 0x49b   : > { %v514_v42 = vpop.xlane.xlu0 %513 }
 0x49c   : > { %v515_v43 = vadd.f32 %v514_v42, %v511_v41 }
 0x49e   : > { %516 = vst.msk [vmem:[#allocation3 + $0x8] sm:$0xff] %vm289_vm2, %v515_v43 }
 0x4a3   : > { %v652_v46 = vpop.xlane.xlu0 %651 }
 0x4a4   : > { %v653_v47 = vadd.f32 %v652_v46, %v649_v45 }
 0x4a5   : > { %v863_v48 = vld [vmem:[#allocation3 + $0x8] sm:$0xff] }
 0x4a6   : > { %654 = vst.msk [vmem:[#allocation3 + $0x10] sm:$0xff] %vm289_vm2, %v653_v47  ;;  %866 = vperm.xlu0 %1159, %v863_v48  }
 0x4ab   : > { %v787_v52 = vpop.xlane.xlu1 %786  ;;  %v382_v53 = vpop.permute.xlu0 %381 }
 0x4ac   : > { %v788_v54 = vadd.f32 %v787_v52, %v784_v51  ;;  %v384_v55 = vmul.f32 %v382_v53, %v378_v50 }
 0x4ad   : > { %v872_v56 = vld [vmem:[#allocation3 + $0x10] sm:$0xff] }
 0x4ae   : > { %789 = vst.msk [vmem:[#allocation3 + $0x18] sm:$0xff] %vm289_vm2, %v788_v54  ;;  %v433_v57 = vadd.f32 %v1345_v33, %v384_v55  ;;  %875 = vperm.xlu1 %1160, %v872_v56  }
 0x4af   : > { %v522_v60 = vpop.permute.xlu1 %521  ;;  %v795_v12 = vpop.permute.xlu0 %794 }
 0x4b0   : > { %434 = vst.msk [vmem:[#allocation4] sm:$0xff] %vm298_vm0, %v433_v57  ;;  %v524_v61 = vmul.f32 %v522_v60, %v518_v59  ;;  %v797_v14 = vmul.f32 %v795_v12, %v791_v11 }
 0x4b3   : > { %v660_v5 = vpop.permute.xlu1 %659 }
 0x4b4   : > { %v662_v6 = vmul.f32 %v660_v5, %v656_v4 }
 0x4b5   : > { %v881_v58 = vld [vmem:[#allocation3 + $0x18] sm:$0xff] }
 0x4b6   : > { %884 = vperm.xlu0 %1159, %v881_v58  }
 0x4b7   : > { %v853_v16 = vld [vmem:[#allocation4] sm:$0xff] }
 0x4d5   : > { %v858_v23 = vpop.permute.xlu1 %857 }
 0x4e9   : > { %v571_v62 = vpop.f32.mrb[4].mxu0 }
 0x4ea   : > { %v577_v63 = vadd.f32 %v571_v62, %v524_v61  ;;  %v1101_v1 = vpop.f32.mrb[5].mxu0 }
 0x4eb   : > { %v574_v2 = vpop.f32.mrb[6].mxu0 }
 0x4ec   : > { %578 = vst.msk [vmem:[#allocation4 + $0x8] sm:$0xff] %vm298_vm0, %v577_v63  ;;  %v1102_v3 = vpop.f32.mrb[7].mxu0 }
 0x4f1   : > { %v706_v7 = vpop.f32.mrb[8].mxu0 }
 0x4f2   : > { %v712_v33 = vadd.f32 %v706_v7, %v662_v6  ;;  %v1113_v8 = vpop.f32.mrb[9].mxu0 }
 0x4f3   : > { %v709_v9 = vpop.f32.mrb[10].mxu0  ;;  %v862_v26 = vld [vmem:[#allocation4 + $0x8] sm:$0xff] }
 0x4f4   : > { %713 = vst.msk [vmem:[#allocation4 + $0x10] sm:$0xff] %vm298_vm0, %v712_v33  ;;  %v1114_v10 = vpop.f32.mrb[11].mxu0 }
 0x4f9   : > { %v841_v17 = vpop.f32.mrb[12].mxu0 }
 0x4fa   : > { %v847_v18 = vadd.f32 %v841_v17, %v797_v14  ;;  %v1125_v19 = vpop.f32.mrb[13].mxu0 }
 0x4fb   : > { %v844_v20 = vpop.f32.mrb[14].mxu0  ;;  %v871_v30 = vld [vmem:[#allocation4 + $0x10] sm:$0xff] }
 0x4fc   : > { %848 = vst.msk [vmem:[#allocation4 + $0x18] sm:$0xff] %vm298_vm0, %v847_v18  ;;  %v1126_v21 = vpop.f32.mrb[15].mxu0 }
 0x503   : > { %v880_v34 = vld [vmem:[#allocation4 + $0x18] sm:$0xff] }
 0x525   : > { %v867_v22 = vpop.permute.xlu0 %866 }
 0x526   : > { %1179 = vrcp.f32 %v867_v22 }
 0x52d   : > { %v876_v24 = vpop.permute.xlu1 %875 }
 0x52e   : > { %1181 = vrcp.f32 %v876_v24 }
 0x530   : > { %v1180_v25 = vpop.eup %1179 }
 0x531   : > { %v870_v27 = vmul.f32 %v1180_v25, %v862_v26 }
 0x533   : > { %890 = vrot.lane.b32.xlu1 %v870_v27, %s1217_s25 }
 0x535   : > { %v885_v28 = vpop.permute.xlu0 %884 }
 0x536   : > { %1183 = vrcp.f32 %v885_v28 }
 0x537   : > { %1185 = vrcp.f32 %v858_v23 }
 0x538   : > { %v1182_v29 = vpop.eup %1181 }
 0x539   : > { %v879_v31 = vmul.f32 %v1182_v29, %v871_v30 }
 0x53b   : > { %894 = vrot.lane.b32.xlu0 %v879_v31, %s1216_s24 }
 0x540   : > { %v1184_v32 = vpop.eup %1183 }
 0x541   : > { %v888_v13 = vmul.f32 %v1184_v32, %v880_v34  ;;  %v1186_v15 = vpop.eup %1185 }
 0x542   : > { %v861_v36 = vmul.f32 %v1186_v15, %v853_v16 }
 0x543   : > { %898 = vrot.lane.b32.xlu1 %v888_v13, %s1215_s23 }
 0x5a5   : > { %v891_v35 = vpop.permute.xlu1 %890 }
 0x5a6   : > { %v901_v37 = vsel %vm298_vm0, %v861_v36, %v891_v35 }
 0x5ad   : > { %v895_v0 = vpop.permute.xlu0 %894 }
 0x5ae   : > { %v903_v38 = vsel %vm902_vm5, %v901_v37, %v895_v0 }
 0x5b5   : > { %v899_v39 = vpop.permute.xlu1 %898 }
 0x5b6   : > { %v905_v40 = vsel %vm904_vm6, %v903_v38, %v899_v39 }
 0x5b7   : > { %v906_v41 = vpack.c.bf16 %v905_v40, %v905_v40 }
 0x5b9   : > { %907 = vst [vmem:[%s283_s5] sm:$0xf] %v906_v41 }
 0x5ba PF: > { %s13_s14 = sadd.s32 1, %s1209_s14   ;;  %s1412_s12 = smov %s1205_s13 }
 0x5bb   : > { %p10_p5 = scmp.ge.s32.totalorder %s13_s14, 4   ;;  %s1413_s13 = smov %s1415_s15 }
 0x5bd   :  { %12 = sbr.rel (!%p10_p5) target bundleno = 2 (0x2), region = 85 }

// kernel: decoder_layer.12
= control target key start
LH: loop header
LB: loop body
LE: loop exit
PB: predicated region body
PF: predicated region fallthrough
CT: control target
= control target key end

     0   :  { %v220_v0 = vmov 0.0   ;;  %vm221_vm0 = vmmov 0   ;;  %s278_s1 = inlined_call_operand.vmem [shape: bf16[128,128], index: 1, kind: input, shape index: {}]   ;;  %s279_s0 = inlined_call_operand.vmem [shape: f32[16,128], index: 0, kind: input, shape index: {}]   ;;  %s280_s2 = inlined_call_operand.vmem [shape: f32[1,128], index: 2, kind: input, shape index: {}]   ;;  %s281_s3 = inlined_call_operand.vmem [shape: bf16[16,128], index: 3, kind: output, shape index: {}]  }
   0x1   :  { %190 = vmatprep.subr.bf16.mxu0 %v220_v0  ;;  %v212_v1 = vld [vmem:[%s278_s1] sm:$0xff]   ;;  %206 = vmatprep.mubr.msk.bf16.mxu0 %vm221_vm0, %v220_v0  ;;  %v213_v2 = vld [vmem:[%s278_s1 + $0x8] sm:$0xff]   ;;  %v214_v3 = vld [vmem:[%s278_s1 + $0x10] sm:$0xff]  }
   0x2   :  { %191 = vmatpush3.bf16.msra.mxu0 %v212_v1  ;;  %v215_v4 = vld [vmem:[%s278_s1 + $0x18] sm:$0xff]   ;;  %v216_v5 = vld [vmem:[%s278_s1 + $0x20] sm:$0xff]   ;;  %v217_v6 = vld [vmem:[%s278_s1 + $0x28] sm:$0xff]  }
   0x3   :  { %192 = vmatprep.subr.bf16.mxu0 %v220_v0  ;;  %v218_v7 = vld [vmem:[%s278_s1 + $0x30] sm:$0xff]   ;;  %v219_v8 = vld [vmem:[%s278_s1 + $0x38] sm:$0xff]   ;;  %v23_v9 = vld [vmem:[%s279_s0] sm:$0xff] }
   0x4   :  { %v24_v10 = vld [vmem:[%s279_s0 + $0x8] sm:$0xff]  ;;  %v171_v13 = vld [vmem:[%s280_s2] ss:$0 sm:$0xff] }
   0x5   :  { %v25_v11 = vpack.c.bf16 %v24_v10, %v23_v9 }
   0x6   :  { %193 = vmatpush3.bf16.msra.mxu0 %v213_v2 }
   0x7   :  { %194 = vmatprep.subr.bf16.mxu0 %v220_v0 }
   0xa   :  { %195 = vmatpush3.bf16.msra.mxu0 %v214_v3 }
   0xb   :  { %196 = vmatprep.subr.bf16.mxu0 %v220_v0 }
   0xe   :  { %197 = vmatpush3.bf16.msra.mxu0 %v215_v4 }
   0xf   :  { %198 = vmatprep.subr.bf16.mxu0 %v220_v0 }
  0x12   :  { %199 = vmatpush3.bf16.msra.mxu0 %v216_v5 }
  0x13   :  { %200 = vmatprep.subr.bf16.mxu0 %v220_v0 }
  0x16   :  { %201 = vmatpush3.bf16.msra.mxu0 %v217_v6 }
  0x17   :  { %202 = vmatprep.subr.bf16.mxu0 %v220_v0 }
  0x1a   :  { %203 = vmatpush3.bf16.msra.mxu0 %v218_v7 }
  0x1b   :  { %204 = vmatprep.subr.bf16.mxu0 %v220_v0 }
  0x1e   :  { %205 = vmatpush3.bf16.msra.mxu0 %v219_v8 }
  0x21   :  { %207 = vmatmul.mubr.bf16.vlgmr.msra.gmra.mrb[0].mxu0 %v25_v11 }
  0xf4   :  { %v124_v12 = vpop.f32.mrb[0].mxu0 }
  0xf5   :  { %v208_v14 = vpop.f32.mrb[1].mxu0  ;;  %v147_v16 = vadd.f32 %v171_v13, %v124_v12 }
  0xf6   :  { %v127_v15 = vpop.f32.mrb[2].mxu0 }
  0xf7   :  { %v148_v17 = vadd.f32 %v171_v13, %v127_v15  ;;  %v209_v18 = vpop.f32.mrb[3].mxu0 }
  0xf9   :  { %v179_v19 = vpack.c.bf16 %v148_v17, %v147_v16 }
  0xfb   :  { %180 = vst [vmem:[%s281_s3] sm:$0xff] %v179_v19  }

// kernel: decoder_layer.13
= control target key start
LH: loop header
LB: loop body
LE: loop exit
PB: predicated region body
PF: predicated region fallthrough
CT: control target
= control target key end

     0   :  { %v334_v1 = vmov 0   ;;  %v219_v23 = vlaneseq  ;;  %s430_s1 = inlined_call_operand.vmem [shape: bf16[128,256], index: 1, kind: input, shape index: {}]   ;;  %s431_s0 = inlined_call_operand.vmem [shape: f32[32,128], index: 0, kind: input, shape index: {}]   ;;  %s432_s2 = inlined_call_operand.vmem [shape: f32[1,256], index: 2, kind: input, shape index: {}]   ;;  %s433_s3 = inlined_call_operand.vmem [shape: bf16[32,256], index: 3, kind: output, shape index: {}]  }
   0x1   :  { %v310_v0 = vld [vmem:[%s430_s1 + $0x4] ss:$8 sps:$4 sm:$0xff]   ;;  %169 = vmatprep.mubr.bf16.mxu0 %v334_v1  ;;  %179 = vmatprep.mubr.bf16.mxu1 %v334_v1  ;;  %v312_v2 = vld [vmem:[%s430_s1] ss:$8 sps:$4 sm:$0xff]   ;;  %v313_v3 = vld [vmem:[%s430_s1 + $0x14] ss:$8 sps:$4 sm:$0xff]  }
   0x2   :  { %137 = vmatprep.subr.bf16.mxu0 %v310_v0  ;;  %293 = vmatprep.subr.bf16.mxu1 %v310_v0  ;;  %v315_v4 = vld [vmem:[%s430_s1 + $0x10] ss:$8 sps:$4 sm:$0xff]   ;;  %v316_v5 = vld [vmem:[%s430_s1 + $0x24] ss:$8 sps:$4 sm:$0xff]   ;;  %v318_v6 = vld [vmem:[%s430_s1 + $0x20] ss:$8 sps:$4 sm:$0xff]  }
   0x3   :  { %138 = vmatpush1.bf16.msra.mxu0 %v312_v2  ;;  %301 = vmatpush1.bf16.msra.mxu1 %v312_v2  ;;  %v319_v7 = vld [vmem:[%s430_s1 + $0x34] ss:$8 sps:$4 sm:$0xff]   ;;  %v321_v8 = vld [vmem:[%s430_s1 + $0x30] ss:$8 sps:$4 sm:$0xff]   ;;  %v322_v9 = vld [vmem:[%s430_s1 + $0x44] ss:$8 sps:$4 sm:$0xff]  }
   0x4   :  { %139 = vmatprep.subr.bf16.mxu0 %v313_v3  ;;  %294 = vmatprep.subr.bf16.mxu1 %v313_v3  ;;  %v324_v10 = vld [vmem:[%s430_s1 + $0x40] ss:$8 sps:$4 sm:$0xff]   ;;  %v325_v11 = vld [vmem:[%s430_s1 + $0x54] ss:$8 sps:$4 sm:$0xff]   ;;  %v327_v12 = vld [vmem:[%s430_s1 + $0x50] ss:$8 sps:$4 sm:$0xff]  }
   0x5   :  { %v328_v13 = vld [vmem:[%s430_s1 + $0x64] ss:$8 sps:$4 sm:$0xff]   ;;  %v330_v14 = vld [vmem:[%s430_s1 + $0x60] ss:$8 sps:$4 sm:$0xff]   ;;  %v331_v15 = vld [vmem:[%s430_s1 + $0x74] ss:$8 sps:$4 sm:$0xff]  }
   0x6   :  { %v333_v16 = vld [vmem:[%s430_s1 + $0x70] ss:$8 sps:$4 sm:$0xff]   ;;  %v35_v17 = vld [vmem:[%s431_s0] sm:$0xff]  ;;  %v36_v18 = vld [vmem:[%s431_s0 + $0x8] sm:$0xff]  ;;  %v220_v24 = vshrl.u32 %v219_v23, 7 }
   0x7   :  { %140 = vmatpush1.bf16.msra.mxu0 %v315_v4  ;;  %302 = vmatpush1.bf16.msra.mxu1 %v315_v4  ;;  %v37_v19 = vld [vmem:[%s431_s0 + $0x10] sm:$0xff]  ;;  %v38_v20 = vld [vmem:[%s431_s0 + $0x18] sm:$0xff]  ;;  %v39_v21 = vpack.c.bf16 %v36_v18, %v35_v17  ;;  %v217_v26 = vld [vmem:[%s432_s2] sm:$0x3] }
   0x8   :  { %141 = vmatprep.subr.bf16.mxu0 %v316_v5  ;;  %295 = vmatprep.subr.bf16.mxu1 %v316_v5  ;;  %v40_v22 = vpack.c.bf16 %v38_v20, %v37_v19  ;;  %v221_v25 = vsub.s32 0, %v220_v24  ;;  %v225_v27 = vsub.s32 1, %v220_v24 }
   0xa   :  { %v222_v28 = vrot.slane %v217_v26, %v221_v25  ;;  %v226_v29 = vrot.slane %v217_v26, %v225_v27 }
   0xb   :  { %142 = vmatpush1.bf16.msra.mxu0 %v318_v6  ;;  %303 = vmatpush1.bf16.msra.mxu1 %v318_v6 }
   0xc   :  { %143 = vmatprep.subr.bf16.mxu0 %v319_v7  ;;  %296 = vmatprep.subr.bf16.mxu1 %v319_v7 }
   0xf   :  { %144 = vmatpush1.bf16.msra.mxu0 %v321_v8  ;;  %304 = vmatpush1.bf16.msra.mxu1 %v321_v8 }
  0x10   :  { %145 = vmatprep.subr.bf16.mxu0 %v322_v9  ;;  %297 = vmatprep.subr.bf16.mxu1 %v322_v9 }
  0x13   :  { %146 = vmatpush1.bf16.msra.mxu0 %v324_v10  ;;  %305 = vmatpush1.bf16.msra.mxu1 %v324_v10 }
  0x14   :  { %147 = vmatprep.subr.bf16.mxu0 %v325_v11  ;;  %298 = vmatprep.subr.bf16.mxu1 %v325_v11 }
  0x17   :  { %148 = vmatpush1.bf16.msra.mxu0 %v327_v12  ;;  %306 = vmatpush1.bf16.msra.mxu1 %v327_v12 }
  0x18   :  { %149 = vmatprep.subr.bf16.mxu0 %v328_v13  ;;  %299 = vmatprep.subr.bf16.mxu1 %v328_v13 }
  0x1b   :  { %150 = vmatpush1.bf16.msra.mxu0 %v330_v14  ;;  %307 = vmatpush1.bf16.msra.mxu1 %v330_v14 }
  0x1c   :  { %151 = vmatprep.subr.bf16.mxu0 %v331_v15  ;;  %300 = vmatprep.subr.bf16.mxu1 %v331_v15 }
  0x1f   :  { %152 = vmatpush1.bf16.msra.mxu0 %v333_v16  ;;  %308 = vmatpush1.bf16.msra.mxu1 %v333_v16 }
  0x22   :  { %170 = vmatmul.mubr.bf16.vlgmr.msra.gmra.mrb[0].mxu0 %v39_v21  ;;  %180 = vmatmul.mubr.bf16.vlgmr.msra.gmra.mrb[0].mxu1 %v40_v22 }
  0xf5   :  { %v171_v30 = vpop.f32.mrb[0].mxu0  ;;  %v181_v31 = vpop.f32.mrb[0].mxu1 }
  0xf6   :  { %v229_v32 = vadd.f32 %v222_v28, %v171_v30  ;;  %v233_v33 = vadd.f32 %v222_v28, %v181_v31  ;;  %v173_v34 = vpop.f32.mrb[1].mxu0  ;;  %v183_v35 = vpop.f32.mrb[1].mxu1 }
  0xf7   :  { %v230_v36 = vadd.f32 %v226_v29, %v173_v34  ;;  %v234_v37 = vadd.f32 %v226_v29, %v183_v35  ;;  %v175_v38 = vpop.f32.mrb[2].mxu0  ;;  %v185_v39 = vpop.f32.mrb[2].mxu1 }
  0xf8   :  { %v231_v40 = vadd.f32 %v222_v28, %v175_v38  ;;  %v235_v41 = vadd.f32 %v222_v28, %v185_v39  ;;  %v177_v42 = vpop.f32.mrb[3].mxu0  ;;  %v187_v43 = vpop.f32.mrb[3].mxu1 }
  0xf9   :  { %v289_v44 = vpack.c.bf16 %v230_v36, %v229_v32  ;;  %v291_v45 = vpack.c.bf16 %v234_v37, %v233_v33  ;;  %v232_v46 = vadd.f32 %v226_v29, %v177_v42  ;;  %v236_v47 = vadd.f32 %v226_v29, %v187_v43 }
  0xfb   :  { %261 = vst [vmem:[%s433_s3] sm:$0xff] %v289_v44  ;;  %263 = vst [vmem:[%s433_s3 + $0x10] sm:$0xff] %v291_v45  ;;  %v290_v48 = vpack.c.bf16 %v232_v46, %v231_v40  ;;  %v292_v49 = vpack.c.bf16 %v236_v47, %v235_v41 }
  0xfd   :  { %262 = vst [vmem:[%s433_s3 + $0x8] sm:$0xff] %v290_v48  ;;  %264 = vst [vmem:[%s433_s3 + $0x18] sm:$0xff] %v292_v49 }

// kernel: decoder_layer.16
= control target key start
LH: loop header
LB: loop body
LE: loop exit
PB: predicated region body
PF: predicated region fallthrough
CT: control target
= control target key end

     0   :  { %v502_v1 = vmov 0   ;;  %v345_v36 = vlaneseq  ;;  %s640_s1 = inlined_call_operand.vmem [shape: bf16[128,512], index: 1, kind: input, shape index: {}]   ;;  %s641_s0 = inlined_call_operand.vmem [shape: f32[16,128], index: 0, kind: input, shape index: {}]   ;;  %s642_s2 = inlined_call_operand.vmem [shape: f32[1,512], index: 2, kind: input, shape index: {}]   ;;  %s643_s3 = inlined_call_operand.vmem [shape: bf16[16,512], index: 3, kind: output, shape index: {}]  }
   0x1   :  { %v454_v0 = vld [vmem:[%s640_s1 + $0x4] ss:$16 sps:$4 sm:$0xff]   ;;  %262 = vmatprep.mubr.bf16.mxu0 %v502_v1  ;;  %305 = vmatprep.mubr.bf16.mxu1 %v502_v1  ;;  %v456_v2 = vld [vmem:[%s640_s1 + $0xc] ss:$16 sps:$4 sm:$0xff]   ;;  %v458_v3 = vld [vmem:[%s640_s1] ss:$16 sps:$4 sm:$0xff]  }
   0x2   :  { %230 = vmatprep.subr.bf16.mxu0 %v454_v0  ;;  %v459_v4 = vld [vmem:[%s640_s1 + $0x8] ss:$16 sps:$4 sm:$0xff]   ;;  %273 = vmatprep.subr.bf16.mxu1 %v456_v2  ;;  %v460_v5 = vld [vmem:[%s640_s1 + $0x24] ss:$16 sps:$4 sm:$0xff]   ;;  %v462_v6 = vld [vmem:[%s640_s1 + $0x2c] ss:$16 sps:$4 sm:$0xff]  }
   0x3   :  { %231 = vmatpush1.bf16.msra.mxu0 %v458_v3  ;;  %274 = vmatpush1.bf16.msra.mxu1 %v459_v4  ;;  %v464_v7 = vld [vmem:[%s640_s1 + $0x20] ss:$16 sps:$4 sm:$0xff]   ;;  %v465_v8 = vld [vmem:[%s640_s1 + $0x28] ss:$16 sps:$4 sm:$0xff]   ;;  %v466_v9 = vld [vmem:[%s640_s1 + $0x44] ss:$16 sps:$4 sm:$0xff]  }
   0x4   :  { %232 = vmatprep.subr.bf16.mxu0 %v460_v5  ;;  %275 = vmatprep.subr.bf16.mxu1 %v462_v6  ;;  %v468_v10 = vld [vmem:[%s640_s1 + $0x4c] ss:$16 sps:$4 sm:$0xff]   ;;  %v470_v11 = vld [vmem:[%s640_s1 + $0x40] ss:$16 sps:$4 sm:$0xff]   ;;  %v471_v12 = vld [vmem:[%s640_s1 + $0x48] ss:$16 sps:$4 sm:$0xff]  }
   0x5   :  { %v472_v13 = vld [vmem:[%s640_s1 + $0x64] ss:$16 sps:$4 sm:$0xff]   ;;  %v474_v14 = vld [vmem:[%s640_s1 + $0x6c] ss:$16 sps:$4 sm:$0xff]   ;;  %v476_v15 = vld [vmem:[%s640_s1 + $0x60] ss:$16 sps:$4 sm:$0xff]  }
   0x6   :  { %v477_v16 = vld [vmem:[%s640_s1 + $0x68] ss:$16 sps:$4 sm:$0xff]   ;;  %v478_v17 = vld [vmem:[%s640_s1 + $0x84] ss:$16 sps:$4 sm:$0xff]   ;;  %v480_v18 = vld [vmem:[%s640_s1 + $0x8c] ss:$16 sps:$4 sm:$0xff]  }
   0x7   :  { %233 = vmatpush1.bf16.msra.mxu0 %v464_v7  ;;  %276 = vmatpush1.bf16.msra.mxu1 %v465_v8  ;;  %v482_v19 = vld [vmem:[%s640_s1 + $0x80] ss:$16 sps:$4 sm:$0xff]   ;;  %v483_v20 = vld [vmem:[%s640_s1 + $0x88] ss:$16 sps:$4 sm:$0xff]   ;;  %v484_v21 = vld [vmem:[%s640_s1 + $0xa4] ss:$16 sps:$4 sm:$0xff]  }
   0x8   :  { %234 = vmatprep.subr.bf16.mxu0 %v466_v9  ;;  %277 = vmatprep.subr.bf16.mxu1 %v468_v10  ;;  %v486_v22 = vld [vmem:[%s640_s1 + $0xac] ss:$16 sps:$4 sm:$0xff]   ;;  %v488_v23 = vld [vmem:[%s640_s1 + $0xa0] ss:$16 sps:$4 sm:$0xff]   ;;  %v489_v24 = vld [vmem:[%s640_s1 + $0xa8] ss:$16 sps:$4 sm:$0xff]  }
   0x9   :  { %v490_v25 = vld [vmem:[%s640_s1 + $0xc4] ss:$16 sps:$4 sm:$0xff]   ;;  %v492_v26 = vld [vmem:[%s640_s1 + $0xcc] ss:$16 sps:$4 sm:$0xff]   ;;  %v494_v27 = vld [vmem:[%s640_s1 + $0xc0] ss:$16 sps:$4 sm:$0xff]  }
   0xa   :  { %v495_v28 = vld [vmem:[%s640_s1 + $0xc8] ss:$16 sps:$4 sm:$0xff]   ;;  %v496_v29 = vld [vmem:[%s640_s1 + $0xe4] ss:$16 sps:$4 sm:$0xff]   ;;  %v498_v30 = vld [vmem:[%s640_s1 + $0xec] ss:$16 sps:$4 sm:$0xff]  }
   0xb   :  { %235 = vmatpush1.bf16.msra.mxu0 %v470_v11  ;;  %278 = vmatpush1.bf16.msra.mxu1 %v471_v12  ;;  %v500_v31 = vld [vmem:[%s640_s1 + $0xe0] ss:$16 sps:$4 sm:$0xff]   ;;  %v501_v32 = vld [vmem:[%s640_s1 + $0xe8] ss:$16 sps:$4 sm:$0xff]   ;;  %v346_v37 = vshrl.u32 %v345_v36, 7 }
   0xc   :  { %236 = vmatprep.subr.bf16.mxu0 %v472_v13  ;;  %279 = vmatprep.subr.bf16.mxu1 %v474_v14  ;;  %v35_v33 = vld [vmem:[%s641_s0] sm:$0xff]  ;;  %v36_v34 = vld [vmem:[%s641_s0 + $0x8] sm:$0xff] }
   0xd   :  { %v37_v35 = vpack.c.bf16 %v36_v34, %v35_v33  ;;  %v347_v38 = vsub.s32 0, %v346_v37  ;;  %v355_v39 = vsub.s32 2, %v346_v37  ;;  %v343_v40 = vld [vmem:[%s642_s2] sm:$0xf]  ;;  %v351_v41 = vsub.s32 1, %v346_v37 }
   0xe   :  { %v359_v42 = vsub.s32 3, %v346_v37 }
   0xf   :  { %237 = vmatpush1.bf16.msra.mxu0 %v476_v15  ;;  %280 = vmatpush1.bf16.msra.mxu1 %v477_v16  ;;  %v348_v43 = vrot.slane %v343_v40, %v347_v38  ;;  %v356_v44 = vrot.slane %v343_v40, %v355_v39  ;;  %v352_v45 = vrot.slane %v343_v40, %v351_v41 }
  0x10   :  { %238 = vmatprep.subr.bf16.mxu0 %v478_v17  ;;  %281 = vmatprep.subr.bf16.mxu1 %v480_v18  ;;  %v360_v46 = vrot.slane %v343_v40, %v359_v42 }
  0x13   :  { %239 = vmatpush1.bf16.msra.mxu0 %v482_v19  ;;  %282 = vmatpush1.bf16.msra.mxu1 %v483_v20 }
  0x14   :  { %240 = vmatprep.subr.bf16.mxu0 %v484_v21  ;;  %283 = vmatprep.subr.bf16.mxu1 %v486_v22 }
  0x17   :  { %241 = vmatpush1.bf16.msra.mxu0 %v488_v23  ;;  %284 = vmatpush1.bf16.msra.mxu1 %v489_v24 }
  0x18   :  { %242 = vmatprep.subr.bf16.mxu0 %v490_v25  ;;  %285 = vmatprep.subr.bf16.mxu1 %v492_v26 }
  0x1b   :  { %243 = vmatpush1.bf16.msra.mxu0 %v494_v27  ;;  %286 = vmatpush1.bf16.msra.mxu1 %v495_v28 }
  0x1c   :  { %244 = vmatprep.subr.bf16.mxu0 %v496_v29  ;;  %287 = vmatprep.subr.bf16.mxu1 %v498_v30 }
  0x1f   :  { %245 = vmatpush1.bf16.msra.mxu0 %v500_v31  ;;  %288 = vmatpush1.bf16.msra.mxu1 %v501_v32 }
  0x22   :  { %263 = vmatmul.mubr.bf16.vlgmr.msra.gmra.mrb[0].mxu0 %v37_v35  ;;  %306 = vmatmul.mubr.bf16.vlgmr.msra.gmra.mrb[0].mxu1 %v37_v35 }
  0xf5   :  { %v264_v47 = vpop.f32.mrb[0].mxu0  ;;  %v307_v48 = vpop.f32.mrb[0].mxu1 }
  0xf6   :  { %v365_v49 = vadd.f32 %v348_v43, %v264_v47  ;;  %v367_v50 = vadd.f32 %v356_v44, %v307_v48  ;;  %v266_v51 = vpop.f32.mrb[1].mxu0  ;;  %v309_v52 = vpop.f32.mrb[1].mxu1 }
  0xf7   :  { %v366_v53 = vadd.f32 %v352_v45, %v266_v51  ;;  %v368_v54 = vadd.f32 %v360_v46, %v309_v52  ;;  %v268_v55 = vpop.f32.mrb[2].mxu0  ;;  %v311_v56 = vpop.f32.mrb[2].mxu1 }
  0xf8   :  { %v373_v57 = vmax.f32 %v365_v49, 0.0  ;;  %v375_v58 = vmax.f32 %v367_v50, 0.0  ;;  %v369_v59 = vadd.f32 %v348_v43, %v268_v55  ;;  %v371_v60 = vadd.f32 %v356_v44, %v311_v56  ;;  %v270_v61 = vpop.f32.mrb[3].mxu0  ;;  %v313_v62 = vpop.f32.mrb[3].mxu1 }
  0xf9   :  { %v374_v63 = vmax.f32 %v366_v53, 0.0  ;;  %v376_v0 = vmax.f32 %v368_v54, 0.0  ;;  %v370_v1 = vadd.f32 %v352_v45, %v270_v61  ;;  %v372_v2 = vadd.f32 %v360_v46, %v313_v62 }
  0xfa   :  { %v377_v3 = vmax.f32 %v369_v59, 0.0  ;;  %v379_v4 = vmax.f32 %v371_v60, 0.0 }
  0xfb   :  { %v449_v5 = vpack.c.bf16 %v374_v63, %v373_v57  ;;  %v450_v6 = vpack.c.bf16 %v376_v0, %v375_v58  ;;  %v378_v7 = vmax.f32 %v370_v1, 0.0  ;;  %v380_v8 = vmax.f32 %v372_v2, 0.0 }
  0xfd   :  { %405 = vst [vmem:[%s643_s3] sm:$0xff] %v449_v5  ;;  %406 = vst [vmem:[%s643_s3 + $0x8] sm:$0xff] %v450_v6  ;;  %v451_v9 = vpack.c.bf16 %v378_v7, %v377_v3  ;;  %v452_v10 = vpack.c.bf16 %v380_v8, %v379_v4 }
  0xff   :  { %407 = vst [vmem:[%s643_s3 + $0x10] sm:$0xff] %v451_v9  ;;  %408 = vst [vmem:[%s643_s3 + $0x18] sm:$0xff] %v452_v10 }

// kernel: decoder_layer.14
= control target key start
LH: loop header
LB: loop body
LE: loop exit
PB: predicated region body
PF: predicated region fallthrough
CT: control target
= control target key end

     0   :  { %s1328_s12 = smov 0   ;;  %s1330_s13 = smov 0   ;;  %s1538_s0 = inlined_call_operand.vmem [shape: bf16[2,8,128], index: 0, kind: input, shape index: {}]   ;;  %s1539_s1 = inlined_call_operand.vmem [shape: bf16[2,16,256], index: 1, kind: input, shape index: {}, may-alias: {1,2}]   ;;  %s1540_s2 = inlined_call_operand.vmem [shape: bf16[2,16,256], index: 2, kind: input, shape index: {}, may-alias: {1,2}]   ;;  %s1541_s3 = inlined_call_operand.vmem [shape: bf16[2,8,128], index: 3, kind: output, shape index: {}]  }
   0x1   :  { %s1332_s14 = smov 0   ;;  %s1334_s15 = smov 0  }
   0x2   :  { %s1336_s16 = smov 0  }
   0x3 LB: > { %s32_s17 = sadd.s32 1, %s1295_s15  ;;  %p76_p1 = scmp.ne.s32.totalorder %s1287_s13, %s1283_s12  ;;  %s1299_s16 = sphi %s1336_s16, %s13_s16   ;;  %s1295_s15 = sphi %s1334_s15, %s1546_s15   ;;  %s1291_s14 = sphi %s1332_s14, %s1545_s14   ;;  %s1287_s13 = sphi %s1330_s13, %s1544_s13   ;;  %s1283_s12 = sphi %s1328_s12, %s1543_s12  }
   0x4   : > { %p34_p0 = scmp.ge.s32.totalorder %s32_s17, 2  ;;  %p77_p2 = scmp.eq.s32.totalorder %s1299_s16, 0 }
   0x5   : > { %s69_s20 = sadd.s32 1, %s1287_s13  ;;  %p1093_p5 = scmp.ge.s32.totalorder %s1299_s16, 2 }
   0x6   : > { %s1548_s17 = smov (%p34_p0, %s32_s17), 0  ;;  %p1359_p3 = por %p77_p2, %p76_p1 }
   0x7   : > { %s64_s19 = ssub.s32 %s1295_s15, %s1548_s17  ;;  %158 = sbr.rel (%p1093_p5) target bundleno = 28 (0x1c), region = 16 }
   0x8   : > { %p67_p4 = scmp.eq.s32.totalorder %s64_s19, 0 }
   0xa   : > { %s1367_s21 = scalar_select %p67_p4, %s1287_s13, %s69_s20  }
   0xe   : > { %171 = sbr.rel (!%p1359_p3) target bundleno = 21 (0x15), region = 24  ;;  %s173_s22 = sand.u32 (%p1359_p3), 1, %s1287_s13  }
   0xf   : > { %s1120_s23 = sshll.u32 (%p1359_p3), %s1295_s15, 4  ;;  %s1094_s24 = sshll.u32 (%p1359_p3), %s173_s22, 3 }
  0x10   : > { %s181_s27 = scalar_lea.vmem (%p1359_p3), %s1539_s1, %s1120_s23  ;;  %s175_s28 = scalar_lea.vmem (%p1359_p3), [#allocation5], %s1094_s24 }
  0x11   : > { %v197_v0 = vld [vmem:[%s181_s27] sm:$0xf] (%p1359_p3)  ;;  %v199_v1 = vld [vmem:[%s181_s27 + $0x8] sm:$0xf] (%p1359_p3) }
  0x12   : > { %198 = vst [vmem:[%s175_s28] sm:$0xf] (%p1359_p3), %v197_v0  ;;  %200 = vst [vmem:[%s175_s28 + $0x4] sm:$0xf] (%p1359_p3), %v199_v1 }
  0x15 PF: > { %227 = sbr.rel (!%p1359_p3) target bundleno = 28 (0x1c), region = 65  ;;  %s229_s29 = sand.u32 (%p1359_p3), 1, %s1287_s13  }
  0x16   : > { %s1121_s30 = sshll.u32 (%p1359_p3), %s1295_s15, 4  ;;  %s1097_s4 = sshll.u32 (%p1359_p3), %s229_s29, 3 }
  0x17   : > { %s1011_s7 = scalar_lea.vmem (%p1359_p3), %s1540_s2, %s1121_s30  ;;  %s231_s8 = scalar_lea.vmem (%p1359_p3), [#allocation6], %s1097_s4 }
  0x18   : > { %v1100_v2 = vld [vmem:[%s1011_s7 + $0x4] sm:$0xf] (%p1359_p3)  ;;  %v1101_v3 = vld [vmem:[%s1011_s7 + $0xc] sm:$0xf] (%p1359_p3) }
  0x19   : > { %255 = vst [vmem:[%s231_s8] sm:$0xf] (%p1359_p3), %v1100_v2  ;;  %257 = vst [vmem:[%s231_s8 + $0x4] sm:$0xf] (%p1359_p3), %v1101_v3 }
  0x1c PF: > { %p1102_p6 = scmp.ge.s32.totalorder %s1299_s16, 1  ;;  %p283_p7 = scmp.lt.s32.totalorder %s1299_s16, 3 }
  0x1e   : > { %p284_p8 = pnand %p1102_p6, %p283_p7 }
  0x1f   : > { %s290_s9 = sand.u32 (!%p284_p8), 1, %s1283_s12   ;;  %vm363_vm0 = vcmask (!%p284_p8), 261120   ;;  %p333_p9 = scmp.lt.s32.totalorder (!%p284_p8), %s1291_s14, 1  ;;  %v1301_v4 = vmov (!%p284_p8), 0.0   ;;  %vm1302_vm1 = vmmov (!%p284_p8), 0   ;;  %vm354_vm2 = vcmask (!%p284_p8), 7168  }
  0x20   : > { %287 = sbr.rel (%p284_p8) target bundleno = 1482 (0x5ca), region = 106  ;;  %1138 = vmatprep.subr.bf16.mxu0 (!%p284_p8), %v1301_v4  ;;  %s1389_s10 = sshll.u32 (!%p284_p8), %s290_s9, 3  ;;  %364 = vst.msk [vmem:[#allocation4] sm:$0xff] (!%p284_p8), %vm363_vm0, %v1301_v4  ;;  %365 = vst.msk [vmem:[#allocation4 + $0x8] sm:$0xff] (!%p284_p8), %vm363_vm0, %v1301_v4  ;;  %1140 = vmatprep.mubr.msk.bf16.mxu0 (!%p284_p8), %vm1302_vm1, %v1301_v4  ;;  %v1303_v8 = vmov (!%p284_p8), -inf   ;;  %vm426_vm3 = vcmask (!%p284_p8), 130048  }
  0x21   : > { %366 = vst.msk [vmem:[#allocation4 + $0x10] sm:$0xff] (!%p284_p8), %vm363_vm0, %v1301_v4  ;;  %367 = vst.msk [vmem:[#allocation4 + $0x18] sm:$0xff] (!%p284_p8), %vm363_vm0, %v1301_v4  ;;  %1144 = vmatprep.subr.bf16.mxu1 (!%p284_p8), %v1301_v4  ;;  %1146 = vmatprep.mubr.msk.bf16.mxu1 (!%p284_p8), %vm1302_vm1, %v1301_v4  ;;  %s292_s11 = scalar_lea.vmem (!%p284_p8), [#allocation5], %s1389_s10  ;;  %v1304_v14 = vmov (!%p284_p8), 0   ;;  %s1305_s22 = smov (!%p284_p8), 96   ;;  %vm964_vm4 = vcmask (!%p284_p8), 523264  }
  0x22   : > { %v1235_v5 = vld [vmem:[%s292_s11] sm:$0xff] (!%p284_p8)   ;;  %355 = vst.msk [vmem:[#allocation2] sm:$0xff] (!%p284_p8), %vm354_vm2, %v1303_v8  ;;  %356 = vst.msk [vmem:[#allocation2 + $0x8] sm:$0xff] (!%p284_p8), %vm354_vm2, %v1303_v8  ;;  %1233 = vset.pattern.permute.xlu0 (!%p284_p8), %v1304_v14  ;;  %1234 = vset.pattern.permute.xlu1 (!%p284_p8), %v1304_v14  ;;  %s1306_s23 = smov (!%p284_p8), 64   ;;  %s1307_s24 = smov (!%p284_p8), 32   ;;  %vm966_vm5 = vcmask (!%p284_p8), 785408  }
  0x23   : > { %v383_v6 = vsel (!%p284_p8), %vm363_vm0, %v1235_v5, 0  ;;  %357 = vst.msk [vmem:[#allocation2 + $0x10] sm:$0xff] (!%p284_p8), %vm354_vm2, %v1303_v8  ;;  %358 = vst.msk [vmem:[#allocation2 + $0x18] sm:$0xff] (!%p284_p8), %vm354_vm2, %v1303_v8  ;;  %515 = vrot.lane.b32.xlu1 (!%p284_p8), %v1235_v5, %s1305_s22  ;;  %s299_s25 = scalar_lea.vmem (!%p284_p8), [#allocation6], %s1389_s10 }
  0x24   : > { %1139 = vmatpush3.bf16.xpose.msra.mxu0 (!%p284_p8), %v383_v6  ;;  %359 = vst.msk [vmem:[#allocation3] sm:$0xff] (!%p284_p8), %vm354_vm2, %v1301_v4  ;;  %360 = vst.msk [vmem:[#allocation3 + $0x8] sm:$0xff] (!%p284_p8), %vm354_vm2, %v1301_v4  ;;  %v1451_v20 = vld [vmem:[%s299_s25] sm:$0xff] (!%p284_p8)  }
  0x25   : > { %1156 = vmatprep.subr.bf16.mxu0 (!%p284_p8), %v1301_v4  ;;  %361 = vst.msk [vmem:[#allocation3 + $0x10] sm:$0xff] (!%p284_p8), %vm354_vm2, %v1301_v4  ;;  %362 = vst.msk [vmem:[#allocation3 + $0x18] sm:$0xff] (!%p284_p8), %vm354_vm2, %v1301_v4  ;;  %1145 = vmatpush3.bf16.msra.mxu1 (!%p284_p8), %v1451_v20 }
  0x26   : > { %1150 = vmatprep.subr.bf16.mxu1 (!%p284_p8), %v1301_v4 }
  0x27   : > { %s1550_s14 = smov (!%p333_p9, %s1291_s14), 1 }
  0x28   : > { %s1105_s12 = sshll.u32 %s1550_s14, 2 }
  0x29   : > { %s339_s20 = scalar_lea.vmem %s1538_s0, %s1105_s12  ;;  %v1440_v16 = vld [vmem:[#allocation2] sm:$0xff]  ;;  %v564_v54 = vld [vmem:[#allocation2 + $0x8] sm:$0xff]  ;;  %s348_s28 = scalar_lea.vmem %s1541_s3, %s1105_s12 }
  0x2a   : > { %v368_v7 = vld [vmem:[%s339_s20] sm:$0xf]  ;;  %v697_v58 = vld [vmem:[#allocation2 + $0x10] sm:$0xff]  ;;  %v830_v62 = vld [vmem:[#allocation2 + $0x18] sm:$0xff] }
  0x2b   : > { %1141 = vmatmul.mubr.msk.bf16.vlgmr.msra.gmra.mrb[0].mxu0 %vm363_vm0, %v368_v7  ;;  %v1111_v15 = vcombine.low %v368_v7, %v368_v7 }
  0x2c   : > { %1158 = vmatprep.mubr.msk.bf16.mxu0 %vm1302_vm1, %v1301_v4 }
  0x2d   : > { %513 = vrot.lane.b32.xlu1 %v1111_v15, %s1305_s22 }
  0x31   : > { %648 = vrot.lane.b32.xlu1 %v1235_v5, %s1306_s23 }
  0x35   : > { %646 = vrot.lane.b32.xlu1 %v1111_v15, %s1306_s23 }
  0x39   : > { %781 = vrot.lane.b32.xlu1 %v1235_v5, %s1307_s24 }
  0x3d   : > { %779 = vrot.lane.b32.xlu1 %v1111_v15, %s1307_s24 }
  0x95   : > { %v516_v24 = vpop.permute.xlu1 %515 }
  0x96   : > { %v521_v27 = vsel %vm363_vm0, %v516_v24, 0 }
  0x9f   : > { %v514_v25 = vpop.permute.xlu1 %513 }
  0xa3   : > { %v649_v29 = vpop.permute.xlu1 %648 }
  0xa4   : > { %v654_v31 = vsel %vm363_vm0, %v649_v29, 0 }
  0xa7   : > { %v647_v30 = vpop.permute.xlu1 %646 }
  0xab   : > { %v782_v32 = vpop.permute.xlu1 %781 }
  0xac   : > { %v787_v33 = vsel %vm363_vm0, %v782_v32, 0 }
  0xaf   : > { %v780_v34 = vpop.permute.xlu1 %779 }
  0xfe   : > { %v419_v9 = vpop.f32.mrb[0].mxu0 }
  0xff   : > { %v1142_v10 = vpop.f32.mrb[1].mxu0  ;;  %v427_v11 = vsel %vm426_vm3, %v419_v9, -inf }
 0x100   : > { %428 = vmax.xlane.f32.xlu0 %v427_v11  ;;  %v422_v12 = vpop.f32.mrb[2].mxu0 }
 0x101   : > { %v1143_v13 = vpop.f32.mrb[3].mxu0 }
 0x18d   : > { %v429_v17 = vpop.xlane.xlu0 %428 }
 0x18e   : > { %v1443_v18 = vmax.f32 %v1440_v16, %v429_v17 }
 0x190   : > { %v431_v19 = vsub.f32 %v1440_v16, %v1443_v18  ;;  %509 = vst.msk [vmem:[#allocation2] sm:$0xff] %vm354_vm2, %v1443_v18  ;;  %436 = vperm.xlu0 %1233, %v1443_v18  }
 0x20f   : > { %v437_v21 = vpop.permute.xlu0 %436 }
 0x210   : > { %v439_v22 = vsub.f32 %v419_v9, %v437_v21 }
 0x212   : > { %v440_v23 = vmul.f32 1.442695, %v439_v22 }
 0x214   : > { %1237 = vpow2.f32 %v440_v23 }
 0x21e   : > { %v1455_v26 = vpop.eup %1237 }
 0x21f   : > { %v457_v28 = vpack.c.bf16 %v1455_v26, %v1455_v26  ;;  %v444_v2 = vsel %vm426_vm3, %v1455_v26, 0.0  ;;  %v432_v26 = vmul.f32 1.442695, %v431_v19 }
 0x221   : > { %1147 = vmatmul.mubr.msk.bf16.vlgmr.msra.gmra.mrb[0].mxu1 %vm426_vm3, %v457_v28 }
 0x222   : > { %1151 = vmatpush3.bf16.xpose.msra.mxu1 %v521_v27  ;;  %1152 = vmatprep.mubr.msk.bf16.mxu1 %vm1302_vm1, %v1301_v4 }
 0x223   : > { %1162 = vmatprep.subr.bf16.mxu1 %v1301_v4 }
 0x229   : > { %1153 = vmatmul.mubr.msk.bf16.vlgmr.msra.gmra.mrb[4].mxu1 %vm363_vm0, %v514_v25 }
 0x22a   : > { %1163 = vmatpush3.bf16.xpose.msra.mxu1 %v654_v31  ;;  %1164 = vmatprep.mubr.msk.bf16.mxu1 %vm1302_vm1, %v1301_v4 }
 0x22b   : > { %1174 = vmatprep.subr.bf16.mxu1 %v1301_v4 }
 0x231   : > { %1165 = vmatmul.mubr.msk.bf16.vlgmr.msra.gmra.mrb[8].mxu1 %vm363_vm0, %v647_v30 }
 0x232   : > { %1175 = vmatpush3.bf16.xpose.msra.mxu1 %v787_v33  ;;  %1176 = vmatprep.mubr.msk.bf16.mxu1 %vm1302_vm1, %v1301_v4  ;;  %v442_v33 = vld [vmem:[#allocation3] sm:$0xff] }
 0x239   : > { %1177 = vmatmul.mubr.msk.bf16.vlgmr.msra.gmra.mrb[12].mxu1 %vm363_vm0, %v780_v34 }
 0x2f4   : > { %v1474_v35 = vpop.f32.mrb[0].mxu1 }
 0x2f5   : > { %v1148_v36 = vpop.f32.mrb[1].mxu1 }
 0x2f6   : > { %v504_v37 = vpop.f32.mrb[2].mxu1 }
 0x2f7   : > { %v1149_v38 = vpop.f32.mrb[3].mxu1 }
 0x2f8   : > { %v581_v38 = vld [vmem:[#allocation3 + $0x8] sm:$0xff] }
 0x2fc   : > { %v557_v39 = vpop.f32.mrb[4].mxu1 }
 0x2fd   : > { %v1154_v40 = vpop.f32.mrb[5].mxu1  ;;  %v565_v41 = vsel %vm426_vm3, %v557_v39, -inf }
 0x2fe   : > { %566 = vmax.xlane.f32.xlu1 %v565_v41  ;;  %v560_v42 = vpop.f32.mrb[6].mxu1 }
 0x2ff   : > { %v1155_v43 = vpop.f32.mrb[7].mxu1  ;;  %v714_v42 = vld [vmem:[#allocation3 + $0x10] sm:$0xff] }
 0x304   : > { %v690_v44 = vpop.f32.mrb[8].mxu1 }
 0x305   : > { %v1166_v45 = vpop.f32.mrb[9].mxu1  ;;  %v698_v46 = vsel %vm426_vm3, %v690_v44, -inf }
 0x306   : > { %699 = vmax.xlane.f32.xlu0 %v698_v46  ;;  %v693_v47 = vpop.f32.mrb[10].mxu1 }
 0x307   : > { %v1167_v48 = vpop.f32.mrb[11].mxu1  ;;  %v847_v47 = vld [vmem:[#allocation3 + $0x18] sm:$0xff] }
 0x308   : > { %v450_v48 = vld [vmem:[#allocation4] sm:$0xff] }
 0x30c   : > { %v823_v49 = vpop.f32.mrb[12].mxu1 }
 0x30d   : > { %v1178_v50 = vpop.f32.mrb[13].mxu1  ;;  %v831_v51 = vsel %vm426_vm3, %v823_v49, -inf }
 0x30e   : > { %832 = vmax.xlane.f32.xlu1 %v831_v51  ;;  %v826_v52 = vpop.f32.mrb[14].mxu1 }
 0x30f   : > { %v1179_v53 = vpop.f32.mrb[15].mxu1 }
 0x38b   : > { %v567_v55 = vpop.xlane.xlu1 %566 }
 0x38c   : > { %v568_v56 = vmax.f32 %v564_v54, %v567_v55 }
 0x38e   : > { %v569_v57 = vsub.f32 %v564_v54, %v568_v56  ;;  %645 = vst.msk [vmem:[#allocation2 + $0x8] sm:$0xff] %vm354_vm2, %v568_v56  ;;  %574 = vperm.xlu1 %1234, %v568_v56  }
 0x390   : > { %v570_v28 = vmul.f32 1.442695, %v569_v57  ;;  %v589_v57 = vld [vmem:[#allocation4 + $0x8] sm:$0xff] }
 0x393   : > { %v700_v59 = vpop.xlane.xlu0 %699 }
 0x394   : > { %v701_v60 = vmax.f32 %v697_v58, %v700_v59 }
 0x396   : > { %v702_v61 = vsub.f32 %v697_v58, %v701_v60  ;;  %778 = vst.msk [vmem:[#allocation2 + $0x10] sm:$0xff] %vm354_vm2, %v701_v60  ;;  %707 = vperm.xlu0 %1233, %v701_v60  }
 0x398   : > { %v703_v31 = vmul.f32 1.442695, %v702_v61 }
 0x39b   : > { %v833_v63 = vpop.xlane.xlu1 %832 }
 0x39c   : > { %v834_v0 = vmax.f32 %v830_v62, %v833_v63 }
 0x39e   : > { %v835_v1 = vsub.f32 %v830_v62, %v834_v0  ;;  %911 = vst.msk [vmem:[#allocation2 + $0x18] sm:$0xff] %vm354_vm2, %v834_v0  ;;  %840 = vperm.xlu1 %1234, %v834_v0  }
 0x3a0   : > { %v836_v29 = vmul.f32 1.442695, %v835_v1  ;;  %v722_v1 = vld [vmem:[#allocation4 + $0x10] sm:$0xff] }
 0x3a2   : > { %597 = vrot.lane.b32.xlu1 %v1451_v20, %s1305_s22 }
 0x3a6   : > { %730 = vrot.lane.b32.xlu1 %v1451_v20, %s1306_s23 }
 0x3aa   : > { %863 = vrot.lane.b32.xlu1 %v1451_v20, %s1307_s24 }
 0x3ce   : > { %445 = vadd.xlane.f32.xlu1 %v444_v2 }
 0x40d   : > { %v575_v3 = vpop.permute.xlu1 %574 }
 0x40e   : > { %v577_v5 = vsub.f32 %v557_v39, %v575_v3 }
 0x410   : > { %v578_v6 = vmul.f32 1.442695, %v577_v5 }
 0x412   : > { %1239 = vpow2.f32 %v578_v6 }
 0x415   : > { %v708_v7 = vpop.permute.xlu0 %707 }
 0x416   : > { %v710_v8 = vsub.f32 %v690_v44, %v708_v7 }
 0x418   : > { %v711_v9 = vmul.f32 1.442695, %v710_v8 }
 0x41a   : > { %1241 = vpow2.f32 %v711_v9  ;;  %v855_v9 = vld [vmem:[#allocation4 + $0x18] sm:$0xff] }
 0x41c   : > { %v1240_v10 = vpop.eup %1239 }
 0x41d   : > { %v841_v11 = vpop.permute.xlu1 %840  ;;  %v583_v12 = vsel %vm426_vm3, %v1240_v10, 0.0  ;;  %v596_v17 = vpack.c.bf16 %v1240_v10, %v1240_v10 }
 0x41e   : > { %v843_v13 = vsub.f32 %v823_v49, %v841_v11  ;;  %584 = vadd.xlane.f32.xlu0 %v583_v12 }
 0x420   : > { %v844_v14 = vmul.f32 1.442695, %v843_v13 }
 0x421   : > { %v598_v15 = vpop.permute.xlu1 %597 }
 0x422   : > { %1243 = vpow2.f32 %v844_v14  ;;  %1157 = vmatpush3.bf16.msra.mxu0 %v598_v15 }
 0x423   : > { %1168 = vmatprep.subr.bf16.mxu0 %v1301_v4  ;;  %1245 = vpow2.f32 %v432_v26 }
 0x424   : > { %v1242_v20 = vpop.eup %1241  ;;  %1247 = vpow2.f32 %v570_v28 }
 0x425   : > { %1159 = vmatmul.mubr.msk.bf16.vlgmr.msra.gmra.mrb[4].mxu0 %vm426_vm3, %v596_v17  ;;  %v716_v21 = vsel %vm426_vm3, %v1242_v20, 0.0  ;;  %v731_v22 = vpop.permute.xlu1 %730  ;;  %v729_v23 = vpack.c.bf16 %v1242_v20, %v1242_v20  ;;  %1249 = vpow2.f32 %v836_v29 }
 0x426   : > { %717 = vadd.xlane.f32.xlu0 %v716_v21  ;;  %1169 = vmatpush3.bf16.msra.mxu0 %v731_v22  ;;  %1251 = vpow2.f32 %v703_v31 }
 0x427   : > { %1170 = vmatprep.mubr.msk.bf16.mxu0 %vm1302_vm1, %v1301_v4  ;;  %1180 = vmatprep.subr.bf16.mxu0 %v1301_v4 }
 0x429   : > { %v864_v24 = vpop.permute.xlu1 %863 }
 0x42c   : > { %v1244_v25 = vpop.eup %1243 }
 0x42d   : > { %1171 = vmatmul.mubr.msk.bf16.vlgmr.msra.gmra.mrb[8].mxu0 %vm426_vm3, %v729_v23  ;;  %v849_v27 = vsel %vm426_vm3, %v1244_v25, 0.0  ;;  %v862_v30 = vpack.c.bf16 %v1244_v25, %v1244_v25  ;;  %v1246_v16 = vpop.eup %1245 }
 0x42e   : > { %850 = vadd.xlane.f32.xlu1 %v849_v27  ;;  %1181 = vmatpush3.bf16.msra.mxu0 %v864_v24  ;;  %v1248_v18 = vpop.eup %1247 }
 0x42f   : > { %1182 = vmatprep.mubr.msk.bf16.mxu0 %vm1302_vm1, %v1301_v4  ;;  %v1250_v19 = vpop.eup %1249  ;;  %v443_v4 = vmul.f32 %v1246_v16, %v442_v33  ;;  %v582_v39 = vmul.f32 %v1248_v18, %v581_v38 }
 0x430   : > { %v1252_v32 = vpop.eup %1251  ;;  %v848_v49 = vmul.f32 %v1250_v19, %v847_v47 }
 0x431   : > { %v715_v43 = vmul.f32 %v1252_v32, %v714_v42 }
 0x435   : > { %1183 = vmatmul.mubr.msk.bf16.vlgmr.msra.gmra.mrb[12].mxu0 %vm426_vm3, %v862_v30 }
 0x43c   : > { %453 = vperm.xlu0 %1233, %v1246_v16  }
 0x43f   : > { %592 = vperm.xlu1 %1234, %v1248_v18  }
 0x440   : > { %858 = vperm.xlu0 %1233, %v1250_v19  }
 0x443   : > { %725 = vperm.xlu1 %1234, %v1252_v32  }
 0x45b   : > { %v446_v34 = vpop.xlane.xlu1 %445 }
 0x45c   : > { %v447_v36 = vadd.f32 %v446_v34, %v443_v4 }
 0x45e   : > { %449 = vst.msk [vmem:[#allocation3] sm:$0xff] %vm354_vm2, %v447_v36 }
 0x465   : > { %v916_v37 = vld [vmem:[#allocation3] sm:$0xff] }
 0x466   : > { %919 = vperm.xlu1 %1234, %v916_v37  }
 0x4ab   : > { %v585_v40 = vpop.xlane.xlu0 %584 }
 0x4ac   : > { %v586_v41 = vadd.f32 %v585_v40, %v582_v39 }
 0x4ae   : > { %587 = vst.msk [vmem:[#allocation3 + $0x8] sm:$0xff] %vm354_vm2, %v586_v41 }
 0x4b3   : > { %v718_v44 = vpop.xlane.xlu0 %717 }
 0x4b4   : > { %v719_v45 = vadd.f32 %v718_v44, %v715_v43 }
 0x4b5   : > { %v925_v46 = vld [vmem:[#allocation3 + $0x8] sm:$0xff] }
 0x4b6   : > { %720 = vst.msk [vmem:[#allocation3 + $0x10] sm:$0xff] %vm354_vm2, %v719_v45  ;;  %928 = vperm.xlu0 %1233, %v925_v46  }
 0x4bb   : > { %v851_v50 = vpop.xlane.xlu1 %850  ;;  %v454_v51 = vpop.permute.xlu0 %453 }
 0x4bc   : > { %v852_v52 = vadd.f32 %v851_v50, %v848_v49  ;;  %v456_v53 = vmul.f32 %v454_v51, %v450_v48 }
 0x4bd   : > { %v934_v54 = vld [vmem:[#allocation3 + $0x10] sm:$0xff] }
 0x4be   : > { %853 = vst.msk [vmem:[#allocation3 + $0x18] sm:$0xff] %vm354_vm2, %v852_v52  ;;  %v507_v55 = vadd.f32 %v1474_v35, %v456_v53  ;;  %937 = vperm.xlu1 %1234, %v934_v54  }
 0x4bf   : > { %v593_v58 = vpop.permute.xlu1 %592  ;;  %v859_v10 = vpop.permute.xlu0 %858 }
 0x4c0   : > { %508 = vst.msk [vmem:[#allocation4] sm:$0xff] %vm363_vm0, %v507_v55  ;;  %v595_v59 = vmul.f32 %v593_v58, %v589_v57  ;;  %v861_v11 = vmul.f32 %v859_v10, %v855_v9 }
 0x4c3   : > { %v726_v2 = vpop.permute.xlu1 %725 }
 0x4c4   : > { %v728_v3 = vmul.f32 %v726_v2, %v722_v1 }
 0x4c5   : > { %v943_v56 = vld [vmem:[#allocation3 + $0x18] sm:$0xff] }
 0x4c6   : > { %946 = vperm.xlu0 %1233, %v943_v56  }
 0x4c7   : > { %v915_v19 = vld [vmem:[#allocation4] sm:$0xff] }
 0x4e5   : > { %v920_v21 = vpop.permute.xlu1 %919 }
 0x4f8   : > { %v637_v60 = vpop.f32.mrb[4].mxu0 }
 0x4f9   : > { %v643_v61 = vadd.f32 %v637_v60, %v595_v59  ;;  %v1160_v62 = vpop.f32.mrb[5].mxu0 }
 0x4fa   : > { %v640_v63 = vpop.f32.mrb[6].mxu0 }
 0x4fb   : > { %644 = vst.msk [vmem:[#allocation4 + $0x8] sm:$0xff] %vm363_vm0, %v643_v61  ;;  %v1161_v0 = vpop.f32.mrb[7].mxu0 }
 0x500   : > { %v770_v5 = vpop.f32.mrb[8].mxu0 }
 0x501   : > { %v776_v35 = vadd.f32 %v770_v5, %v728_v3  ;;  %v1172_v6 = vpop.f32.mrb[9].mxu0 }
 0x502   : > { %v773_v7 = vpop.f32.mrb[10].mxu0  ;;  %v924_v24 = vld [vmem:[#allocation4 + $0x8] sm:$0xff] }
 0x503   : > { %777 = vst.msk [vmem:[#allocation4 + $0x10] sm:$0xff] %vm363_vm0, %v776_v35  ;;  %v1173_v8 = vpop.f32.mrb[11].mxu0 }
 0x508   : > { %v903_v12 = vpop.f32.mrb[12].mxu0 }
 0x509   : > { %v909_v13 = vadd.f32 %v903_v12, %v861_v11  ;;  %v1184_v14 = vpop.f32.mrb[13].mxu0 }
 0x50a   : > { %v906_v15 = vpop.f32.mrb[14].mxu0  ;;  %v933_v28 = vld [vmem:[#allocation4 + $0x10] sm:$0xff] }
 0x50b   : > { %910 = vst.msk [vmem:[#allocation4 + $0x18] sm:$0xff] %vm363_vm0, %v909_v13  ;;  %v1185_v17 = vpop.f32.mrb[15].mxu0 }
 0x512   : > { %v942_v31 = vld [vmem:[#allocation4 + $0x18] sm:$0xff] }
 0x535   : > { %v929_v20 = vpop.permute.xlu0 %928 }
 0x536   : > { %1253 = vrcp.f32 %v929_v20 }
 0x53d   : > { %v938_v22 = vpop.permute.xlu1 %937 }
 0x53e   : > { %1255 = vrcp.f32 %v938_v22 }
 0x540   : > { %v1254_v23 = vpop.eup %1253 }
 0x541   : > { %v932_v25 = vmul.f32 %v1254_v23, %v924_v24 }
 0x543   : > { %952 = vrot.lane.b32.xlu1 %v932_v25, %s1307_s24 }
 0x545   : > { %v947_v26 = vpop.permute.xlu0 %946 }
 0x546   : > { %1257 = vrcp.f32 %v947_v26 }
 0x547   : > { %1259 = vrcp.f32 %v920_v21 }
 0x548   : > { %v1256_v27 = vpop.eup %1255 }
 0x549   : > { %v941_v29 = vmul.f32 %v1256_v27, %v933_v28 }
 0x54b   : > { %956 = vrot.lane.b32.xlu0 %v941_v29, %s1306_s23 }
 0x550   : > { %v1258_v30 = vpop.eup %1257 }
 0x551   : > { %v950_v16 = vmul.f32 %v1258_v30, %v942_v31  ;;  %v1260_v18 = vpop.eup %1259 }
 0x552   : > { %v923_v33 = vmul.f32 %v1260_v18, %v915_v19 }
 0x553   : > { %960 = vrot.lane.b32.xlu1 %v950_v16, %s1305_s22 }
 0x5b5   : > { %v953_v32 = vpop.permute.xlu1 %952 }
 0x5b6   : > { %v963_v34 = vsel %vm363_vm0, %v923_v33, %v953_v32 }
 0x5bd   : > { %v957_v4 = vpop.permute.xlu0 %956 }
 0x5be   : > { %v965_v36 = vsel %vm964_vm4, %v963_v34, %v957_v4 }
 0x5c5   : > { %v961_v37 = vpop.permute.xlu1 %960 }
 0x5c6   : > { %v967_v38 = vsel %vm966_vm5, %v965_v36, %v961_v37 }
 0x5c7   : > { %v968_v39 = vpack.c.bf16 %v967_v38, %v967_v38 }
 0x5c9   : > { %969 = vst [vmem:[%s348_s28] sm:$0xf] %v968_v39 }
 0x5ca PF: > { %s13_s16 = sadd.s32 1, %s1299_s16   ;;  %s1543_s12 = smov %s1287_s13 }
 0x5cb   : > { %p10_p10 = scmp.ge.s32.totalorder %s13_s16, 4   ;;  %s1544_s13 = smov %s1367_s21 }
 0x5cc   : > { %s1545_s14 = smov %s1295_s15  ;;  %s1546_s15 = smov %s1548_s17 }
 0x5cd   :  { %12 = sbr.rel (!%p10_p10) target bundleno = 3 (0x3), region = 177 }

// kernel: decoder_layer.17
= control target key start
LH: loop header
LB: loop body
LE: loop exit
PB: predicated region body
PF: predicated region fallthrough
CT: control target
= control target key end

     0   :  { %s801_s0 = inlined_call_operand.vmem [shape: bf16[16,512], index: 0, kind: input, shape index: {}]   ;;  %s802_s1 = inlined_call_operand.vmem [shape: bf16[512,128], index: 1, kind: input, shape index: {}]   ;;  %s803_s2 = inlined_call_operand.vmem [shape: f32[1,128], index: 2, kind: input, shape index: {}]   ;;  %s804_s3 = inlined_call_operand.vmem [shape: f32[16,128], index: 3, kind: input, shape index: {}]   ;;  %s805_s4 = inlined_call_operand.vmem [shape: f32[1,128], index: 4, kind: input, shape index: {}]   ;;  %s806_s5 = inlined_call_operand.vmem [shape: f32[1,128], index: 5, kind: input, shape index: {}]   ;;  %s807_s6 = inlined_call_operand.hbm [shape: f32[16,128], index: 6, kind: output, shape index: {}]  }
   0x1   :  { %v562_v0 = vld [vmem:[%s802_s1 + $0x40] sm:$0xff]   ;;  %v566_v4 = vld [vmem:[%s802_s1 + $0x48] sm:$0xff]   ;;  %v570_v8 = vld [vmem:[%s802_s1 + $0x50] sm:$0xff]  }
   0x2   :  { %v563_v1 = vld [vmem:[%s802_s1 + $0xc0] sm:$0xff]   ;;  %515 = vmatprep.subr.bf16.mxu0 %v562_v0  ;;  %v567_v5 = vld [vmem:[%s802_s1 + $0xc8] sm:$0xff]   ;;  %v571_v9 = vld [vmem:[%s802_s1 + $0xd0] sm:$0xff]  }
   0x3   :  { %v564_v2 = vld [vmem:[%s802_s1] sm:$0xff]   ;;  %537 = vmatprep.subr.bf16.mxu1 %v563_v1  ;;  %v568_v6 = vld [vmem:[%s802_s1 + $0x8] sm:$0xff]   ;;  %v572_v10 = vld [vmem:[%s802_s1 + $0x10] sm:$0xff]  }
   0x4   :  { %v565_v3 = vld [vmem:[%s802_s1 + $0x80] sm:$0xff]   ;;  %516 = vmatpush3.bf16.msra.mxu0 %v564_v2  ;;  %v569_v7 = vld [vmem:[%s802_s1 + $0x88] sm:$0xff]   ;;  %v573_v11 = vld [vmem:[%s802_s1 + $0x90] sm:$0xff]  }
   0x5   :  { %538 = vmatpush3.bf16.msra.mxu1 %v565_v3  ;;  %517 = vmatprep.subr.bf16.mxu0 %v566_v4  ;;  %v574_v12 = vld [vmem:[%s802_s1 + $0x58] sm:$0xff]   ;;  %v578_v16 = vld [vmem:[%s802_s1 + $0x60] sm:$0xff]   ;;  %v582_v20 = vld [vmem:[%s802_s1 + $0x68] sm:$0xff]  }
   0x6   :  { %539 = vmatprep.subr.bf16.mxu1 %v567_v5  ;;  %v575_v13 = vld [vmem:[%s802_s1 + $0xd8] sm:$0xff]   ;;  %v579_v17 = vld [vmem:[%s802_s1 + $0xe0] sm:$0xff]   ;;  %v583_v21 = vld [vmem:[%s802_s1 + $0xe8] sm:$0xff]  }
   0x7   :  { %v576_v14 = vld [vmem:[%s802_s1 + $0x18] sm:$0xff]   ;;  %v580_v18 = vld [vmem:[%s802_s1 + $0x20] sm:$0xff]   ;;  %v584_v22 = vld [vmem:[%s802_s1 + $0x28] sm:$0xff]  }
   0x8   :  { %518 = vmatpush3.bf16.msra.mxu0 %v568_v6  ;;  %v577_v15 = vld [vmem:[%s802_s1 + $0x98] sm:$0xff]   ;;  %v581_v19 = vld [vmem:[%s802_s1 + $0xa0] sm:$0xff]   ;;  %v585_v23 = vld [vmem:[%s802_s1 + $0xa8] sm:$0xff]  }
   0x9   :  { %540 = vmatpush3.bf16.msra.mxu1 %v569_v7  ;;  %519 = vmatprep.subr.bf16.mxu0 %v570_v8  ;;  %v586_v24 = vld [vmem:[%s802_s1 + $0x70] sm:$0xff]   ;;  %v590_v28 = vld [vmem:[%s802_s1 + $0x78] sm:$0xff]  }
   0xa   :  { %541 = vmatprep.subr.bf16.mxu1 %v571_v9  ;;  %v587_v25 = vld [vmem:[%s802_s1 + $0xf0] sm:$0xff]   ;;  %v591_v29 = vld [vmem:[%s802_s1 + $0xf8] sm:$0xff]  }
   0xb   :  { %v588_v26 = vld [vmem:[%s802_s1 + $0x30] sm:$0xff]   ;;  %v592_v30 = vld [vmem:[%s802_s1 + $0x38] sm:$0xff]  }
   0xc   :  { %520 = vmatpush3.bf16.msra.mxu0 %v572_v10  ;;  %v589_v27 = vld [vmem:[%s802_s1 + $0xb0] sm:$0xff]   ;;  %v593_v31 = vld [vmem:[%s802_s1 + $0xb8] sm:$0xff]  }
   0xd   :  { %542 = vmatpush3.bf16.msra.mxu1 %v573_v11  ;;  %521 = vmatprep.subr.bf16.mxu0 %v574_v12  ;;  %v594_v32 = vld [vmem:[%s801_s0] ss:$16 sps:$4 sm:$0xff]   ;;  %v596_v33 = vld [vmem:[%s801_s0 + $0x4] ss:$16 sps:$4 sm:$0xff]   ;;  %v597_v34 = vld [vmem:[%s801_s0 + $0x8] ss:$16 sps:$4 sm:$0xff]  }
   0xe   :  { %543 = vmatprep.subr.bf16.mxu1 %v575_v13  ;;  %v599_v35 = vld [vmem:[%s801_s0 + $0xc] ss:$16 sps:$4 sm:$0xff]  }
  0x10   :  { %522 = vmatpush3.bf16.msra.mxu0 %v576_v14 }
  0x11   :  { %544 = vmatpush3.bf16.msra.mxu1 %v577_v15  ;;  %523 = vmatprep.subr.bf16.mxu0 %v578_v16 }
  0x12   :  { %545 = vmatprep.subr.bf16.mxu1 %v579_v17 }
  0x14   :  { %524 = vmatpush3.bf16.msra.mxu0 %v580_v18 }
  0x15   :  { %546 = vmatpush3.bf16.msra.mxu1 %v581_v19  ;;  %525 = vmatprep.subr.bf16.mxu0 %v582_v20 }
  0x16   :  { %547 = vmatprep.subr.bf16.mxu1 %v583_v21 }
  0x18   :  { %526 = vmatpush3.bf16.msra.mxu0 %v584_v22 }
  0x19   :  { %548 = vmatpush3.bf16.msra.mxu1 %v585_v23  ;;  %527 = vmatprep.subr.bf16.mxu0 %v586_v24 }
  0x1a   :  { %549 = vmatprep.subr.bf16.mxu1 %v587_v25 }
  0x1c   :  { %528 = vmatpush3.bf16.msra.mxu0 %v588_v26 }
  0x1d   :  { %550 = vmatpush3.bf16.msra.mxu1 %v589_v27  ;;  %529 = vmatprep.subr.bf16.mxu0 %v590_v28 }
  0x1e   :  { %551 = vmatprep.subr.bf16.mxu1 %v591_v29 }
  0x20   :  { %530 = vmatpush3.bf16.msra.mxu0 %v592_v30 }
  0x21   :  { %552 = vmatpush3.bf16.msra.mxu1 %v593_v31 }
  0x22   :  { %11 = vsyncpa [#allocation4], 0  ;;  %345 = vmatprep.mubr.bf16.mxu0 %v596_v33  ;;  %386 = vmatprep.mubr.bf16.mxu1 %v599_v35  ;;  %v402_v47 = vld [vmem:[%s804_s3] sm:$0xff]  ;;  %v403_v51 = vld [vmem:[%s804_s3 + $0x8] sm:$0xff]  ;;  %s628_s27 = smov [#allocation3]  }
  0x23   :  { %346 = vmatmul.mubr.bf16.vlgmr.msra.gmra.mrb[0].mxu0 %v594_v32  ;;  %v512_v50 = vld [vmem:[%s803_s2] ss:$0 sm:$0xff]  ;;  %s465_s28 = sshll.u32 %s628_s27, 4  ;;  %s466_s28 = int_to_ptr.vmem [resolvable:$true] %s465_s28 }
  0x24   :  { %387 = vmatmul.mubr.bf16.vlgmr.msra.gmra.mrb[0].mxu1 %v597_v34  ;;  %v513_v8 = vld [vmem:[%s805_s4] ss:$0 sm:$0xff]  ;;  %s604_s29 = scalar_lea.vmem %s466_s28, 256  ;;  %p609_p1 = scmp.lt.s32.totalorder %s466_s28, %s466_s28 }
  0x25   :  { %v514_v10 = vld [vmem:[%s806_s5] ss:$0 sm:$0xff]  ;;  %p605_p0 = scmp.ne.s32.totalorder %s466_s28, %s604_s29  ;;  %p610_p2 = scmp.lt.s32.totalorder %s604_s29, %s604_s29 }
  0x27   :  { %p611_p3 = por %p610_p2, %p609_p1 }
  0x29   :  { %p612_p4 = pnand %p611_p3, %p605_p0 }
  0xf6   :  { %v531_v36 = vpop.f32.mrb[0].mxu0 }
  0xf7   :  { %v553_v37 = vpop.f32.mrb[0].mxu1  ;;  %v532_v38 = vpop.f32.mrb[1].mxu0 }
  0xf8   :  { %v533_v39 = vadd.f32 %v532_v38, %v531_v36  ;;  %v554_v40 = vpop.f32.mrb[1].mxu1  ;;  %v534_v41 = vpop.f32.mrb[2].mxu0 }
  0xf9   :  { %v555_v42 = vadd.f32 %v554_v40, %v553_v37  ;;  %v556_v43 = vpop.f32.mrb[2].mxu1  ;;  %v535_v44 = vpop.f32.mrb[3].mxu0 }
  0xfa   :  { %v536_v45 = vadd.f32 %v535_v44, %v534_v41  ;;  %v557_v46 = vpop.f32.mrb[3].mxu1 }
  0xfb   :  { %v389_v48 = vadd.f32 %v555_v42, %v533_v39  ;;  %v558_v49 = vadd.f32 %v557_v46, %v556_v43 }
  0xfd   :  { %v392_v52 = vadd.f32 %v558_v49, %v536_v45  ;;  %v406_v53 = vadd.f32 %v402_v47, %v389_v48 }
  0xff   :  { %v415_v54 = vadd.f32 %v512_v50, %v406_v53  ;;  %v407_v55 = vadd.f32 %v403_v51, %v392_v52 }
 0x101   :  { %417 = vadd.xlane.f32.xlu0 %v415_v54  ;;  %v416_v56 = vadd.f32 %v512_v50, %v407_v55 }
 0x105   :  { %419 = vadd.xlane.f32.xlu0 %v416_v56 }
 0x18e   :  { %v418_v57 = vpop.xlane.xlu0 %417 }
 0x18f   :  { %v422_v58 = vmul.f32 0.0078125, %v418_v57 }
 0x191   :  { %v424_v59 = vsub.f32 %v415_v54, %v422_v58 }
 0x192   :  { %v420_v60 = vpop.xlane.xlu0 %419 }
 0x193   :  { %v423_v61 = vmul.f32 0.0078125, %v420_v60  ;;  %v426_v62 = vmul.f32 %v424_v59, %v424_v59 }
 0x195   :  { %v425_v63 = vsub.f32 %v416_v56, %v423_v61  ;;  %428 = vadd.xlane.f32.xlu1 %v426_v62 }
 0x197   :  { %v427_v0 = vmul.f32 %v425_v63, %v425_v63 }
 0x199   :  { %430 = vadd.xlane.f32.xlu1 %v427_v0 }
 0x222   :  { %v429_v1 = vpop.xlane.xlu1 %428 }
 0x223   :  { %v432_v2 = vmul.f32 0.0078125, %v429_v1 }
 0x225   :  { %v434_v3 = vadd.f32 1e-05, %v432_v2 }
 0x226   :  { %v431_v4 = vpop.xlane.xlu1 %430 }
 0x227   :  { %600 = vrsqrt.f32 %v434_v3  ;;  %v433_v5 = vmul.f32 0.0078125, %v431_v4 }
 0x229   :  { %v435_v6 = vadd.f32 1e-05, %v433_v5 }
 0x22b   :  { %602 = vrsqrt.f32 %v435_v6 }
 0x231   :  { %v601_v7 = vpop.eup %600 }
 0x232   :  { %v438_v9 = vmul.f32 %v601_v7, %v424_v59 }
 0x234   :  { %v447_v11 = vmul.f32 %v513_v8, %v438_v9 }
 0x235   :  { %v603_v12 = vpop.eup %602 }
 0x236   :  { %v439_v13 = vmul.f32 %v603_v12, %v425_v63  ;;  %v456_v14 = vadd.f32 %v514_v10, %v447_v11 }
 0x238   :  { %v448_v15 = vmul.f32 %v513_v8, %v439_v13  ;;  %458 = vst [vmem:[#allocation3] sm:$0xff] %v456_v14 }
 0x23a   :  { %v457_v16 = vadd.f32 %v514_v10, %v448_v15 }
 0x23c   :  { %459 = vst [vmem:[#allocation3 + $0x8] sm:$0xff] %v457_v16 }
 0x23d   :  { %615 = shalt.err (!%p612_p4)
}
 0x23e   :  { %s616_s30 = scalar_lea.hbm %s807_s6, 256 }
 0x23f   :  { %p617_p5 = scmp.ne.s32.totalorder %s807_s6, %s616_s30  ;;  %p620_p6 = scmp.lt.u32.totalorder %s616_s30, %s807_s6 }
 0x241   :  { %p622_p7 = pnand %p620_p6, %p617_p5 }
 0x243   :  { %625 = shalt.err (!%p622_p7)
}
 0x244   :  { %s629_s11 = smov 128   ;;  %s630_s12 = smov 8  }
 0x245   :  { %471 = dma.vmem_to_hbm [thread:$0]  %s466_s28, 256, %s807_s6, [#allocation4], %s629_s11, %s629_s11, %s630_s12  }
 0x246   :  { %626 = dma.done.wait [#allocation4], 256  }
 0x247   :  { %627 = vsyncadd [#allocation4], 4294967040 }
 0x248   :  { %475 = vsyncpa [#allocation4], 1 }

</bundles_post_ra>
